<compile_context>
chip_gen: v7x
topology: tpu7x:2x2x1
jax: 0.10.0
libtpu: 0.0.40
codegen_flags: <defaults>
</compile_context>

<pallas_src>
import functools

import jax
import jax.numpy as jnp
from jax.experimental import pallas as pl
from jax.experimental.pallas import tpu as pltpu

POS_WEIGHT = 2.4        # matches torch.nn.BCEWithLogitsLoss(pos_weight=torch.tensor(2.4))
LANES = 128
STRIP_ROWS = 256        # rows per in-kernel strip: (256,128) f32 = 128 KiB live working set
MAX_BLOCK_ROWS = 4096   # per-grid-step HBM tile (multiple of STRIP_ROWS)


def _round_up(x, m):
    return ((x + m - 1) // m) * m


def _pcr_loss_kernel(logits_ref, targets_ref, out_ref, *, total_elems, block_rows,
                     blocks_per_core, first_masked_block):
    c = pl.program_id(0)     # TensorCore-parallel axis (v7x megacore split)
    i = pl.program_id(1)     # sequential row-block (reduction) axis

    @pl.when(i == 0)
    def _():
        out_ref[...] = jnp.zeros_like(out_ref)

    # Logical row-block covered by this step. On the last core it may point one block past
    # the array (odd number of blocks); the index_map clamps the DMA and the mask below
    # forces that duplicate block's contribution to exactly zero.
    b_logical = c * blocks_per_core + i
    block_row0 = b_logical * block_rows
    n_strips = block_rows // STRIP_ROWS

    def strip_body(masked):
        def body(s, acc):
            r0 = pl.multiple_of(s * STRIP_ROWS, STRIP_ROWS)
            x = logits_ref[pl.ds(r0, STRIP_ROWS), :].astype(jnp.float32)
            y = targets_ref[pl.ds(r0, STRIP_ROWS), :].astype(jnp.float32)
            # Stable softplus + folded pos_weight: one exp + one log1p per element (EUP).
            sp = jnp.maximum(x, 0.0) + jnp.log1p(jnp.exp(-jnp.abs(x)))
            per = (1.0 + (POS_WEIGHT - 1.0) * y) * sp - POS_WEIGHT * (x * y)
            if masked:
                row = jax.lax.broadcasted_iota(jnp.int32, (STRIP_ROWS, LANES), 0)
                lane = jax.lax.broadcasted_iota(jnp.int32, (STRIP_ROWS, LANES), 1)
                flat = (block_row0 + r0 + row) * LANES + lane
                per = jnp.where(flat < total_elems, per, 0.0)
            # vreg-wise partial sums (pure VALU adds); the single cross-lane/sublane reduce
            # happens once, in the wrapper, over the tiny (n_cores, 8, 128) output.
            return acc + jnp.sum(per.reshape(STRIP_ROWS // 8, 8, LANES), axis=0)
        return body

    zero = jnp.zeros((8, LANES), jnp.float32)

    @pl.when(b_logical < first_masked_block)      # steady state: block fully in-range
    def _():
        acc = jax.lax.fori_loop(0, n_strips, strip_body(False), zero)
        out_ref[...] += acc[None, :, :]

    @pl.when(b_logical >= first_masked_block)     # partial / overhanging / duplicate block
    def _():
        acc = jax.lax.fori_loop(0, n_strips, strip_body(True), zero)
        out_ref[...] += acc[None, :, :]


def pcr_loss(logits, targets, *, block_rows=None):
    """JAX/Pallas equivalent of PCRLoss.forward.

    Args:
      logits: (B,) or (B, 1) raw model outputs (pre-sigmoid), any float dtype.
      targets: list of 0/1 ints, or array of shape (B,).
      block_rows: optional override of the per-step row-tile (testing / tuning).
    Returns:
      scalar float32 loss.
    """
    if isinstance(targets, (list, tuple)):
        targets = jnp.asarray(targets)
    logits = jnp.asarray(logits)
    if logits.ndim == 2 and logits.shape[1] == 1:
        logits = jnp.squeeze(logits, axis=1)
    # Hard 0/1 labels travel as int8 over HBM (1 B/elem); cast back to f32 in-kernel.
    # NOTE: non-binary (soft) labels would be truncated here; PCRLoss documents 0/1 targets.
    targets = jnp.asarray(targets).reshape(-1).astype(jnp.int8)

    B = logits.shape[0]
    assert targets.shape[0] == B
    assert B < 2**31, "in-kernel flat index is int32"

    # Minimal padding: only up to the next 128-lane boundary (<=127 elems). When B is already
    # lane-aligned we skip the pad entirely and the reshape below is a free bitcast (no HBM copy).
    pad = (-B) % LANES
    if pad:
        logits = jnp.pad(logits, (0, pad))
        targets = jnp.pad(targets, (0, pad))
    rows = (B + pad) // LANES
    logits2 = logits.reshape(rows, LANES)
    targets2 = targets.reshape(rows, LANES)

    if block_rows is None:
        block_rows = min(MAX_BLOCK_ROWS, _round_up(rows, STRIP_ROWS))
    assert block_rows % STRIP_ROWS == 0

    num_blocks = pl.cdiv(rows, block_rows)      # last block may overhang `rows` (masked)
    n_cores = 2 if num_blocks >= 2 else 1       # v7x: split row-blocks across both TCs
    bpc = pl.cdiv(num_blocks, n_cores)
    first_masked_block = rows // block_rows     # first block that can contain invalid rows

    def in_index(c, i):
        # Clamp so a duplicate block on the last core (odd num_blocks) never DMAs fully
        # out of bounds; its contribution is masked to zero in-kernel.
        return (jnp.minimum(c * bpc + i, num_blocks - 1), 0)

    kernel = functools.partial(
        _pcr_loss_kernel, total_elems=B, block_rows=block_rows,
        blocks_per_core=bpc, first_masked_block=first_masked_block)

    partials = pl.pallas_call(
        kernel,
        out_shape=jax.ShapeDtypeStruct((n_cores, 8, LANES), jnp.float32),
        grid=(n_cores, bpc),
        in_specs=[
            pl.BlockSpec((block_rows, LANES), in_index),
            pl.BlockSpec((block_rows, LANES), in_index),
        ],
        out_specs=pl.BlockSpec((1, 8, LANES), lambda c, i: (c, 0, 0)),
        compiler_params=pltpu.CompilerParams(
            dimension_semantics=("parallel", "arbitrary"),
            vmem_limit_bytes=32 * 1024 * 1024),
        cost_estimate=pl.CostEstimate(
            flops=10 * B,
            transcendentals=2 * B,
            bytes_accessed=B * logits.dtype.itemsize + B + n_cores * 8 * LANES * 4),
    )(logits2, targets2)

    # Per-core lane-dense partial sums -> scalar mean (tiny XLA reduce over 2*8*128 values).
    return jnp.sum(partials) * (1.0 / B)


def _pcr_loss_ref(logits, targets):
    """Pure-JAX reference (unfolded BCEWithLogits w/ pos_weight) for correctness checking."""
    logits = jnp.asarray(logits, jnp.float32)
    if logits.ndim == 2 and logits.shape[1] == 1:
        logits = jnp.squeeze(logits, axis=1)
    y = jnp.asarray(targets, jnp.float32).reshape(-1)
    log1p_exp = jnp.log1p(jnp.exp(-jnp.abs(logits)))
    sp_neg = jnp.maximum(-logits, 0.0) + log1p_exp
    sp_pos = jnp.maximum(logits, 0.0) + log1p_exp
    per = POS_WEIGHT * y * sp_neg + (1.0 - y) * sp_pos
    return jnp.mean(per)


if __name__ == "__main__":
    key = jax.random.PRNGKey(0)
    k1, k2, k3, k4 = jax.random.split(key, 4)

    # Test 1: tiny (B,1) logits + Python-list targets -> squeeze path, list handling,
    # single overhanging block, lane-tail masking.
    B = 8
    logits_small = jax.random.normal(k1, (B, 1), dtype=jnp.float32) * 2.0
    targets_small = [0, 1, 1, 0, 1, 0, 0, 1]
    loss1 = jax.block_until_ready(pcr_loss(logits_small, targets_small))
    ref1 = jax.block_until_ready(_pcr_loss_ref(logits_small, targets_small))
    assert jnp.allclose(loss1, ref1, rtol=5e-5, atol=1e-6), (loss1, ref1)

    # Test 2: large flat batch with default (large) blocks; 200000 % 128 != 0 exercises the
    # minimal-pad + partial-last-block path.
    B2 = 200_000
    logits_big = jax.random.normal(k2, (B2,), dtype=jnp.float32) * 2.0
    targets_big = jax.random.bernoulli(k3, 0.5, (B2,)).astype(jnp.int32)
    loss2 = jax.block_until_ready(pcr_loss(logits_big, targets_big))
    ref2 = jax.block_until_ready(_pcr_loss_ref(logits_big, targets_big))
    assert jnp.allclose(loss2, ref2, rtol=5e-5, atol=1e-6), (loss2, ref2)

    # Test 3: same data, small blocks -> multi-block grid, 2-way "parallel" core split with an
    # odd number of blocks (clamped duplicate block on the last core must contribute exactly 0).
    loss3 = jax.block_until_ready(pcr_loss(logits_big, targets_big, block_rows=256))
    assert jnp.allclose(loss3, ref2, rtol=5e-5, atol=1e-6), (loss3, ref2)

    # Test 4: bf16 logits pass through HBM at 2 B/elem; math stays f32 in-kernel.
    logits_bf16 = (jax.random.normal(k4, (4096,), dtype=jnp.float32) * 2.0).astype(jnp.bfloat16)
    targets_bf = jax.random.bernoulli(k3, 0.5, (4096,)).astype(jnp.int32)
    loss4 = jax.block_until_ready(pcr_loss(logits_bf16, targets_bf))
    ref4 = jax.block_until_ready(_pcr_loss_ref(logits_bf16, targets_bf))
    assert jnp.allclose(loss4, ref4, rtol=5e-5, atol=1e-6), (loss4, ref4)

    print("KERNEL_OK")
</pallas_src>

<mosaic_0001>
module attributes {stable_mosaic.version = 11 : i64} {
  func.func @_pcr_loss_kernel(%arg0: i32, %arg1: i32, %arg2: memref<256x128xf32, #tpu.memory_space<vmem>>, %arg3: memref<256x128xi8, #tpu.memory_space<vmem>>, %arg4: memref<1x8x128xf32, #tpu.memory_space<vmem>>) attributes {dimension_semantics = [#tpu.dimension_semantics<parallel>, #tpu.dimension_semantics<arbitrary>], iteration_bounds = array<i64: 1, 1>, scalar_prefetch = 0 : i64, scratch_operands = 0 : i64, tpu.core_type = #tpu.core_type<tc>, window_params = [{transform_indices = @transform_0, window_bounds = array<i64: 256, 128>}, {transform_indices = @transform_1, window_bounds = array<i64: 256, 128>}, {transform_indices = @transform_2, window_bounds = array<i64: 1, 8, 128>}]} {
    %c0_i32 = arith.constant 0 : i32
    %0 = arith.cmpi eq, %arg1, %c0_i32 : i32
    %1 = arith.extui %0 : i1 to i32
    %c0_i32_0 = arith.constant 0 : i32
    %2 = arith.cmpi ne, %1, %c0_i32_0 : i32
    scf.if %2 {
      %cst_5 = arith.constant 0.000000e+00 : f32
      %13 = vector.broadcast %cst_5 : f32 to vector<1x8x128xf32>
      %c0 = arith.constant 0 : index
      %c0_6 = arith.constant 0 : index
      %c0_7 = arith.constant 0 : index
      %14 = vector.load %arg4[%c0, %c0_6, %c0_7] : memref<1x8x128xf32, #tpu.memory_space<vmem>>, vector<1x8x128xf32>
      tpu.vector_store %arg4[%c0, %c0_6, %c0_7], %13 {strides = array<i32>} : memref<1x8x128xf32, #tpu.memory_space<vmem>>, vector<1x8x128xf32>,
    } else {
    }
    %c1_i32 = arith.constant 1 : i32
    %3 = arith.muli %arg0, %c1_i32 : i32
    %4 = arith.addi %3, %arg1 : i32
    %c256_i32 = arith.constant 256 : i32
    %5 = arith.muli %4, %c256_i32 : i32
    %cst = arith.constant 0.000000e+00 : f32
    %6 = vector.broadcast %cst : f32 to vector<8x128xf32>
    %c0_i32_1 = arith.constant 0 : i32
    %7 = arith.cmpi slt, %4, %c0_i32_1 : i32
    %8 = arith.extui %7 : i1 to i32
    %c0_i32_2 = arith.constant 0 : i32
    %9 = arith.cmpi ne, %8, %c0_i32_2 : i32
    scf.if %9 {
      %c0_i32_5 = arith.constant 0 : i32
      %c256_i32_6 = arith.constant 256 : i32
      %13 = arith.muli %c0_i32_5, %c256_i32_6 : i32
      %14 = tpu.assume_multiple %13, 256 : i32
      %15 = arith.index_cast %14 : i32 to index
      %c0 = arith.constant 0 : index
      %16 = vector.load %arg2[%15, %c0] : memref<256x128xf32, #tpu.memory_space<vmem>>, vector<256x128xf32>
      %17 = arith.index_cast %14 : i32 to index
      %c0_7 = arith.constant 0 : index
      %18 = vector.load %arg3[%17, %c0_7] : memref<256x128xi8, #tpu.memory_space<vmem>>, vector<256x128xi8>
      %19 = arith.sitofp %18 : vector<256x128xi8> to vector<256x128xf32>
      %cst_8 = arith.constant 0.000000e+00 : f32
      %20 = vector.broadcast %cst_8 : f32 to vector<256x128xf32>
      %21 = arith.maximumf %16, %20 : vector<256x128xf32>
      %22 = math.absf %16 : vector<256x128xf32>
      %cst_9 = arith.constant 0.000000e+00 : f32
      %23 = vector.broadcast %cst_9 : f32 to vector<256x128xf32>
      %24 = arith.subf %23, %22 : vector<256x128xf32>
      %25 = math.exp %24 : vector<256x128xf32>
      %26 = math.log1p %25 : vector<256x128xf32>
      %27 = arith.addf %21, %26 : vector<256x128xf32>
      %cst_10 = arith.constant 1.400000e+00 : f32
      %28 = vector.broadcast %cst_10 : f32 to vector<256x128xf32>
      %29 = arith.mulf %28, %19 : vector<256x128xf32>
      %cst_11 = arith.constant 1.000000e+00 : f32
      %30 = vector.broadcast %cst_11 : f32 to vector<256x128xf32>
      %31 = arith.addf %30, %29 : vector<256x128xf32>
      %32 = arith.mulf %31, %27 : vector<256x128xf32>
      %33 = arith.mulf %16, %19 : vector<256x128xf32>
      %cst_12 = arith.constant 2.400000e+00 : f32
      %34 = vector.broadcast %cst_12 : f32 to vector<256x128xf32>
      %35 = arith.mulf %34, %33 : vector<256x128xf32>
      %36 = arith.subf %32, %35 : vector<256x128xf32>
      %37 = vector.shape_cast %36 : vector<256x128xf32> to vector<32x8x128xf32>
      %cst_13 = arith.constant dense<0.000000e+00> : vector<8x128xf32>
      %38 = vector.multi_reduction <add>, %37, %cst_13 [0] : vector<32x8x128xf32> to vector<8x128xf32>
      %39 = arith.addf %6, %38 : vector<8x128xf32>
      %c1_i32_14 = arith.constant 1 : i32
      %c0_15 = arith.constant 0 : index
      %c0_16 = arith.constant 0 : index
      %c0_17 = arith.constant 0 : index
      %40 = vector.load %arg4[%c0_15, %c0_16, %c0_17] : memref<1x8x128xf32, #tpu.memory_space<vmem>>, vector<1x8x128xf32>
      %41 = vector.shape_cast %39 : vector<8x128xf32> to vector<1x8x128xf32>
      %42 = arith.addf %40, %41 : vector<1x8x128xf32>
      %c0_18 = arith.constant 0 : index
      %c0_19 = arith.constant 0 : index
      %c0_20 = arith.constant 0 : index
      %43 = vector.load %arg4[%c0_18, %c0_19, %c0_20] : memref<1x8x128xf32, #tpu.memory_space<vmem>>, vector<1x8x128xf32>
      tpu.vector_store %arg4[%c0_18, %c0_19, %c0_20], %42 {strides = array<i32>} : memref<1x8x128xf32, #tpu.memory_space<vmem>>, vector<1x8x128xf32>,
    } else {
    }
    %c0_i32_3 = arith.constant 0 : i32
    %10 = arith.cmpi sge, %4, %c0_i32_3 : i32
    %11 = arith.extui %10 : i1 to i32
    %c0_i32_4 = arith.constant 0 : i32
    %12 = arith.cmpi ne, %11, %c0_i32_4 : i32
    scf.if %12 {
      %c0_i32_5 = arith.constant 0 : i32
      %c256_i32_6 = arith.constant 256 : i32
      %13 = arith.muli %c0_i32_5, %c256_i32_6 : i32
      %14 = tpu.assume_multiple %13, 256 : i32
      %15 = arith.index_cast %14 : i32 to index
      %c0 = arith.constant 0 : index
      %16 = vector.load %arg2[%15, %c0] : memref<256x128xf32, #tpu.memory_space<vmem>>, vector<256x128xf32>
      %17 = arith.index_cast %14 : i32 to index
      %c0_7 = arith.constant 0 : index
      %18 = vector.load %arg3[%17, %c0_7] : memref<256x128xi8, #tpu.memory_space<vmem>>, vector<256x128xi8>
      %19 = arith.sitofp %18 : vector<256x128xi8> to vector<256x128xf32>
      %cst_8 = arith.constant 0.000000e+00 : f32
      %20 = vector.broadcast %cst_8 : f32 to vector<256x128xf32>
      %21 = arith.maximumf %16, %20 : vector<256x128xf32>
      %22 = math.absf %16 : vector<256x128xf32>
      %cst_9 = arith.constant 0.000000e+00 : f32
      %23 = vector.broadcast %cst_9 : f32 to vector<256x128xf32>
      %24 = arith.subf %23, %22 : vector<256x128xf32>
      %25 = math.exp %24 : vector<256x128xf32>
      %26 = math.log1p %25 : vector<256x128xf32>
      %27 = arith.addf %21, %26 : vector<256x128xf32>
      %cst_10 = arith.constant 1.400000e+00 : f32
      %28 = vector.broadcast %cst_10 : f32 to vector<256x128xf32>
      %29 = arith.mulf %28, %19 : vector<256x128xf32>
      %cst_11 = arith.constant 1.000000e+00 : f32
      %30 = vector.broadcast %cst_11 : f32 to vector<256x128xf32>
      %31 = arith.addf %30, %29 : vector<256x128xf32>
      %32 = arith.mulf %31, %27 : vector<256x128xf32>
      %33 = arith.mulf %16, %19 : vector<256x128xf32>
      %cst_12 = arith.constant 2.400000e+00 : f32
      %34 = vector.broadcast %cst_12 : f32 to vector<256x128xf32>
      %35 = arith.mulf %34, %33 : vector<256x128xf32>
      %36 = arith.subf %32, %35 : vector<256x128xf32>
      %37 = tpu.iota {dimensions = array<i32: 0>} : vector<256x128xi32>
      %38 = tpu.iota {dimensions = array<i32: 1>} : vector<256x128xi32>
      %39 = arith.addi %5, %14 : i32
      %40 = vector.broadcast %39 : i32 to vector<256x128xi32>
      %41 = arith.addi %40, %37 : vector<256x128xi32>
      %c128_i32 = arith.constant 128 : i32
      %42 = vector.broadcast %c128_i32 : i32 to vector<256x128xi32>
      %43 = arith.muli %41, %42 : vector<256x128xi32>
      %44 = arith.addi %43, %38 : vector<256x128xi32>
      %c8_i32 = arith.constant 8 : i32
      %45 = vector.broadcast %c8_i32 : i32 to vector<256x128xi32>
      %46 = arith.cmpi slt, %44, %45 : vector<256x128xi32>
      %cst_13 = arith.constant 0.000000e+00 : f32
      %47 = vector.broadcast %cst_13 : f32 to vector<256x128xf32>
      %48 = arith.select %46, %36, %47 : vector<256x128xi1>, vector<256x128xf32>
      %49 = vector.shape_cast %48 : vector<256x128xf32> to vector<32x8x128xf32>
      %cst_14 = arith.constant dense<0.000000e+00> : vector<8x128xf32>
      %50 = vector.multi_reduction <add>, %49, %cst_14 [0] : vector<32x8x128xf32> to vector<8x128xf32>
      %51 = arith.addf %6, %50 : vector<8x128xf32>
      %c1_i32_15 = arith.constant 1 : i32
      %c0_16 = arith.constant 0 : index
      %c0_17 = arith.constant 0 : index
      %c0_18 = arith.constant 0 : index
      %52 = vector.load %arg4[%c0_16, %c0_17, %c0_18] : memref<1x8x128xf32, #tpu.memory_space<vmem>>, vector<1x8x128xf32>
      %53 = vector.shape_cast %51 : vector<8x128xf32> to vector<1x8x128xf32>
      %54 = arith.addf %52, %53 : vector<1x8x128xf32>
      %c0_19 = arith.constant 0 : index
      %c0_20 = arith.constant 0 : index
      %c0_21 = arith.constant 0 : index
      %55 = vector.load %arg4[%c0_19, %c0_20, %c0_21] : memref<1x8x128xf32, #tpu.memory_space<vmem>>, vector<1x8x128xf32>
      tpu.vector_store %arg4[%c0_19, %c0_20, %c0_21], %54 {strides = array<i32>} : memref<1x8x128xf32, #tpu.memory_space<vmem>>, vector<1x8x128xf32>,
    } else {
    }
    return
  }
  func.func @transform_0(%arg0: i32, %arg1: i32) -> (i32, i32) {
    %c1_i32 = arith.constant 1 : i32
    %0 = arith.muli %arg0, %c1_i32 : i32
    %1 = arith.addi %0, %arg1 : i32
    %c0_i32 = arith.constant 0 : i32
    %2 = arith.minsi %1, %c0_i32 : i32
    %c0_i32_0 = arith.constant 0 : i32
    %c0_i32_1 = arith.constant 0 : i32
    return %2, %c0_i32_0 : i32, i32
  }
  func.func @transform_1(%arg0: i32, %arg1: i32) -> (i32, i32) {
    %c1_i32 = arith.constant 1 : i32
    %0 = arith.muli %arg0, %c1_i32 : i32
    %1 = arith.addi %0, %arg1 : i32
    %c0_i32 = arith.constant 0 : i32
    %2 = arith.minsi %1, %c0_i32 : i32
    %c0_i32_0 = arith.constant 0 : i32
    %c0_i32_1 = arith.constant 0 : i32
    return %2, %c0_i32_0 : i32, i32
  }
  func.func @transform_2(%arg0: i32, %arg1: i32) -> (i32, i32, i32) {
    %c0_i32 = arith.constant 0 : i32
    %c0_i32_0 = arith.constant 0 : i32
    %c0_i32_1 = arith.constant 0 : i32
    return %arg0, %c0_i32, %c0_i32_0 : i32, i32, i32
  }
}

</mosaic_0001>

<bundles_post_ra>
// kernel: tpu_custom_call.1
= control target key start
LH: loop header
LB: loop body
LE: loop exit
PB: predicated region body
PF: predicated region fallthrough
CT: control target
= control target key end

     0   :  { %7 = vsyncpa [#allocation3], 0  ;;  %s6322_s0 = inlined_call_operand.hbm [shape: f32[1,128], index: 0, kind: input, shape index: {}]   ;;  %s6323_s1 = inlined_call_operand.vmem [shape: s8[1,128], index: 1, kind: input, shape index: {}]   ;;  %s6324_s2 = inlined_call_operand.hbm [shape: f32[1,8,128], index: 2, kind: output, shape index: {}]  }
   0x1   :  { %8 = vsyncpa [#allocation4], 0 }
   0x2   :  { %19 = vsyncadd [#allocation3], 4080  ;;  %s3539_s9 = smov [#allocation2]   ;;  %s3491_s13 = scalar_lea.hbm %s6322_s0, 16 }
   0x3   :  { %s23_s10 = sshll.u32 %s3539_s9, 4  ;;  %p3492_p0 = scmp.ne.s32.totalorder %s6322_s0, %s3491_s13  ;;  %s24_s10 = int_to_ptr.vmem [resolvable:$true] %s23_s10 }
   0x4   :  { %p3495_p1 = scmp.lt.u32.totalorder %s3491_s13, %s6322_s0 }
   0x6   :  { %p3497_p2 = pnand %p3495_p1, %p3492_p0 }
   0x8   :  { %3500 = shalt.err (!%p3497_p2)
}
   0x9   :  { %s3501_s18 = scalar_lea.vmem %s24_s10, 16  ;;  %s3505_s19 = scalar_lea.vmem %s24_s10, 4096 }
   0xa   :  { %p3502_p3 = scmp.ne.s32.totalorder %s24_s10, %s3501_s18  ;;  %p3506_p4 = scmp.lt.s32.totalorder %s24_s10, %s24_s10 }
   0xb   :  { %p3507_p5 = scmp.lt.s32.totalorder %s3505_s19, %s3501_s18 }
   0xd   :  { %p3508_p6 = por %p3507_p5, %p3506_p4 }
   0xf   :  { %p3509_p7 = pnand %p3508_p6, %p3502_p3 }
  0x11   :  { %3512 = shalt.err (!%p3509_p7)
}
  0x12   :  { %s3540_s20 = smov 16   ;;  %s3541_s21 = smov 1  }
  0x13   :  { %29 = dma.hbm_to_vmem [thread:$0]  %s6322_s0, 16, %s24_s10, [#allocation3], %s3540_s20, %s3540_s20, %s3541_s21  }
  0x14   :  { %3535 = dma.done.wait [#allocation3], 4096  }
  0x15   :  { %3536 = vsyncadd [#allocation3], 4294963200  ;;  %v3570_v0 = vld [vmem:[#allocation2] sm:$0xff]  ;;  %v3572_v1 = vld [vmem:[#allocation2 + $0x8] sm:$0xff] }
  0x16   :  { %6591 = vst [vmem:[#allocation8_spill] sm:$0xff] %v3570_v0  ;;  %6592 = vst [vmem:[#allocation9_spill] sm:$0xff] %v3572_v1  ;;  %v3574_v2 = vld [vmem:[#allocation2 + $0x10] sm:$0xff]  ;;  %v3576_v3 = vld [vmem:[#allocation2 + $0x18] sm:$0xff] }
  0x17   :  { %6593 = vst [vmem:[#allocation10_spill] sm:$0xff] %v3574_v2  ;;  %6594 = vst [vmem:[#allocation11_spill] sm:$0xff] %v3576_v3  ;;  %v3578_v4 = vld [vmem:[#allocation2 + $0x20] sm:$0xff]  ;;  %v3580_v5 = vld [vmem:[#allocation2 + $0x28] sm:$0xff] }
  0x18   :  { %6595 = vst [vmem:[#allocation12_spill] sm:$0xff] %v3578_v4  ;;  %6596 = vst [vmem:[#allocation13_spill] sm:$0xff] %v3580_v5  ;;  %v3582_v6 = vld [vmem:[#allocation2 + $0x30] sm:$0xff]  ;;  %v3585_v8 = vld [vmem:[#allocation2 + $0x38] sm:$0xff] }
  0x19   :  { %6597 = vst [vmem:[#allocation14_spill] sm:$0xff] %v3582_v6  ;;  %6598 = vst [vmem:[#allocation15_spill] sm:$0xff] %v3585_v8  ;;  %v3587_v9 = vld [vmem:[#allocation2 + $0x40] sm:$0xff]  ;;  %v3589_v10 = vld [vmem:[#allocation2 + $0x48] sm:$0xff] }
  0x1a   :  { %6599 = vst [vmem:[#allocation16_spill] sm:$0xff] %v3587_v9  ;;  %6600 = vst [vmem:[#allocation17_spill] sm:$0xff] %v3589_v10  ;;  %v3594_v14 = vld [vmem:[#allocation2 + $0x50] sm:$0xff]  ;;  %v3596_v15 = vld [vmem:[#allocation2 + $0x58] sm:$0xff] }
  0x1b   :  { %6601 = vst [vmem:[#allocation18_spill] sm:$0xff] %v3594_v14  ;;  %6602 = vst [vmem:[#allocation19_spill] sm:$0xff] %v3596_v15  ;;  %v3598_v16 = vld [vmem:[#allocation2 + $0x60] sm:$0xff]  ;;  %v3603_v20 = vld [vmem:[#allocation2 + $0x68] sm:$0xff] }
  0x1c   :  { %6603 = vst [vmem:[#allocation20_spill] sm:$0xff] %v3598_v16  ;;  %6604 = vst [vmem:[#allocation21_spill] sm:$0xff] %v3603_v20  ;;  %v3605_v21 = vld [vmem:[#allocation2 + $0x70] sm:$0xff]  ;;  %v3607_v22 = vld [vmem:[#allocation2 + $0x78] sm:$0xff] }
  0x1d   :  { %6605 = vst [vmem:[#allocation22_spill] sm:$0xff] %v3605_v21  ;;  %6606 = vst [vmem:[#allocation23_spill] sm:$0xff] %v3607_v22  ;;  %v3612_v26 = vld [vmem:[#allocation2 + $0x80] sm:$0xff]  ;;  %v3614_v27 = vld [vmem:[#allocation2 + $0x88] sm:$0xff] }
  0x1e   :  { %6607 = vst [vmem:[#allocation24_spill] sm:$0xff] %v3612_v26  ;;  %6608 = vst [vmem:[#allocation25_spill] sm:$0xff] %v3614_v27  ;;  %v3616_v28 = vld [vmem:[#allocation2 + $0x90] sm:$0xff]  ;;  %v3621_v32 = vld [vmem:[#allocation2 + $0x98] sm:$0xff] }
  0x1f   :  { %6609 = vst [vmem:[#allocation26_spill] sm:$0xff] %v3616_v28  ;;  %6610 = vst [vmem:[#allocation27_spill] sm:$0xff] %v3621_v32  ;;  %v3623_v33 = vld [vmem:[#allocation2 + $0xa0] sm:$0xff]  ;;  %v3625_v34 = vld [vmem:[#allocation2 + $0xa8] sm:$0xff] }
  0x20   :  { %6611 = vst [vmem:[#allocation28_spill] sm:$0xff] %v3623_v33  ;;  %6612 = vst [vmem:[#allocation29_spill] sm:$0xff] %v3625_v34  ;;  %v3630_v38 = vld [vmem:[#allocation2 + $0xb0] sm:$0xff]  ;;  %v3632_v39 = vld [vmem:[#allocation2 + $0xb8] sm:$0xff] }
  0x21   :  { %6613 = vst [vmem:[#allocation30_spill] sm:$0xff] %v3630_v38  ;;  %6614 = vst [vmem:[#allocation31_spill] sm:$0xff] %v3632_v39  ;;  %v3634_v40 = vld [vmem:[#allocation2 + $0xc0] sm:$0xff]  ;;  %v3639_v44 = vld [vmem:[#allocation2 + $0xc8] sm:$0xff] }
  0x22   :  { %6615 = vst [vmem:[#allocation32_spill] sm:$0xff] %v3634_v40  ;;  %6616 = vst [vmem:[#allocation33_spill] sm:$0xff] %v3639_v44  ;;  %v3641_v45 = vld [vmem:[#allocation2 + $0xd0] sm:$0xff]  ;;  %v1634_v46 = vld [vmem:[%s6323_s1] sm:$0x1] }
  0x23   :  { %6617 = vst [vmem:[#allocation34_spill] sm:$0xff] %v3641_v45  ;;  %v3648_v49 = vld [vmem:[#allocation2 + $0xd8] sm:$0xff]  ;;  %v1635_v50 = vld [vmem:[%s6323_s1 + $0x1] sm:$0x1]  ;;  %v1636_v55 = vld [vmem:[%s6323_s1 + $0x2] sm:$0x1]  ;;  %v1698_v61 = vunpack.c.0.s8 %v1634_v46 }
  0x24   :  { %6618 = vst [vmem:[#allocation35_spill] sm:$0xff] %v3648_v49  ;;  %v3656_v54 = vld [vmem:[#allocation2 + $0xe0] sm:$0xff]  ;;  %v1699_v53 = vunpack.c.0.s8 %v1635_v50  ;;  %v3686_v46 = vld [vmem:[%s6323_s1 + $0x8] sm:$0x1]  ;;  %v3691_v63 = vld [vmem:[%s6323_s1 + $0x9] sm:$0x1]  ;;  %v1700_v52 = vunpack.c.0.s8 %v1636_v55 }
  0x25   :  { %6619 = vst [vmem:[#allocation36_spill] sm:$0xff] %v3656_v54  ;;  %v1637_v59 = vld [vmem:[%s6323_s1 + $0x3] sm:$0x1]  ;;  %v1638_v60 = vld [vmem:[%s6323_s1 + $0x4] sm:$0x1] }
  0x26   :  { %v1639_v56 = vld [vmem:[%s6323_s1 + $0x5] sm:$0x1]  ;;  %v1640_v58 = vld [vmem:[%s6323_s1 + $0x6] sm:$0x1]  ;;  %v3681_v57 = vld [vmem:[%s6323_s1 + $0x7] sm:$0x1]  ;;  %v1701_v47 = vunpack.c.0.s8 %v1637_v59  ;;  %v1702_v43 = vunpack.c.0.s8 %v1638_v60  ;;  %v3729_v60 = vcvt.s32.f32 %v1698_v61  ;;  %v3749_v61 = vcvt.s32.f32 %v1699_v53 }
  0x27   :  { %v3696_v62 = vld [vmem:[%s6323_s1 + $0xa] sm:$0x1]  ;;  %v3701_v50 = vld [vmem:[%s6323_s1 + $0xb] sm:$0x1]  ;;  %v3706_v51 = vld [vmem:[%s6323_s1 + $0xc] sm:$0x1]  ;;  %v1703_v37 = vunpack.c.0.s8 %v1639_v56  ;;  %v1704_v36 = vunpack.c.0.s8 %v1640_v58  ;;  %v1705_v59 = vunpack.c.0.s8 %v3681_v57  ;;  %v1706_v56 = vunpack.c.0.s8 %v3686_v46 }
  0x28   :  { %v3711_v48 = vld [vmem:[%s6323_s1 + $0xd] sm:$0x1]  ;;  %v3716_v55 = vld [vmem:[%s6323_s1 + $0xe] sm:$0x1]  ;;  %v3721_v42 = vld [vmem:[%s6323_s1 + $0xf] sm:$0x1]  ;;  %v1707_v57 = vunpack.c.0.s8 %v3691_v63  ;;  %v3769_v23 = vcvt.s32.f32 %v1700_v52  ;;  %v3789_v11 = vcvt.s32.f32 %v1701_v47  ;;  %v3809_v53 = vcvt.s32.f32 %v1702_v43 }
  0x29   :  { %v3726_v41 = vld [vmem:[%s6323_s1 + $0x10] sm:$0x1]  ;;  %6620 = vst [vmem:[#allocation37_spill] sm:$0xff] %v3729_v60  ;;  %v3734_v35 = vld [vmem:[%s6323_s1 + $0x11] sm:$0x1]  ;;  %6621 = vst [vmem:[#allocation38_spill] sm:$0xff] %v3749_v61  ;;  %v6634_v12 = vunpack.c.0.s8 %v3706_v51 }
  0x2a   :  { %v3739_v31 = vld [vmem:[%s6323_s1 + $0x12] sm:$0x1]  ;;  %v3744_v30 = vld [vmem:[%s6323_s1 + $0x13] sm:$0x1]  ;;  %v3754_v29 = vld [vmem:[%s6323_s1 + $0x14] sm:$0x1]  ;;  %v6644_v8 = vunpack.c.0.s8 %v3734_v35 }
  0x2b   :  { %v3759_v25 = vld [vmem:[%s6323_s1 + $0x15] sm:$0x1]  ;;  %v3764_v46 = vld [vmem:[%s6323_s1 + $0x16] sm:$0x1]  ;;  %6622 = vst [vmem:[#allocation39_spill] sm:$0xff] %v3769_v23  ;;  %6623 = vst [vmem:[#allocation40_spill] sm:$0xff] %v3789_v11 }
  0x2c   :  { %v3774_v19 = vld [vmem:[%s6323_s1 + $0x17] sm:$0x1]  ;;  %v3779_v18 = vld [vmem:[%s6323_s1 + $0x18] sm:$0x1]  ;;  %v3784_v17 = vld [vmem:[%s6323_s1 + $0x19] sm:$0x1]  ;;  %v4065_v6 = vcvt.s32.f32 %v6644_v8  ;;  %v6650_v8 = vunpack.c.0.s8 %v3754_v29 }
  0x2d   :  { %v3794_v7 = vld [vmem:[%s6323_s1 + $0x1a] sm:$0x1]  ;;  %v3799_v24 = vld [vmem:[%s6323_s1 + $0x1b] sm:$0x1]  ;;  %v3804_v13 = vld [vmem:[%s6323_s1 + $0x1c] sm:$0x1]  ;;  %v6660_v29 = vunpack.c.0.s8 %v3784_v17 }
  0x2e   :  { %6624 = vst [vmem:[#allocation41_spill] sm:$0xff] %v3809_v53  ;;  %v3814_v63 = vld [vmem:[%s6323_s1 + $0x1d] sm:$0x1]  ;;  %v3819_v58 = vld [vmem:[%s6323_s1 + $0x1e] sm:$0x1]  ;;  %v3829_v53 = vcvt.s32.f32 %v1703_v37  ;;  %6645 = vst [vmem:[#allocation54_spill] sm:$0xff] %v4065_v6  ;;  %v4082_v35 = vcvt.s32.f32 %v6650_v8 }
  0x2f   :  { %v3824_v52 = vld [vmem:[%s6323_s1 + $0x1f] sm:$0x1]  ;;  %v3834_v11 = vld [vmem:[%s6323_s1 + $0x20] sm:$0x1]  ;;  %v3839_v23 = vld [vmem:[%s6323_s1 + $0x21] sm:$0x1]  ;;  %v4102_v8 = vcvt.s32.f32 %v6660_v29  ;;  %v6670_v17 = vunpack.c.0.s8 %v3819_v58 }
  0x30   :  { %6625 = vst [vmem:[#allocation42_spill] sm:$0xff] %v3829_v53  ;;  %v3844_v47 = vld [vmem:[%s6323_s1 + $0x22] sm:$0x1]  ;;  %v3849_v53 = vcvt.s32.f32 %v1704_v36  ;;  %v3854_v61 = vld [vmem:[%s6323_s1 + $0x23] sm:$0x1]  ;;  %6651 = vst [vmem:[#allocation57_spill] sm:$0xff] %v4082_v35 }
  0x31   :  { %v3859_v60 = vld [vmem:[%s6323_s1 + $0x24] sm:$0x1]  ;;  %v3864_v43 = vld [vmem:[%s6323_s1 + $0x25] sm:$0x1]  ;;  %v3874_v54 = vld [vmem:[%s6323_s1 + $0x26] sm:$0x1]  ;;  %v4122_v29 = vcvt.s32.f32 %v6670_v17  ;;  %v6680_v58 = vunpack.c.0.s8 %v3854_v61 }
  0x32   :  { %6626 = vst [vmem:[#allocation43_spill] sm:$0xff] %v3849_v53  ;;  %v3869_v53 = vcvt.s32.f32 %v1705_v59  ;;  %v3879_v49 = vld [vmem:[%s6323_s1 + $0x27] sm:$0x1]  ;;  %v3884_v37 = vld [vmem:[%s6323_s1 + $0x28] sm:$0x1]  ;;  %6661 = vst [vmem:[#allocation62_spill] sm:$0xff] %v4102_v8 }
  0x33   :  { %v3894_v45 = vld [vmem:[%s6323_s1 + $0x29] sm:$0x1]  ;;  %v3899_v44 = vld [vmem:[%s6323_s1 + $0x2a] sm:$0x1]  ;;  %v3904_v36 = vld [vmem:[%s6323_s1 + $0x2b] sm:$0x1]  ;;  %v4142_v17 = vcvt.s32.f32 %v6680_v58  ;;  %v6690_v61 = vunpack.c.0.s8 %v3884_v37 }
  0x34   :  { %6627 = vst [vmem:[#allocation44_spill] sm:$0xff] %v3869_v53  ;;  %v3889_v53 = vcvt.s32.f32 %v1706_v56  ;;  %v3914_v40 = vld [vmem:[%s6323_s1 + $0x2c] sm:$0x1]  ;;  %v3919_v39 = vld [vmem:[%s6323_s1 + $0x2d] sm:$0x1]  ;;  %v6632_v56 = vunpack.c.0.s8 %v3701_v50  ;;  %v1740_v50 = vunpack.c.0.s8 %v3899_v44  ;;  %6671 = vst [vmem:[#allocation67_spill] sm:$0xff] %v4122_v29 }
  0x35   :  { %v3924_v59 = vld [vmem:[%s6323_s1 + $0x2e] sm:$0x1]  ;;  %v3936_v34 = vld [vmem:[%s6323_s1 + $0x2f] sm:$0x1]  ;;  %v3941_v33 = vld [vmem:[%s6323_s1 + $0x30] sm:$0x1]  ;;  %v4162_v58 = vcvt.s32.f32 %v6690_v61 }
  0x36   :  { %6628 = vst [vmem:[#allocation45_spill] sm:$0xff] %v3889_v53  ;;  %v3909_v53 = vcvt.s32.f32 %v1707_v57  ;;  %v3946_v57 = vld [vmem:[%s6323_s1 + $0x31] sm:$0x1]  ;;  %v3958_v32 = vld [vmem:[%s6323_s1 + $0x32] sm:$0x1]  ;;  %v1744_v51 = vunpack.c.0.s8 %v3924_v59  ;;  %6681 = vst [vmem:[#allocation72_spill] sm:$0xff] %v4142_v17 }
  0x37   :  { %v3963_v28 = vld [vmem:[%s6323_s1 + $0x33] sm:$0x1]  ;;  %v3980_v27 = vld [vmem:[%s6323_s1 + $0x35] sm:$0x1]  ;;  %v3985_v26 = vld [vmem:[%s6323_s1 + $0x36] sm:$0x1]  ;;  %v1747_v59 = vunpack.c.0.s8 %v3946_v57 }
  0x38   :  { %6629 = vst [vmem:[#allocation46_spill] sm:$0xff] %v3909_v53  ;;  %v6630_v53 = vunpack.c.0.s8 %v3696_v62  ;;  %v3968_v62 = vld [vmem:[%s6323_s1 + $0x34] sm:$0x1]  ;;  %v3990_v44 = vld [vmem:[%s6323_s1 + $0x37] sm:$0x1]  ;;  %6691 = vst [vmem:[#allocation77_spill] sm:$0xff] %v4162_v58 }
  0x39   :  { %v4002_v22 = vld [vmem:[%s6323_s1 + $0x38] sm:$0x1]  ;;  %v4007_v21 = vld [vmem:[%s6323_s1 + $0x39] sm:$0x1]  ;;  %v4024_v20 = vld [vmem:[%s6323_s1 + $0x3b] sm:$0x1]  ;;  %v1750_v57 = vunpack.c.0.s8 %v3968_v62  ;;  %v1753_v62 = vunpack.c.0.s8 %v3990_v44 }
  0x3a   :  { %v3931_v38 = vcvt.s32.f32 %v6630_v53  ;;  %v1739_v53 = vunpack.c.0.s8 %v3894_v45  ;;  %v1742_v45 = vunpack.c.0.s8 %v3914_v40  ;;  %v1745_v40 = vunpack.c.0.s8 %v3936_v34  ;;  %v4029_v16 = vld [vmem:[%s6323_s1 + $0x3c] sm:$0x1]  ;;  %v4046_v15 = vld [vmem:[%s6323_s1 + $0x3e] sm:$0x1]  ;;  %v4051_v14 = vld [vmem:[%s6323_s1 + $0x3f] sm:$0x1] }
  0x3b   :  { %v1748_v34 = vunpack.c.0.s8 %v3958_v32  ;;  %v1751_v32 = vunpack.c.0.s8 %v3980_v27  ;;  %v1755_v10 = vunpack.c.0.s8 %v4007_v21  ;;  %v1757_v27 = vunpack.c.0.s8 %v4024_v20  ;;  %v4222_v17 = vld [vmem:[#allocation2 + $0xe8] sm:$0xff]  ;;  %v4238_v8 = vld [vmem:[#allocation2 + $0xf8] sm:$0xff] }
  0x3c   :  { %6631 = vst [vmem:[#allocation47_spill] sm:$0xff] %v3931_v38  ;;  %v3953_v38 = vcvt.s32.f32 %v6632_v56  ;;  %v1741_v56 = vunpack.c.0.s8 %v3904_v36  ;;  %v6636_v36 = vunpack.c.0.s8 %v3711_v48  ;;  %v1746_v48 = vunpack.c.0.s8 %v3941_v33  ;;  %v4034_v33 = vld [vmem:[%s6323_s1 + $0x3d] sm:$0x1]  ;;  %6724 = vst [vmem:[#allocation98_spill] sm:$0xff] %v4222_v17 }
  0x3d   :  { %v4164_v21 = vcvt.s32.f32 %v1739_v53  ;;  %v4182_v37 = vcvt.s32.f32 %v1748_v34  ;;  %v1862_v34 = vand.u32 2147483647, %v3578_v4  ;;  %6734 = vst [vmem:[#allocation102_spill] sm:$0xff] %v4238_v8 }
  0x3e   :  { %6633 = vst [vmem:[#allocation48_spill] sm:$0xff] %v3953_v38  ;;  %v3975_v38 = vcvt.s32.f32 %v6634_v12  ;;  %v1743_v12 = vunpack.c.0.s8 %v3919_v39  ;;  %v4012_v39 = vld [vmem:[%s6323_s1 + $0x3a] sm:$0x1]  ;;  %s3542_s1 = smov [#allocation5]  }
  0x3f   :  { %v1756_v9 = vunpack.c.0.s8 %v4012_v39  ;;  %v6648_v39 = vunpack.c.0.s8 %v3744_v30  ;;  %v6658_v30 = vunpack.c.0.s8 %v3779_v18  ;;  %v6668_v18 = vunpack.c.0.s8 %v3814_v63  ;;  %6692 = vst [vmem:[#allocation78_spill] sm:$0xff] %v4164_v21  ;;  %6701 = vst [vmem:[#allocation87_spill] sm:$0xff] %v4182_v37  ;;  %v6713_v37 = vld [vmem:[#allocation18_spill] sm:$0xff]  ;;  %s3312_s7 = sshll.u32 %s3542_s1, 4  ;;  %s3313_s7 = int_to_ptr.vmem [resolvable:$true] %s3312_s7 }
  0x40   :  { %6635 = vst [vmem:[#allocation49_spill] sm:$0xff] %v3975_v38  ;;  %v3997_v38 = vcvt.s32.f32 %v6636_v36  ;;  %v6638_v36 = vunpack.c.0.s8 %v3716_v55  ;;  %v1749_v55 = vunpack.c.0.s8 %v3963_v28  ;;  %v1752_v28 = vunpack.c.0.s8 %v3985_v26  ;;  %s3513_s8 = scalar_lea.vmem %s3313_s7, 128  ;;  %p3518_p9 = scmp.lt.s32.totalorder %s3313_s7, %s3313_s7 }
  0x41   :  { %v1758_v26 = vunpack.c.0.s8 %v4029_v16  ;;  %v6652_v16 = vunpack.c.0.s8 %v3759_v25  ;;  %v6662_v25 = vunpack.c.0.s8 %v3794_v7  ;;  %v6672_v7 = vunpack.c.0.s8 %v3824_v52  ;;  %p3514_p8 = scmp.ne.s32.totalorder %s3313_s7, %s3513_s8  ;;  %p3519_p10 = scmp.lt.s32.totalorder %s3513_s8, %s3513_s8 }
  0x42   :  { %6637 = vst [vmem:[#allocation50_spill] sm:$0xff] %v3997_v38  ;;  %v4019_v38 = vcvt.s32.f32 %v6638_v36  ;;  %v6640_v36 = vunpack.c.0.s8 %v3721_v42  ;;  %v6642_v42 = vunpack.c.0.s8 %v3726_v41  ;;  %v6646_v41 = vunpack.c.0.s8 %v3739_v31 }
  0x43   :  { %v4086_v20 = vcvt.s32.f32 %v6652_v16  ;;  %v6654_v31 = vunpack.c.0.s8 %v3764_v46  ;;  %v4106_v16 = vcvt.s32.f32 %v6662_v25  ;;  %v6664_v46 = vunpack.c.0.s8 %v3799_v24  ;;  %p3520_p11 = por %p3519_p10, %p3518_p9 }
  0x44   :  { %6639 = vst [vmem:[#allocation51_spill] sm:$0xff] %v4019_v38  ;;  %v4041_v38 = vcvt.s32.f32 %v6640_v36  ;;  %v4058_v36 = vcvt.s32.f32 %v6642_v42  ;;  %v4072_v42 = vcvt.s32.f32 %v6646_v41  ;;  %v4126_v25 = vcvt.s32.f32 %v6672_v7 }
  0x45   :  { %6653 = vst [vmem:[#allocation58_spill] sm:$0xff] %v4086_v20  ;;  %v4090_v41 = vcvt.s32.f32 %v6654_v31  ;;  %6663 = vst [vmem:[#allocation63_spill] sm:$0xff] %v4106_v16  ;;  %v4110_v31 = vcvt.s32.f32 %v6664_v46  ;;  %v6674_v24 = vunpack.c.0.s8 %v3834_v11  ;;  %v6678_v63 = vunpack.c.0.s8 %v3844_v47  ;;  %p3521_p12 = pnand %p3520_p11, %p3514_p8 }
  0x46   :  { %6641 = vst [vmem:[#allocation52_spill] sm:$0xff] %v4041_v38  ;;  %6643 = vst [vmem:[#allocation53_spill] sm:$0xff] %v4058_v36  ;;  %v1754_v38 = vunpack.c.0.s8 %v4002_v22  ;;  %v4078_v36 = vcvt.s32.f32 %v6648_v39  ;;  %v6656_v22 = vunpack.c.0.s8 %v3774_v19  ;;  %v4098_v39 = vcvt.s32.f32 %v6658_v30 }
  0x47   :  { %6647 = vst [vmem:[#allocation55_spill] sm:$0xff] %v4072_v42  ;;  %6655 = vst [vmem:[#allocation59_spill] sm:$0xff] %v4090_v41  ;;  %v6666_v19 = vunpack.c.0.s8 %v3804_v13  ;;  %v4118_v30 = vcvt.s32.f32 %v6668_v18  ;;  %v4130_v46 = vcvt.s32.f32 %v6674_v24  ;;  %v6676_v13 = vunpack.c.0.s8 %v3839_v23 }
  0x48   :  { %6649 = vst [vmem:[#allocation56_spill] sm:$0xff] %v4078_v36  ;;  %v4094_v44 = vcvt.s32.f32 %v6656_v22  ;;  %6659 = vst [vmem:[#allocation61_spill] sm:$0xff] %v4098_v39  ;;  %v4138_v18 = vcvt.s32.f32 %v6678_v63  ;;  %v6682_v52 = vunpack.c.0.s8 %v3859_v60  ;;  %v6684_v11 = vunpack.c.0.s8 %v3864_v43  ;;  %v6739_v36 = vld [vmem:[#allocation32_spill] sm:$0xff] }
  0x49   :  { %6665 = vst [vmem:[#allocation64_spill] sm:$0xff] %v4110_v31  ;;  %v4114_v22 = vcvt.s32.f32 %v6666_v19  ;;  %6669 = vst [vmem:[#allocation66_spill] sm:$0xff] %v4118_v30  ;;  %v4134_v19 = vcvt.s32.f32 %v6676_v13  ;;  %v6686_v23 = vunpack.c.0.s8 %v3874_v54  ;;  %v6688_v47 = vunpack.c.0.s8 %v3879_v49  ;;  %v4230_v30 = vld [vmem:[#allocation2 + $0xf0] sm:$0xff] }
  0x4a   :  { %6657 = vst [vmem:[#allocation60_spill] sm:$0xff] %v4094_v44  ;;  %6673 = vst [vmem:[#allocation68_spill] sm:$0xff] %v4126_v25  ;;  %v4146_v7 = vcvt.s32.f32 %v6682_v52  ;;  %v4150_v24 = vcvt.s32.f32 %v6684_v11  ;;  %v4166_v60 = vcvt.s32.f32 %v1740_v50  ;;  %v4168_v52 = vcvt.s32.f32 %v1741_v56 }
  0x4b   :  { %6667 = vst [vmem:[#allocation65_spill] sm:$0xff] %v4114_v22  ;;  %6675 = vst [vmem:[#allocation69_spill] sm:$0xff] %v4130_v46  ;;  %v4154_v13 = vcvt.s32.f32 %v6686_v23  ;;  %v4158_v63 = vcvt.s32.f32 %v6688_v47  ;;  %v4170_v43 = vcvt.s32.f32 %v1742_v45  ;;  %v4172_v11 = vcvt.s32.f32 %v1743_v12  ;;  %v6728_v46 = vld [vmem:[#allocation27_spill] sm:$0xff] }
  0x4c   :  { %6677 = vst [vmem:[#allocation70_spill] sm:$0xff] %v4134_v19  ;;  %6679 = vst [vmem:[#allocation71_spill] sm:$0xff] %v4138_v18  ;;  %v4174_v54 = vcvt.s32.f32 %v1744_v51  ;;  %v4176_v23 = vcvt.s32.f32 %v1745_v40  ;;  %v4178_v49 = vcvt.s32.f32 %v1746_v48  ;;  %v4180_v47 = vcvt.s32.f32 %v1747_v59 }
  0x4d   :  { %6683 = vst [vmem:[#allocation73_spill] sm:$0xff] %v4146_v7  ;;  %6685 = vst [vmem:[#allocation74_spill] sm:$0xff] %v4150_v24  ;;  %v4184_v53 = vcvt.s32.f32 %v1749_v55  ;;  %v4186_v50 = vcvt.s32.f32 %v1750_v57  ;;  %v4188_v56 = vcvt.s32.f32 %v1751_v32  ;;  %v4190_v45 = vcvt.s32.f32 %v1752_v28  ;;  %v6708_v32 = vld [vmem:[#allocation14_spill] sm:$0xff]  ;;  %v6709_v28 = vld [vmem:[#allocation15_spill] sm:$0xff] }
  0x4e   :  { %6687 = vst [vmem:[#allocation75_spill] sm:$0xff] %v4154_v13  ;;  %6689 = vst [vmem:[#allocation76_spill] sm:$0xff] %v4158_v63  ;;  %v1858_v12 = vand.u32 2147483647, %v3570_v0  ;;  %v1859_v51 = vand.u32 2147483647, %v3572_v1  ;;  %v4194_v40 = vcvt.s32.f32 %v1753_v62  ;;  %v4199_v55 = vcvt.s32.f32 %v1754_v38 }
  0x4f   :  { %6693 = vst [vmem:[#allocation79_spill] sm:$0xff] %v4166_v60  ;;  %6694 = vst [vmem:[#allocation80_spill] sm:$0xff] %v4168_v52  ;;  %v1860_v48 = vand.u32 2147483647, %v3574_v2  ;;  %v1861_v59 = vand.u32 2147483647, %v3576_v3  ;;  %v4214_v52 = vcvt.s32.f32 %v1757_v27  ;;  %v4218_v63 = vcvt.s32.f32 %v1758_v26 }
  0x50   :  { %6695 = vst [vmem:[#allocation81_spill] sm:$0xff] %v4170_v43  ;;  %6696 = vst [vmem:[#allocation82_spill] sm:$0xff] %v4172_v11  ;;  %v1863_v57 = vand.u32 2147483647, %v3580_v5  ;;  %v1864_v61 = vand.u32 2147483647, %v6708_v32  ;;  %v6725_v18 = vunpack.c.0.s8 %v4034_v33  ;;  %v6730_v26 = vunpack.c.0.s8 %v4046_v15 }
  0x51   :  { %6697 = vst [vmem:[#allocation83_spill] sm:$0xff] %v4174_v54  ;;  %6698 = vst [vmem:[#allocation84_spill] sm:$0xff] %v4176_v23  ;;  %v6712_v62 = vld [vmem:[#allocation17_spill] sm:$0xff]  ;;  %v6715_v23 = vld [vmem:[#allocation19_spill] sm:$0xff]  ;;  %v1890_v58 = vsub.f32 0.0, %v1858_v12  ;;  %v1892_v29 = vsub.f32 0.0, %v1860_v48  ;;  %v6735_v33 = vunpack.c.0.s8 %v4051_v14 }
  0x52   :  { %6699 = vst [vmem:[#allocation85_spill] sm:$0xff] %v4178_v49  ;;  %6700 = vst [vmem:[#allocation86_spill] sm:$0xff] %v4180_v47  ;;  %v1868_v47 = vand.u32 2147483647, %v6713_v37  ;;  %v4209_v49 = vcvt.s32.f32 %v1756_v9  ;;  %v1869_v54 = vand.u32 2147483647, %v6715_v23  ;;  %v4226_v19 = vcvt.s32.f32 %v6725_v18 }
  0x53   :  { %6702 = vst [vmem:[#allocation88_spill] sm:$0xff] %v4184_v53  ;;  %6703 = vst [vmem:[#allocation89_spill] sm:$0xff] %v4186_v50  ;;  %v6711_v50 = vld [vmem:[#allocation16_spill] sm:$0xff]  ;;  %v6717_v11 = vld [vmem:[#allocation21_spill] sm:$0xff]  ;;  %v1877_v25 = vand.u32 2147483647, %v6728_v46  ;;  %v4234_v12 = vcvt.s32.f32 %v6730_v26  ;;  %v4242_v18 = vcvt.s32.f32 %v6735_v33 }
  0x54   :  { %6704 = vst [vmem:[#allocation90_spill] sm:$0xff] %v4188_v56  ;;  %6705 = vst [vmem:[#allocation91_spill] sm:$0xff] %v4190_v45  ;;  %v1865_v45 = vand.u32 2147483647, %v6709_v28  ;;  %v4204_v56 = vcvt.s32.f32 %v1755_v10  ;;  %v1866_v53 = vand.u32 2147483647, %v6711_v50 }
  0x55   :  { %6706 = vst [vmem:[#allocation92_spill] sm:$0xff] %v4194_v40  ;;  %6707 = vst [vmem:[#allocation93_spill] sm:$0xff] %v4199_v55  ;;  %v1867_v40 = vand.u32 2147483647, %v6712_v62  ;;  %v6716_v38 = vld [vmem:[#allocation20_spill] sm:$0xff]  ;;  %v6719_v60 = vld [vmem:[#allocation22_spill] sm:$0xff] }
  0x56   :  { %6710 = vst [vmem:[#allocation94_spill] sm:$0xff] %v4204_v56  ;;  %6714 = vst [vmem:[#allocation95_spill] sm:$0xff] %v4209_v49  ;;  %v1870_v55 = vand.u32 2147483647, %v6716_v38  ;;  %v1871_v43 = vand.u32 2147483647, %v6717_v11 }
  0x57   :  { %6718 = vst [vmem:[#allocation96_spill] sm:$0xff] %v4214_v52  ;;  %v1872_v21 = vand.u32 2147483647, %v6719_v60  ;;  %v6720_v10 = vld [vmem:[#allocation23_spill] sm:$0xff]  ;;  %6721 = vst [vmem:[#allocation97_spill] sm:$0xff] %v4218_v63  ;;  %v6722_v13 = vld [vmem:[#allocation24_spill] sm:$0xff] }
  0x58   :  { %v1873_v56 = vand.u32 2147483647, %v6720_v10  ;;  %v1874_v24 = vand.u32 2147483647, %v6722_v13  ;;  %v6723_v7 = vld [vmem:[#allocation25_spill] sm:$0xff]  ;;  %v1891_v49 = vsub.f32 0.0, %v1859_v51 }
  0x59   :  { %v1875_v9 = vand.u32 2147483647, %v6723_v7  ;;  %6726 = vst [vmem:[#allocation99_spill] sm:$0xff] %v4226_v19  ;;  %v6727_v27 = vld [vmem:[#allocation26_spill] sm:$0xff]  ;;  %6729 = vst [vmem:[#allocation100_spill] sm:$0xff] %v4230_v30  ;;  %v6732_v63 = vld [vmem:[#allocation28_spill] sm:$0xff] }
  0x5a   :  { %v1876_v52 = vand.u32 2147483647, %v6727_v27  ;;  %6731 = vst [vmem:[#allocation101_spill] sm:$0xff] %v4234_v12  ;;  %v1878_v22 = vand.u32 2147483647, %v6732_v63  ;;  %v6733_v51 = vld [vmem:[#allocation29_spill] sm:$0xff] }
  0x5b   :  { %v1879_v31 = vand.u32 2147483647, %v6733_v51  ;;  %v1893_v16 = vsub.f32 0.0, %v1861_v59  ;;  %6736 = vst [vmem:[#allocation103_spill] sm:$0xff] %v4242_v18  ;;  %v6737_v19 = vld [vmem:[#allocation30_spill] sm:$0xff]  ;;  %v1894_v48 = vsub.f32 0.0, %v1862_v34 }
  0x5c   :  { %v1880_v39 = vand.u32 2147483647, %v6737_v19  ;;  %v1922_v44 = vmul.f32 1.442695, %v1890_v58  ;;  %v6738_v15 = vld [vmem:[#allocation31_spill] sm:$0xff]  ;;  %v1895_v12 = vsub.f32 0.0, %v1863_v57 }
  0x5d   :  { %v1881_v26 = vand.u32 2147483647, %v6738_v15  ;;  %v1924_v20 = vmul.f32 1.442695, %v1891_v49  ;;  %v1882_v59 = vand.u32 2147483647, %v6739_v36 }
  0x5e   :  { %v1896_v42 = vsub.f32 0.0, %v1864_v61  ;;  %v1926_v6 = vmul.f32 1.442695, %v1892_v29  ;;  %v6740_v33 = vld [vmem:[#allocation33_spill] sm:$0xff]  ;;  %v1897_v51 = vsub.f32 0.0, %v1865_v45  ;;  %v6741_v34 = vld [vmem:[#allocation34_spill] sm:$0xff]  ;;  %3331 = vpow2.f32 %v1922_v44 }
  0x5f   :  { %v1883_v18 = vand.u32 2147483647, %v6740_v33  ;;  %v1928_v19 = vmul.f32 1.442695, %v1893_v16  ;;  %v1884_v58 = vand.u32 2147483647, %v6741_v34  ;;  %3333 = vpow2.f32 %v1924_v20 }
  0x60   :  { %v1898_v63 = vsub.f32 0.0, %v1866_v53  ;;  %v1930_v41 = vmul.f32 1.442695, %v1894_v48  ;;  %v6742_v15 = vld [vmem:[#allocation35_spill] sm:$0xff]  ;;  %v1899_v49 = vsub.f32 0.0, %v1867_v40  ;;  %v6743_v46 = vld [vmem:[#allocation36_spill] sm:$0xff]  ;;  %3335 = vpow2.f32 %v1926_v6 }
  0x61   :  { %v1885_v57 = vand.u32 2147483647, %v6742_v15  ;;  %v1932_v35 = vmul.f32 1.442695, %v1895_v12  ;;  %v1886_v36 = vand.u32 2147483647, %v6743_v46  ;;  %3337 = vpow2.f32 %v1928_v19 }
  0x62   :  { %v1900_v61 = vsub.f32 0.0, %v1868_v47  ;;  %v1934_v29 = vmul.f32 1.442695, %v1896_v42  ;;  %v1887_v14 = vand.u32 2147483647, %v4222_v17  ;;  %v1901_v33 = vsub.f32 0.0, %v1869_v54 }
  0x63   :  { %v1936_v16 = vmul.f32 1.442695, %v1897_v51  ;;  %v1888_v45 = vand.u32 2147483647, %v4230_v30  ;;  %v1902_v53 = vsub.f32 0.0, %v1870_v55  ;;  %3339 = vpow2.f32 %v1930_v41 }
  0x64   :  { %v1938_v44 = vmul.f32 1.442695, %v1898_v63  ;;  %v1889_v48 = vand.u32 2147483647, %v4238_v8  ;;  %v1903_v40 = vsub.f32 0.0, %v1871_v43  ;;  %3341 = vpow2.f32 %v1932_v35 }
  0x65   :  { %v1940_v20 = vmul.f32 1.442695, %v1899_v49  ;;  %v1904_v12 = vsub.f32 0.0, %v1872_v21  ;;  %v1905_v46 = vsub.f32 0.0, %v1873_v56  ;;  %3343 = vpow2.f32 %v1934_v29 }
  0x66   :  { %v1942_v6 = vmul.f32 1.442695, %v1900_v61  ;;  %v1906_v42 = vsub.f32 0.0, %v1874_v24  ;;  %v1907_v47 = vsub.f32 0.0, %v1875_v9  ;;  %3345 = vpow2.f32 %v1936_v16 }
  0x67   :  { %v1944_v54 = vmul.f32 1.442695, %v1901_v33  ;;  %v1908_v19 = vsub.f32 0.0, %v1876_v52  ;;  %v1909_v51 = vsub.f32 0.0, %v1877_v25  ;;  %3347 = vpow2.f32 %v1938_v44 }
  0x68   :  { %v1946_v30 = vmul.f32 1.442695, %v1902_v53  ;;  %v1910_v55 = vsub.f32 0.0, %v1878_v22  ;;  %v1911_v41 = vsub.f32 0.0, %v1879_v31  ;;  %3349 = vpow2.f32 %v1940_v20  ;;  %v4257_v8 = vpop.eup %3331 }
  0x69   :  { %v1948_v63 = vmul.f32 1.442695, %v1903_v40  ;;  %v1912_v35 = vsub.f32 0.0, %v1880_v39  ;;  %v1913_v43 = vsub.f32 0.0, %v1881_v26  ;;  %3351 = vpow2.f32 %v1942_v6  ;;  %v4259_v56 = vpop.eup %3333 }
  0x6a   :  { %v1950_v21 = vmul.f32 1.442695, %v1904_v12  ;;  %v1914_v24 = vsub.f32 0.0, %v1882_v59  ;;  %v1915_v9 = vsub.f32 0.0, %v1883_v18  ;;  %3353 = vpow2.f32 %v1944_v54  ;;  %v4261_v52 = vpop.eup %3335 }
  0x6b   :  { %v1952_v33 = vmul.f32 1.442695, %v1905_v46  ;;  %v1916_v25 = vsub.f32 0.0, %v1884_v58  ;;  %v1917_v49 = vsub.f32 0.0, %v1885_v57  ;;  %3355 = vpow2.f32 %v1946_v30  ;;  %v4263_v22 = vpop.eup %3337 }
  0x6c   :  { %v1954_v31 = vmul.f32 1.442695, %v1906_v42  ;;  %v1918_v61 = vsub.f32 0.0, %v1886_v36  ;;  %v1919_v29 = vsub.f32 0.0, %v1887_v14  ;;  %3357 = vpow2.f32 %v1948_v63  ;;  %v6744_v63 = vld [vmem:[#allocation37_spill] sm:$0xff] }
  0x6d   :  { %v1956_v39 = vmul.f32 1.442695, %v1907_v47  ;;  %v4265_v26 = vpop.eup %3339  ;;  %v1920_v16 = vsub.f32 0.0, %v1888_v45  ;;  %v1921_v53 = vsub.f32 0.0, %v1889_v48  ;;  %3359 = vpow2.f32 %v1950_v21 }
  0x6e   :  { %v1958_v18 = vmul.f32 1.442695, %v1908_v19  ;;  %v4267_v59 = vpop.eup %3341  ;;  %3361 = vpow2.f32 %v1952_v33  ;;  %v1960_v46 = vmul.f32 1.442695, %v1909_v51  ;;  %v1962_v58 = vmul.f32 1.442695, %v1910_v55 }
  0x6f   :  { %v1964_v57 = vmul.f32 1.442695, %v1911_v41  ;;  %v4269_v30 = vpop.eup %3343  ;;  %3363 = vpow2.f32 %v1954_v31  ;;  %v1966_v44 = vmul.f32 1.442695, %v1912_v35  ;;  %v1968_v36 = vmul.f32 1.442695, %v1913_v43 }
  0x70   :  { %v1970_v14 = vmul.f32 1.442695, %v1914_v24  ;;  %v4271_v40 = vpop.eup %3345  ;;  %3365 = vpow2.f32 %v1956_v39  ;;  %v1972_v20 = vmul.f32 1.442695, %v1915_v9  ;;  %v1974_v45 = vmul.f32 1.442695, %v1916_v25 }
  0x71   :  { %v1989_v48 = vmul.f32 -0.5, %v4257_v8  ;;  %v4274_v12 = vpop.eup %3347  ;;  %3367 = vpow2.f32 %v1958_v18  ;;  %v1976_v6 = vmul.f32 1.442695, %v1917_v49  ;;  %v1978_v42 = vmul.f32 1.442695, %v1918_v61  ;;  %v6746_v43 = vld [vmem:[#allocation38_spill] sm:$0xff] }
  0x72   :  { %v1980_v47 = vmul.f32 1.442695, %v1919_v29  ;;  %v4276_v54 = vpop.eup %3349  ;;  %3369 = vpow2.f32 %v1960_v46  ;;  %v1982_v19 = vmul.f32 1.442695, %v1920_v16  ;;  %v1984_v51 = vmul.f32 1.442695, %v1921_v53 }
  0x73   :  { %v1998_v55 = vmul.f32 -0.5, %v4259_v56  ;;  %v4279_v41 = vpop.eup %3351  ;;  %3371 = vpow2.f32 %v1962_v58  ;;  %v4282_v35 = vmul.f32 1.4, %v6744_v63  ;;  %v4285_v21 = vmul.f32 1.4, %v6746_v43  ;;  %v6748_v24 = vld [vmem:[#allocation39_spill] sm:$0xff] }
  0x74   :  { %v4288_v9 = vmul.f32 1.4, %v6748_v24  ;;  %v4290_v33 = vpop.eup %3353  ;;  %3373 = vpow2.f32 %v1964_v57  ;;  %v1990_v25 = vadd.f32 1.0, %v1989_v48  ;;  %v2007_v49 = vmul.f32 -0.5, %v4261_v52  ;;  %v6750_v31 = vld [vmem:[#allocation40_spill] sm:$0xff]  ;;  %v6752_v16 = vld [vmem:[#allocation41_spill] sm:$0xff] }
  0x75   :  { %6745 = vst [vmem:[#allocation104_spill] sm:$0xff] %v4282_v35  ;;  %6747 = vst [vmem:[#allocation105_spill] sm:$0xff] %v4285_v21  ;;  %v4294_v61 = vmul.f32 1.4, %v6750_v31  ;;  %v4296_v29 = vpop.eup %3355  ;;  %3375 = vpow2.f32 %v1966_v44  ;;  %v2016_v39 = vmul.f32 -0.5, %v4263_v22  ;;  %v6754_v18 = vld [vmem:[#allocation42_spill] sm:$0xff] }
  0x76   :  { %6749 = vst [vmem:[#allocation106_spill] sm:$0xff] %v4288_v9  ;;  %v4300_v53 = vmul.f32 1.4, %v6752_v16  ;;  %v4303_v46 = vmul.f32 1.4, %v6754_v18  ;;  %v4305_v58 = vpop.eup %3357  ;;  %3377 = vpow2.f32 %v1968_v36  ;;  %v1986_v57 = vadd.f32 1.0, %v4257_v8 }
  0x77   :  { %6751 = vst [vmem:[#allocation107_spill] sm:$0xff] %v4294_v61  ;;  %v1999_v24 = vadd.f32 1.0, %v1998_v55  ;;  %v4309_v31 = vpop.eup %3359  ;;  %3379 = vpow2.f32 %v1970_v14  ;;  %v1995_v44 = vadd.f32 1.0, %v4259_v56  ;;  %v2025_v16 = vmul.f32 -0.5, %v4265_v26 }
  0x78   :  { %6753 = vst [vmem:[#allocation108_spill] sm:$0xff] %v4300_v53  ;;  %6755 = vst [vmem:[#allocation109_spill] sm:$0xff] %v4303_v46  ;;  %v4314_v43 = vpop.eup %3361  ;;  %3381 = vpow2.f32 %v1972_v20  ;;  %v4317_v18 = vmul.f32 %v4257_v8, %v1990_v25  ;;  %v2004_v36 = vadd.f32 1.0, %v4261_v52  ;;  %v2008_v46 = vadd.f32 1.0, %v2007_v49 }
  0x79   :  { %v4320_v48 = vpop.eup %3363  ;;  %3383 = vpow2.f32 %v1974_v45  ;;  %v2017_v55 = vadd.f32 1.0, %v2016_v39  ;;  %v2034_v53 = vmul.f32 -0.5, %v4267_v59  ;;  %v4327_v61 = vmul.f32 %v4259_v56, %v1999_v24 }
  0x7a   :  { %v4324_v63 = vpop.eup %3365  ;;  %3385 = vpow2.f32 %v1976_v6  ;;  %v2013_v20 = vadd.f32 1.0, %v4263_v22  ;;  %v2043_v25 = vmul.f32 -0.5, %v4269_v30  ;;  %v2022_v49 = vadd.f32 1.0, %v4265_v26 }
  0x7b   :  { %v4331_v9 = vpop.eup %3367  ;;  %3387 = vpow2.f32 %v1978_v42  ;;  %v2026_v39 = vadd.f32 1.0, %v2025_v16  ;;  %v4338_v6 = vmul.f32 %v4261_v52, %v2008_v46  ;;  %v2052_v21 = vmul.f32 -0.5, %v4271_v40 }
  0x7c   :  { %v4335_v14 = vpop.eup %3369  ;;  %3389 = vpow2.f32 %v1980_v47  ;;  %v4345_v42 = vmul.f32 %v4263_v22, %v2017_v55  ;;  %v2031_v45 = vadd.f32 1.0, %v4267_v59  ;;  %v2035_v17 = vadd.f32 1.0, %v2034_v53 }
  0x7d   :  { %v4342_v35 = vpop.eup %3371  ;;  %3391 = vpow2.f32 %v1982_v19  ;;  %v2044_v46 = vadd.f32 1.0, %v2043_v25  ;;  %v2061_v15 = vmul.f32 -0.5, %v4274_v12  ;;  %v4355_v34 = vmul.f32 %v4265_v26, %v2026_v39 }
  0x7e   :  { %v4348_v16 = vpop.eup %3373  ;;  %3393 = vpow2.f32 %v1984_v51  ;;  %v2040_v19 = vadd.f32 1.0, %v4269_v30  ;;  %v2070_v55 = vmul.f32 -0.5, %v4276_v54  ;;  %v2053_v53 = vadd.f32 1.0, %v2052_v21 }
  0x7f   :  { %v4352_v24 = vpop.eup %3375  ;;  %3395 = vlog2.f32 %v1986_v57  ;;  %6756 = vst [vmem:[#allocation110_spill] sm:$0xff] %v4355_v34  ;;  %v2079_v25 = vmul.f32 -0.5, %v4279_v41  ;;  %v4366_v57 = vmul.f32 %v4267_v59, %v2035_v17  ;;  %v2049_v39 = vadd.f32 1.0, %v4271_v40 }
  0x80   :  { %v4359_v27 = vpop.eup %3377  ;;  %3397 = vlog2.f32 %v1995_v44  ;;  %v4373_v44 = vmul.f32 %v4269_v30, %v2044_v46  ;;  %v2058_v21 = vadd.f32 1.0, %v4274_v12  ;;  %v2062_v51 = vadd.f32 1.0, %v2061_v15 }
  0x81   :  { %v4363_v47 = vpop.eup %3379  ;;  %3399 = vlog2.f32 %v2004_v36  ;;  %6757 = vst [vmem:[#allocation111_spill] sm:$0xff] %v4366_v57  ;;  %v2067_v17 = vadd.f32 1.0, %v4276_v54  ;;  %v2071_v60 = vadd.f32 1.0, %v2070_v55  ;;  %v4383_v7 = vmul.f32 %v4271_v40, %v2053_v53 }
  0x82   :  { %v4370_v13 = vpop.eup %3381  ;;  %3401 = vlog2.f32 %v2013_v20  ;;  %v2080_v20 = vadd.f32 1.0, %v2079_v25  ;;  %v2088_v46 = vmul.f32 -0.5, %v4290_v33  ;;  %v2097_v36 = vmul.f32 -0.5, %v4296_v29 }
  0x83   :  { %6758 = vst [vmem:[#allocation112_spill] sm:$0xff] %v4370_v13  ;;  %v4376_v10 = vpop.eup %3383  ;;  %3403 = vlog2.f32 %v2022_v49  ;;  %v2076_v49 = vadd.f32 1.0, %v4279_v41  ;;  %v2082_v55 = vand.u32 2147483647, %v4279_v41  ;;  %v2085_v53 = vadd.f32 1.0, %v4290_v33 }
  0x84   :  { %6759 = vst [vmem:[#allocation113_spill] sm:$0xff] %v4376_v10  ;;  %v4380_v11 = vpop.eup %3385  ;;  %3405 = vlog2.f32 %v2031_v45  ;;  %v4394_v45 = vmul.f32 %v4274_v12, %v2062_v51  ;;  %v2094_v37 = vadd.f32 1.0, %v4296_v29  ;;  %v6768_v50 = vand.u32 2147483647, %v4259_v56 }
  0x85   :  { %6760 = vst [vmem:[#allocation114_spill] sm:$0xff] %v4380_v11  ;;  %v4386_v38 = vpop.eup %3387  ;;  %3407 = vlog2.f32 %v2040_v19  ;;  %v4401_v19 = vmul.f32 %v4276_v54, %v2071_v60  ;;  %v4420_v60 = vmul.f32 %v4279_v41, %v2080_v20  ;;  %v2103_v15 = vadd.f32 1.0, %v4305_v58 }
  0x86   :  { %6761 = vst [vmem:[#allocation115_spill] sm:$0xff] %v4386_v38  ;;  %v4391_v23 = vpop.eup %3389  ;;  %3409 = vlog2.f32 %v2049_v39  ;;  %v6765_v39 = vand.u32 2147483647, %v4257_v8  ;;  %vm4415_vm1 = vcmp.lt.f32.partialorder %v6768_v50, 0.0004427343  ;;  %v2098_v56 = vadd.f32 1.0, %v2097_v36 }
  0x87   :  { %6762 = vst [vmem:[#allocation116_spill] sm:$0xff] %v4391_v23  ;;  %v4398_v25 = vpop.eup %3391  ;;  %3411 = vlog2.f32 %v2058_v21  ;;  %v2089_v21 = vadd.f32 1.0, %v2088_v46  ;;  %v6771_v8 = vand.u32 2147483647, %v4261_v52  ;;  %v2106_v50 = vmul.f32 -0.5, %v4305_v58  ;;  %v6916_v52 = vld [vmem:[#allocation14_spill] sm:$0xff] }
  0x88   :  { %6763 = vst [vmem:[#allocation117_spill] sm:$0xff] %v4398_v25  ;;  %v4405_v62 = vpop.eup %3393  ;;  %vm4409_vm0 = vcmp.lt.f32.partialorder %v6765_v39, 0.0004427343  ;;  %3413 = vlog2.f32 %v2067_v17  ;;  %v6772_v39 = vmov 0  ;;  %v2112_v5 = vadd.f32 1.0, %v4309_v31 }
  0x89   :  { %6764 = vst [vmem:[#allocation118_spill] sm:$0xff] %v4405_v62  ;;  %v3396_v32 = vpop.eup %3395  ;;  %vm4425_vm2 = vcmp.lt.f32.partialorder %v6771_v8, 0.0004427343  ;;  %3415 = vlog2.f32 %v2076_v49  ;;  %v6774_v41 = vand.u32 2147483647, %v4263_v22  ;;  %v6775_v20 = vmov 0 }
  0x8a   :  { %v6773_v39 = vsel %vm4425_vm2, 4294967295, %v6772_v39  ;;  %v3398_v17 = vpop.eup %3397  ;;  %v6777_v46 = vand.u32 2147483647, %v4265_v26  ;;  %v6780_v49 = vand.u32 2147483647, %v4267_v59  ;;  %v6781_v36 = vmov 0 }
  0x8b   :  { %vm4433_vm3 = vcmp.lt.f32.partialorder %v6774_v41, 0.0004427343  ;;  %3417 = vlog2.f32 %v2085_v53  ;;  %v2115_v8 = vmul.f32 -0.5, %v4309_v31  ;;  %v2121_v22 = vadd.f32 1.0, %v4314_v43  ;;  %v3400_v4 = vpop.eup %3399 }
  0x8c   :  { %v6776_v20 = vsel %vm4433_vm3, 4294967295, %v6775_v20  ;;  %vm4439_vm4 = vcmp.lt.f32.partialorder %v6777_v46, 0.0004427343  ;;  %vm4445_vm5 = vcmp.lt.f32.partialorder %v6780_v49, 0.0004427343  ;;  %v2124_v41 = vmul.f32 -0.5, %v4314_v43  ;;  %v3402_v59 = vpop.eup %3401 }
  0x8d   :  { %v6782_v36 = vsel %vm4445_vm5, 4294967295, %v6781_v36  ;;  %3419 = vlog2.f32 %v2094_v37  ;;  %v2100_v26 = vand.u32 2147483647, %v4296_v29  ;;  %v2130_v46 = vadd.f32 1.0, %v4320_v48  ;;  %v3404_v0 = vpop.eup %3403 }
  0x8e   :  { %6783 = vst [vmem:[#allocation119_spill] sm:$0xff] %v6782_v36  ;;  %v2133_v3 = vmul.f32 -0.5, %v4320_v48  ;;  %v6784_v49 = vand.u32 2147483647, %v4269_v30  ;;  %v6785_v2 = vmov 0  ;;  %v4462_v53 = vmul.f32 %v4290_v33, %v2089_v21  ;;  %v3406_v23 = vpop.eup %3405 }
  0x8f   :  { %3421 = vlog2.f32 %v2103_v15  ;;  %v2109_v1 = vand.u32 2147483647, %v4305_v58  ;;  %v2139_v37 = vadd.f32 1.0, %v4324_v63  ;;  %v6788_v62 = vand.u32 2147483647, %v4271_v40  ;;  %v3408_v10 = vpop.eup %3407 }
  0x90   :  { %vm4457_vm6 = vcmp.lt.f32.partialorder %v6784_v49, 0.0004427343  ;;  %v4473_v30 = vmul.f32 %v4296_v29, %v2098_v56  ;;  %v2107_v49 = vadd.f32 1.0, %v2106_v50  ;;  %3423 = vlog2.f32 %v2112_v5  ;;  %v3410_v56 = vpop.eup %3409 }
  0x91   :  { %v6786_v2 = vsel %vm4457_vm6, 4294967295, %v6785_v2  ;;  %vm4468_vm7 = vcmp.lt.f32.partialorder %v6788_v62, 0.0004427343  ;;  %v2118_v21 = vand.u32 2147483647, %v4309_v31  ;;  %v2116_v15 = vadd.f32 1.0, %v2115_v8 }
  0x92   :  { %6787 = vst [vmem:[#allocation120_spill] sm:$0xff] %v6786_v2  ;;  %6791 = vst [vmem:[#allocation121_spill] sm:$0xff] %v4473_v30  ;;  %3425 = vlog2.f32 %v2121_v22  ;;  %v2125_v38 = vadd.f32 1.0, %v2124_v41  ;;  %v2127_v11 = vand.u32 2147483647, %v4314_v43  ;;  %v6794_v29 = vmov 0  ;;  %v3412_v41 = vpop.eup %3411 }
  0x93   :  { %v4477_v13 = vmul.f32 0.6931472, %v3396_v32  ;;  %v4479_v62 = vmul.f32 0.6931472, %v3398_v17  ;;  %v6793_v40 = vand.u32 2147483647, %v4274_v12  ;;  %3427 = vlog2.f32 %v2130_v46 }
  0x94   :  { %v2134_v5 = vadd.f32 1.0, %v2133_v3  ;;  %v4487_v50 = vmul.f32 0.6931472, %v3400_v4  ;;  %v6796_v8 = vand.u32 2147483647, %v4276_v54  ;;  %3429 = vlog2.f32 %v2139_v37 }
  0x95   :  { %6792 = vst [vmem:[#allocation122_spill] sm:$0xff] %v4477_v13  ;;  %vm4483_vm8 = vcmp.lt.f32.partialorder %v6793_v40, 0.0004427343  ;;  %vm4495_vm10 = vcmp.lt.f32.partialorder %v2082_v55, 0.0004427343  ;;  %v2142_v17 = vmul.f32 -0.5, %v4324_v63  ;;  %v4508_v54 = vmul.f32 %v4305_v58, %v2107_v49  ;;  %v3414_v40 = vpop.eup %3413 }
  0x96   :  { %v6795_v29 = vsel %vm4483_vm8, 4294967295, %v6794_v29  ;;  %vm4491_vm9 = vcmp.lt.f32.partialorder %v6796_v8, 0.0004427343  ;;  %v2136_v12 = vand.u32 2147483647, %v4320_v48  ;;  %v6806_v8 = vmov 0  ;;  %v3416_v49 = vpop.eup %3415 }
  0x97   :  { %v4501_v3 = vmul.f32 0.6931472, %v3402_v59  ;;  %v4503_v4 = vmul.f32 0.6931472, %v3404_v0  ;;  %v4505_v46 = vmul.f32 0.6931472, %v3406_v23  ;;  %v4525_v0 = vmul.f32 %v4309_v31, %v2116_v15  ;;  %v3418_v15 = vpop.eup %3417 }
  0x98   :  { %6804 = vst [vmem:[#allocation126_spill] sm:$0xff] %v4508_v54  ;;  %v6805_v55 = vand.u32 2147483647, %v4290_v33  ;;  %vm4516_vm12 = vcmp.lt.f32.partialorder %v2100_v26, 0.0004427343  ;;  %v6808_v37 = vmov 0  ;;  %v4528_v23 = vmul.f32 %v4314_v43, %v2125_v38 }
  0x99   :  { %6801 = vst [vmem:[#allocation123_spill] sm:$0xff] %v4501_v3  ;;  %6802 = vst [vmem:[#allocation124_spill] sm:$0xff] %v4503_v4  ;;  %v6809_v37 = vsel %vm4516_vm12, 4294967295, %v6808_v37  ;;  %vm4520_vm13 = vcmp.lt.f32.partialorder %v2109_v1, 0.0004427343  ;;  %v6811_v59 = vmov 0  ;;  %v4547_v43 = vmul.f32 %v4320_v48, %v2134_v5 }
  0x9a   :  { %6803 = vst [vmem:[#allocation125_spill] sm:$0xff] %v4505_v46  ;;  %vm4512_vm11 = vcmp.lt.f32.partialorder %v6805_v55, 0.0004427343  ;;  %6810 = vst [vmem:[#allocation127_spill] sm:$0xff] %v6809_v37  ;;  %v6812_v59 = vsel %vm4520_vm13, 4294967295, %v6811_v59  ;;  %v2148_v58 = vadd.f32 1.0, %v4331_v9 }
  0x9b   :  { %v6807_v8 = vsel %vm4512_vm11, 4294967295, %v6806_v8  ;;  %6813 = vst [vmem:[#allocation128_spill] sm:$0xff] %v6812_v59  ;;  %6814 = vst [vmem:[#allocation129_spill] sm:$0xff] %v4525_v0  ;;  %v2145_v33 = vand.u32 2147483647, %v4324_v63  ;;  %v6817_v38 = vmov 0 }
  0x9c   :  { %6815 = vst [vmem:[#allocation130_spill] sm:$0xff] %v4528_v23  ;;  %v4540_v31 = vmul.f32 0.6931472, %v3408_v10  ;;  %vm4542_vm14 = vcmp.lt.f32.partialorder %v2118_v21, 0.0004427343  ;;  %6820 = vst [vmem:[#allocation133_spill] sm:$0xff] %v4547_v43  ;;  %v3420_v10 = vpop.eup %3419  ;;  %3431 = vlog2.f32 %v2148_v58 }
  0x9d   :  { %v6818_v38 = vsel %vm4542_vm14, 4294967295, %v6817_v38  ;;  %v4553_v26 = vmul.f32 0.6931472, %v3410_v56  ;;  %v2143_v13 = vadd.f32 1.0, %v2142_v17  ;;  %v2151_v1 = vmul.f32 -0.5, %v4331_v9  ;;  %v3422_v55 = vpop.eup %3421  ;;  %v6847_v0 = vld [vmem:[#allocation112_spill] sm:$0xff] }
  0x9e   :  { %6816 = vst [vmem:[#allocation131_spill] sm:$0xff] %v4540_v31  ;;  %6819 = vst [vmem:[#allocation132_spill] sm:$0xff] %v6818_v38  ;;  %vm4568_vm15 = vcmp.lt.f32.partialorder %v2127_v11, 0.0004427343  ;;  %v6822_v56 = vmov 0  ;;  %v6825_v17 = vmov 0  ;;  %v3424_v11 = vpop.eup %3423 }
  0x9f   :  { %6821 = vst [vmem:[#allocation134_spill] sm:$0xff] %v4553_v26  ;;  %v6823_v56 = vsel %vm4568_vm15, 4294967295, %v6822_v56  ;;  %vm4572_vm2 = vcmp.lt.f32.partialorder %v2136_v12, 0.0004427343  ;;  %v2157_v21 = vadd.f32 1.0, %v4335_v14  ;;  %v6828_v48 = vmov 0  ;;  %v3426_v36 = vpop.eup %3425 }
  0xa0   :  { %6824 = vst [vmem:[#allocation135_spill] sm:$0xff] %v6823_v56  ;;  %v6826_v17 = vsel %vm4572_vm2, 4294967295, %v6825_v17  ;;  %v4577_v3 = vmul.f32 0.6931472, %v3412_v41  ;;  %vm4579_vm3 = vcmp.lt.f32.partialorder %v2145_v33, 0.0004427343  ;;  %v4598_v58 = vmul.f32 %v4324_v63, %v2143_v13  ;;  %v3428_v2 = vpop.eup %3427 }
  0xa1   :  { %6827 = vst [vmem:[#allocation136_spill] sm:$0xff] %v6826_v17  ;;  %v6829_v48 = vsel %vm4579_vm3, 4294967295, %v6828_v48  ;;  %v2160_v5 = vmul.f32 -0.5, %v4335_v14  ;;  %v4588_v46 = vmul.f32 0.6931472, %v3414_v40  ;;  %v2166_v41 = vadd.f32 1.0, %v4342_v35  ;;  %v3430_v31 = vpop.eup %3429 }
  0xa2   :  { %6830 = vst [vmem:[#allocation137_spill] sm:$0xff] %v6829_v48  ;;  %v4590_v57 = vmul.f32 0.6931472, %v3416_v49  ;;  %6831 = vst [vmem:[#allocation138_spill] sm:$0xff] %v4598_v58  ;;  %v2152_v4 = vadd.f32 1.0, %v2151_v1  ;;  %3433 = vlog2.f32 %v2157_v21  ;;  %v2169_v63 = vmul.f32 -0.5, %v4342_v35 }
  0xa3   :  { %v2154_v34 = vand.u32 2147483647, %v4331_v9  ;;  %v4601_v12 = vmul.f32 0.6931472, %v3418_v15  ;;  %v4603_v40 = vmul.f32 0.6931472, %v3420_v10  ;;  %3435 = vlog2.f32 %v2166_v41 }
  0xa4   :  { %v4605_v49 = vmul.f32 0.6931472, %v3422_v55  ;;  %v4611_v26 = vmul.f32 0.6931472, %v3424_v11  ;;  %v2161_v13 = vadd.f32 1.0, %v2160_v5  ;;  %v4628_v5 = vmul.f32 %v4331_v9, %v2152_v4  ;;  %v6900_v28 = vld [vmem:[#allocation123_spill] sm:$0xff] }
  0xa5   :  { %6832 = vst [vmem:[#allocation139_spill] sm:$0xff] %v4601_v12  ;;  %6833 = vst [vmem:[#allocation140_spill] sm:$0xff] %v4603_v40  ;;  %v2163_v55 = vand.u32 2147483647, %v4335_v14  ;;  %v4623_v10 = vmul.f32 0.6931472, %v3426_v36  ;;  %v6934_v25 = vsel %vm4491_vm9, %v4401_v19, %v4588_v46 }
  0xa6   :  { %6834 = vst [vmem:[#allocation141_spill] sm:$0xff] %v4605_v49  ;;  %6835 = vst [vmem:[#allocation142_spill] sm:$0xff] %v4611_v26  ;;  %v4625_v21 = vmul.f32 0.6931472, %v3428_v2  ;;  %vm4630_vm8 = vcmp.lt.f32.partialorder %v2154_v34, 0.0004427343  ;;  %v4654_v4 = vmul.f32 %v4335_v14, %v2161_v13  ;;  %v3432_v49 = vpop.eup %3431 }
  0xa7   :  { %6836 = vst [vmem:[#allocation143_spill] sm:$0xff] %v4623_v10  ;;  %6838 = vst [vmem:[#allocation145_spill] sm:$0xff] %v4628_v5  ;;  %v6839_v11 = vmov 0  ;;  %v2175_v1 = vadd.f32 1.0, %v4348_v16  ;;  %v4647_v9 = vmul.f32 0.6931472, %v3430_v31 }
  0xa8   :  { %6837 = vst [vmem:[#allocation144_spill] sm:$0xff] %v4625_v21  ;;  %v6840_v11 = vsel %vm4630_vm8, 4294967295, %v6839_v11  ;;  %6843 = vst [vmem:[#allocation148_spill] sm:$0xff] %v4654_v4  ;;  %v2170_v41 = vadd.f32 1.0, %v2169_v63  ;;  %v2184_v15 = vadd.f32 1.0, %v4352_v24  ;;  %v6844_v2 = vmov 0 }
  0xa9   :  { %6841 = vst [vmem:[#allocation146_spill] sm:$0xff] %v6840_v11  ;;  %6842 = vst [vmem:[#allocation147_spill] sm:$0xff] %v4647_v9  ;;  %vm4657_vm11 = vcmp.lt.f32.partialorder %v2163_v55, 0.0004427343  ;;  %v2172_v33 = vand.u32 2147483647, %v4342_v35  ;;  %3437 = vlog2.f32 %v2175_v1 }
  0xaa   :  { %v6845_v2 = vsel %vm4657_vm11, 4294967295, %v6844_v2  ;;  %v2178_v31 = vmul.f32 -0.5, %v4348_v16  ;;  %v2193_v34 = vadd.f32 1.0, %v4359_v27  ;;  %v2202_v63 = vadd.f32 1.0, %v4363_v47  ;;  %v6849_v1 = vld [vmem:[#allocation113_spill] sm:$0xff]  ;;  %v6946_v46 = vld [vmem:[#allocation20_spill] sm:$0xff] }
  0xab   :  { %6846 = vst [vmem:[#allocation149_spill] sm:$0xff] %v6845_v2  ;;  %v2181_v36 = vand.u32 2147483647, %v4348_v16  ;;  %v2187_v26 = vmul.f32 -0.5, %v4352_v24  ;;  %v2211_v56 = vadd.f32 1.0, %v6847_v0  ;;  %v4681_v14 = vmul.f32 %v4342_v35, %v2170_v41  ;;  %v6854_v41 = vld [vmem:[#allocation114_spill] sm:$0xff] }
  0xac   :  { %3439 = vlog2.f32 %v2184_v15  ;;  %v2196_v13 = vmul.f32 -0.5, %v4359_v27  ;;  %v2220_v21 = vadd.f32 1.0, %v6849_v1  ;;  %v3434_v43 = vpop.eup %3433  ;;  %v4685_v17 = vmul.f32 0.6931472, %v3432_v49  ;;  %v6943_v22 = vld [vmem:[#allocation139_spill] sm:$0xff]  ;;  %v6950_v32 = vld [vmem:[#allocation140_spill] sm:$0xff] }
  0xad   :  { %6848 = vst [vmem:[#allocation112_spill] sm:$0xff] %v4681_v14  ;;  %vm4687_vm2 = vcmp.lt.f32.partialorder %v2172_v33, 0.0004427343  ;;  %v6851_v48 = vmov 0  ;;  %v2179_v55 = vadd.f32 1.0, %v2178_v31  ;;  %3441 = vlog2.f32 %v2193_v34  ;;  %v3436_v58 = vpop.eup %3435 }
  0xae   :  { %6850 = vst [vmem:[#allocation113_spill] sm:$0xff] %v4685_v17  ;;  %v6852_v48 = vsel %vm4687_vm2, 4294967295, %v6851_v48  ;;  %v2190_v9 = vand.u32 2147483647, %v4352_v24  ;;  %3443 = vlog2.f32 %v2202_v63  ;;  %v2205_v35 = vmul.f32 -0.5, %v4363_v47  ;;  %v6864_v17 = vld [vmem:[#allocation116_spill] sm:$0xff] }
  0xaf   :  { %6853 = vst [vmem:[#allocation150_spill] sm:$0xff] %v6852_v48  ;;  %v2229_v15 = vadd.f32 1.0, %v6854_v41  ;;  %v2188_v10 = vadd.f32 1.0, %v2187_v26  ;;  %v2199_v23 = vand.u32 2147483647, %v4359_v27  ;;  %3445 = vlog2.f32 %v2211_v56 }
  0xb0   :  { %v2214_v49 = vmul.f32 -0.5, %v6847_v0  ;;  %v4696_v33 = vmul.f32 0.6931472, %v3434_v43  ;;  %vm4698_vm3 = vcmp.lt.f32.partialorder %v2181_v36, 0.0004427343  ;;  %v2197_v34 = vadd.f32 1.0, %v2196_v13 }
  0xb1   :  { %v2208_v31 = vand.u32 2147483647, %v4363_v47  ;;  %3447 = vlog2.f32 %v2220_v21  ;;  %v4708_v63 = vmul.f32 %v4348_v16, %v2179_v55  ;;  %v2223_v56 = vmul.f32 -0.5, %v6849_v1  ;;  %v6858_v43 = vld [vmem:[#allocation115_spill] sm:$0xff] }
  0xb2   :  { %6855 = vst [vmem:[#allocation114_spill] sm:$0xff] %v4696_v33  ;;  %v2238_v54 = vadd.f32 1.0, %v6858_v43  ;;  %v4712_v36 = vmul.f32 0.6931472, %v3436_v58  ;;  %vm4714_vm15 = vcmp.lt.f32.partialorder %v2190_v9, 0.0004427343  ;;  %3449 = vlog2.f32 %v2229_v15 }
  0xb3   :  { %v2206_v13 = vadd.f32 1.0, %v2205_v35  ;;  %v4719_v21 = vmul.f32 %v4352_v24, %v2188_v10  ;;  %vm4721_vm14 = vcmp.lt.f32.partialorder %v2199_v23, 0.0004427343  ;;  %v2215_v16 = vadd.f32 1.0, %v2214_v49  ;;  %v3438_v58 = vpop.eup %3437  ;;  %v6867_v23 = vld [vmem:[#allocation117_spill] sm:$0xff]  ;;  %v6881_v24 = vld [vmem:[#allocation122_spill] sm:$0xff] }
  0xb4   :  { %6859 = vst [vmem:[#allocation115_spill] sm:$0xff] %v4712_v36  ;;  %v2217_v55 = vand.u32 2147483647, %v6847_v0  ;;  %v2247_v5 = vadd.f32 1.0, %v6864_v17  ;;  %v4732_v35 = vmul.f32 %v4359_v27, %v2197_v34  ;;  %vm4734_vm8 = vcmp.lt.f32.partialorder %v2208_v31, 0.0004427343 }
  0xb5   :  { %v2256_v10 = vadd.f32 1.0, %v6867_v23  ;;  %v2224_v15 = vadd.f32 1.0, %v2223_v56  ;;  %v2226_v49 = vand.u32 2147483647, %v6849_v1  ;;  %v2232_v11 = vmul.f32 -0.5, %v6854_v41  ;;  %v6868_v31 = vld [vmem:[#allocation118_spill] sm:$0xff] }
  0xb6   :  { %3451 = vlog2.f32 %v2238_v54  ;;  %v3440_v40 = vpop.eup %3439  ;;  %v4746_v27 = vmul.f32 %v4363_v47, %v2206_v13  ;;  %v2241_v34 = vmul.f32 -0.5, %v6858_v43  ;;  %v2265_v33 = vadd.f32 1.0, %v6868_v31 }
  0xb7   :  { %v3442_v4 = vpop.eup %3441  ;;  %v4750_v56 = vmul.f32 0.6931472, %v3438_v58  ;;  %v4753_v2 = vmul.f32 %v6847_v0, %v2215_v16  ;;  %vm4755_vm11 = vcmp.lt.f32.partialorder %v2217_v55, 0.0004427343  ;;  %3453 = vlog2.f32 %v2247_v5 }
  0xb8   :  { %v3444_v48 = vpop.eup %3443  ;;  %v2235_v9 = vand.u32 2147483647, %v6854_v41  ;;  %v2250_v47 = vmul.f32 -0.5, %v6864_v17  ;;  %3455 = vlog2.f32 %v2256_v10  ;;  %v2259_v13 = vmul.f32 -0.5, %v6867_v23 }
  0xb9   :  { %v3446_v36 = vpop.eup %3445  ;;  %v4762_v14 = vmul.f32 0.6931472, %v3440_v40  ;;  %v4765_v58 = vmul.f32 %v6849_v1, %v2224_v15  ;;  %vm4767_vm2 = vcmp.lt.f32.partialorder %v2226_v49, 0.0004427343  ;;  %v2233_v16 = vadd.f32 1.0, %v2232_v11 }
  0xba   :  { %v4771_v55 = vmul.f32 0.6931472, %v3442_v4  ;;  %v2242_v30 = vadd.f32 1.0, %v2241_v34  ;;  %v2244_v37 = vand.u32 2147483647, %v6858_v43  ;;  %3457 = vlog2.f32 %v2265_v33 }
  0xbb   :  { %v3448_v5 = vpop.eup %3447  ;;  %v2183_v40 = vsel %vm4698_vm3, %v4708_v63, %v4750_v56  ;;  %v4778_v10 = vmul.f32 0.6931472, %v3444_v48  ;;  %v2253_v1 = vand.u32 2147483647, %v6864_v17  ;;  %v2268_v15 = vmul.f32 -0.5, %v6868_v31 }
  0xbc   :  { %v3450_v49 = vpop.eup %3449  ;;  %v2213_v11 = vmul.f32 0.6931472, %v3446_v36  ;;  %vm4782_vm13 = vcmp.lt.f32.partialorder %v2235_v9, 0.0004427343  ;;  %v2251_v34 = vadd.f32 1.0, %v2250_v47  ;;  %v2260_v12 = vadd.f32 1.0, %v2259_v13 }
  0xbd   :  { %v2192_v38 = vsel %vm4714_vm15, %v4719_v21, %v4762_v14  ;;  %v2222_v33 = vmul.f32 0.6931472, %v3448_v5  ;;  %v2262_v48 = vand.u32 2147483647, %v6867_v23  ;;  %v2271_v63 = vand.u32 2147483647, %v6868_v31 }
  0xbe   :  { %v2201_v36 = vsel %vm4721_vm14, %v4732_v35, %v4771_v55  ;;  %v2234_v9 = vmul.f32 %v6854_v41, %v2233_v16  ;;  %v2243_v56 = vmul.f32 %v6858_v43, %v2242_v30  ;;  %vm4798_vm3 = vcmp.lt.f32.partialorder %v2244_v37, 0.0004427343  ;;  %v6879_v43 = vld [vmem:[#allocation8_spill] sm:$0xff]  ;;  %v6969_v47 = vld [vmem:[#allocation23_spill] sm:$0xff]  ;;  %v7016_v13 = vld [vmem:[#allocation29_spill] sm:$0xff] }
  0xbf   :  { %v2210_v14 = vsel %vm4734_vm8, %v4746_v27, %v4778_v10  ;;  %v2231_v21 = vmul.f32 0.6931472, %v3450_v49  ;;  %vm4806_vm15 = vcmp.lt.f32.partialorder %v2253_v1, 0.0004427343  ;;  %v2269_v26 = vadd.f32 1.0, %v2268_v15  ;;  %v6897_v49 = vld [vmem:[#allocation11_spill] sm:$0xff] }
  0xc0   :  { %v3452_v59 = vpop.eup %3451  ;;  %v2219_v30 = vsel %vm4755_vm11, %v4753_v2, %v2213_v11  ;;  %v2252_v37 = vmul.f32 %v6864_v17, %v2251_v34  ;;  %v2261_v41 = vmul.f32 %v6867_v23, %v2260_v12  ;;  %v6880_v35 = vmax.f32 %v6879_v43, 0.0  ;;  %v6888_v12 = vld [vmem:[#allocation9_spill] sm:$0xff]  ;;  %v6903_v34 = vld [vmem:[#allocation12_spill] sm:$0xff] }
  0xc1   :  { %v6882_v27 = vsel %vm4409_vm0, %v4317_v18, %v6881_v24  ;;  %v3454_v5 = vpop.eup %3453  ;;  %v2228_v55 = vsel %vm4767_vm2, %v4765_v58, %v2222_v33  ;;  %vm4827_vm8 = vcmp.lt.f32.partialorder %v2262_v48, 0.0004427343  ;;  %vm4831_vm11 = vcmp.lt.f32.partialorder %v2271_v63, 0.0004427343  ;;  %v6892_v58 = vld [vmem:[#allocation10_spill] sm:$0xff]  ;;  %v6913_v24 = vld [vmem:[#allocation125_spill] sm:$0xff] }
  0xc2   :  { %v4822_v16 = vadd.f32 %v6882_v27, %v6880_v35  ;;  %v6889_v51 = vmax.f32 %v6888_v12, 0.0  ;;  %v6890_v18 = vsel %vm4415_vm1, %v4327_v61, %v4479_v62  ;;  %v3456_v54 = vpop.eup %3455  ;;  %v2240_v0 = vmul.f32 0.6931472, %v3452_v59  ;;  %v6905_v48 = vld [vmem:[#allocation110_spill] sm:$0xff] }
  0xc3   :  { %v6893_v10 = vmax.f32 %v6892_v58, 0.0  ;;  %vm6894_vm0 = vnez %v6773_v39  ;;  %v6898_v11 = vmax.f32 %v6897_v49, 0.0  ;;  %vm6899_vm2 = vnez %v6776_v20  ;;  %v6906_v39 = vld [vmem:[#allocation124_spill] sm:$0xff]  ;;  %v6909_v20 = vld [vmem:[#allocation13_spill] sm:$0xff]  ;;  %v6919_v58 = vld [vmem:[#allocation131_spill] sm:$0xff] }
  0xc4   :  { %6883 = vst [vmem:[#allocation116_spill] sm:$0xff] %v4822_v16  ;;  %v4842_v23 = vadd.f32 %v6890_v18, %v6889_v51  ;;  %v6895_v1 = vsel %vm6894_vm0, %v4338_v6, %v4487_v50  ;;  %v6901_v61 = vsel %vm6899_vm2, %v4345_v42, %v6900_v28  ;;  %v6904_v33 = vmax.f32 %v6903_v34, 0.0  ;;  %v6912_v42 = vld [vmem:[#allocation111_spill] sm:$0xff]  ;;  %v6927_v28 = vld [vmem:[#allocation16_spill] sm:$0xff] }
  0xc5   :  { %v4851_v15 = vadd.f32 %v6895_v1, %v6893_v10  ;;  %v4860_v62 = vadd.f32 %v6901_v61, %v6898_v11  ;;  %v6907_v63 = vsel %vm4439_vm4, %v6905_v48, %v6906_v39  ;;  %v2237_v6 = vsel %vm4782_vm13, %v2234_v9, %v2231_v21  ;;  %v3458_v9 = vpop.eup %3457  ;;  %v6922_v21 = vld [vmem:[#allocation15_spill] sm:$0xff]  ;;  %v6924_v1 = vld [vmem:[#allocation134_spill] sm:$0xff] }
  0xc6   :  { %6891 = vst [vmem:[#allocation117_spill] sm:$0xff] %v4842_v23  ;;  %v4869_v59 = vadd.f32 %v6907_v63, %v6904_v33  ;;  %v2270_v50 = vmul.f32 %v6868_v31, %v2269_v26  ;;  %v6910_v43 = vmax.f32 %v6909_v20, 0.0  ;;  %v6914_v27 = vsel %vm4445_vm5, %v6912_v42, %v6913_v24  ;;  %v6932_v33 = vld [vmem:[#allocation17_spill] sm:$0xff]  ;;  %v6936_v39 = vld [vmem:[#allocation18_spill] sm:$0xff]  ;;  %v7077_v16 = vld [vmem:[#allocation71_spill] sm:$0xff] }
  0xc7   :  { %6896 = vst [vmem:[#allocation118_spill] sm:$0xff] %v4851_v15  ;;  %6902 = vst [vmem:[#allocation8_spill] sm:$0xff] %v4860_v62  ;;  %v6917_v51 = vmax.f32 %v6916_v52, 0.0  ;;  %v6920_v10 = vsel %vm4457_vm6, %v4373_v44, %v6919_v58  ;;  %v2249_v31 = vmul.f32 0.6931472, %v3454_v5  ;;  %v6923_v26 = vmax.f32 %v6922_v21, 0.0 }
  0xc8   :  { %6908 = vst [vmem:[#allocation122_spill] sm:$0xff] %v4869_v59  ;;  %v4881_v12 = vadd.f32 %v6914_v27, %v6910_v43  ;;  %v6925_v49 = vsel %vm4468_vm7, %v4383_v7, %v6924_v1  ;;  %v6928_v61 = vmax.f32 %v6927_v28, 0.0  ;;  %vm6929_vm1 = vnez %v6795_v29  ;;  %v6949_v42 = vld [vmem:[#allocation121_spill] sm:$0xff]  ;;  %v7074_v15 = vld [vmem:[#allocation68_spill] sm:$0xff] }
  0xc9   :  { %v4890_v4 = vadd.f32 %v6920_v10, %v6917_v51  ;;  %v4899_v11 = vadd.f32 %v6925_v49, %v6923_v26  ;;  %v6930_v44 = vsel %vm6929_vm1, %v4394_v45, %v4577_v3  ;;  %v6933_v5 = vmax.f32 %v6932_v33, 0.0  ;;  %v6940_v3 = vld [vmem:[#allocation19_spill] sm:$0xff]  ;;  %v6957_v51 = vld [vmem:[#allocation126_spill] sm:$0xff]  ;;  %v6963_v26 = vld [vmem:[#allocation132_spill] sm:$0xff] }
  0xca   :  { %6915 = vst [vmem:[#allocation9_spill] sm:$0xff] %v4881_v12  ;;  %v4908_v34 = vadd.f32 %v6930_v44, %v6928_v61  ;;  %v2258_v7 = vmul.f32 0.6931472, %v3456_v54  ;;  %v6937_v63 = vmax.f32 %v6936_v39, 0.0  ;;  %v6938_v29 = vsel %vm4495_vm10, %v4420_v60, %v4590_v57  ;;  %v6953_v60 = vld [vmem:[#allocation21_spill] sm:$0xff]  ;;  %v6961_v10 = vld [vmem:[#allocation22_spill] sm:$0xff] }
  0xcb   :  { %6921 = vst [vmem:[#allocation10_spill] sm:$0xff] %v4890_v4  ;;  %6926 = vst [vmem:[#allocation11_spill] sm:$0xff] %v4899_v11  ;;  %v4917_v48 = vadd.f32 %v6934_v25, %v6933_v5  ;;  %v6941_v20 = vmax.f32 %v6940_v3, 0.0  ;;  %vm6942_vm4 = vnez %v6807_v8  ;;  %v6947_v54 = vmax.f32 %v6946_v46, 0.0  ;;  %v6955_v8 = vld [vmem:[#allocation128_spill] sm:$0xff]  ;;  %v6965_v1 = vld [vmem:[#allocation129_spill] sm:$0xff] }
  0xcc   :  { %6931 = vst [vmem:[#allocation123_spill] sm:$0xff] %v4908_v34  ;;  %v4926_v45 = vadd.f32 %v6938_v29, %v6937_v63  ;;  %v6944_v43 = vsel %vm6942_vm4, %v4462_v53, %v6943_v22  ;;  %v6951_v24 = vsel %vm4516_vm12, %v6949_v42, %v6950_v32  ;;  %v2246_v57 = vsel %vm4798_vm3, %v2243_v56, %v2240_v0  ;;  %v6958_v53 = vld [vmem:[#allocation141_spill] sm:$0xff]  ;;  %v6966_v49 = vld [vmem:[#allocation142_spill] sm:$0xff]  ;;  %v6971_v0 = vld [vmem:[#allocation135_spill] sm:$0xff] }
  0xcd   :  { %6935 = vst [vmem:[#allocation12_spill] sm:$0xff] %v4917_v48  ;;  %v4935_v19 = vadd.f32 %v6944_v43, %v6941_v20  ;;  %v4944_v27 = vadd.f32 %v6951_v24, %v6947_v54  ;;  %v6954_v52 = vmax.f32 %v6953_v60, 0.0  ;;  %vm6956_vm5 = vnez %v6955_v8  ;;  %v6973_v44 = vld [vmem:[#allocation130_spill] sm:$0xff]  ;;  %v6974_v33 = vld [vmem:[#allocation143_spill] sm:$0xff]  ;;  %v6977_v63 = vld [vmem:[#allocation24_spill] sm:$0xff] }
  0xce   :  { %6939 = vst [vmem:[#allocation110_spill] sm:$0xff] %v4926_v45  ;;  %v6959_v18 = vsel %vm6956_vm5, %v6957_v51, %v6958_v53  ;;  %v6962_v21 = vmax.f32 %v6961_v10, 0.0  ;;  %vm6964_vm6 = vnez %v6963_v26  ;;  %v6970_v56 = vmax.f32 %v6969_v47, 0.0  ;;  %v6979_v3 = vld [vmem:[#allocation136_spill] sm:$0xff]  ;;  %v6981_v20 = vld [vmem:[#allocation133_spill] sm:$0xff]  ;;  %v6988_v32 = vld [vmem:[#allocation138_spill] sm:$0xff] }
  0xcf   :  { %6945 = vst [vmem:[#allocation124_spill] sm:$0xff] %v4935_v19  ;;  %6952 = vst [vmem:[#allocation13_spill] sm:$0xff] %v4944_v27  ;;  %v4955_v58 = vadd.f32 %v6959_v18, %v6954_v52  ;;  %v6967_v28 = vsel %vm6964_vm6, %v6965_v1, %v6966_v49  ;;  %vm6972_vm7 = vnez %v6971_v0  ;;  %v2267_v39 = vmul.f32 0.6931472, %v3458_v9  ;;  %v6982_v22 = vld [vmem:[#allocation144_spill] sm:$0xff]  ;;  %v6984_v54 = vld [vmem:[#allocation25_spill] sm:$0xff] }
  0xd0   :  { %v4964_v61 = vadd.f32 %v6967_v28, %v6962_v21  ;;  %v6975_v5 = vsel %vm6972_vm7, %v6973_v44, %v6974_v33  ;;  %v6978_v29 = vmax.f32 %v6977_v63, 0.0  ;;  %vm6980_vm9 = vnez %v6979_v3  ;;  %v6986_v42 = vld [vmem:[#allocation137_spill] sm:$0xff]  ;;  %v6989_v24 = vld [vmem:[#allocation147_spill] sm:$0xff]  ;;  %v6992_v8 = vld [vmem:[#allocation26_spill] sm:$0xff] }
  0xd1   :  { %6960 = vst [vmem:[#allocation119_spill] sm:$0xff] %v4955_v58  ;;  %v4973_v25 = vadd.f32 %v6975_v5, %v6970_v56  ;;  %v6983_v43 = vsel %vm6980_vm9, %v6981_v20, %v6982_v22  ;;  %v6985_v35 = vmax.f32 %v6984_v54, 0.0  ;;  %vm6987_vm10 = vnez %v6986_v42  ;;  %v6994_v51 = vld [vmem:[#allocation146_spill] sm:$0xff]  ;;  %v6996_v53 = vld [vmem:[#allocation145_spill] sm:$0xff]  ;;  %v7000_v1 = vld [vmem:[#allocation27_spill] sm:$0xff] }
  0xd2   :  { %6968 = vst [vmem:[#allocation111_spill] sm:$0xff] %v4964_v61  ;;  %v4982_v46 = vadd.f32 %v6983_v43, %v6978_v29  ;;  %v6990_v60 = vsel %vm6987_vm10, %v6988_v32, %v6989_v24  ;;  %v6993_v9 = vmax.f32 %v6992_v8, 0.0  ;;  %vm6995_vm12 = vnez %v6994_v51  ;;  %v6997_v18 = vld [vmem:[#allocation113_spill] sm:$0xff]  ;;  %v7004_v47 = vld [vmem:[#allocation148_spill] sm:$0xff]  ;;  %v7005_v56 = vld [vmem:[#allocation114_spill] sm:$0xff] }
  0xd3   :  { %6976 = vst [vmem:[#allocation125_spill] sm:$0xff] %v4973_v25  ;;  %v4991_v52 = vadd.f32 %v6990_v60, %v6985_v35  ;;  %v6998_v10 = vsel %vm6995_vm12, %v6996_v53, %v6997_v18  ;;  %v2255_v26 = vsel %vm4806_vm15, %v2252_v37, %v2249_v31  ;;  %v7001_v49 = vmax.f32 %v7000_v1, 0.0  ;;  %v7002_v28 = vld [vmem:[#allocation149_spill] sm:$0xff]  ;;  %v7008_v33 = vld [vmem:[#allocation28_spill] sm:$0xff]  ;;  %v7010_v63 = vld [vmem:[#allocation150_spill] sm:$0xff] }
  0xd4   :  { %v5000_v21 = vadd.f32 %v6998_v10, %v6993_v9  ;;  %vm7003_vm13 = vnez %v7002_v28  ;;  %v7009_v5 = vmax.f32 %v7008_v33, 0.0  ;;  %vm7011_vm14 = vnez %v7010_v63  ;;  %v7012_v29 = vld [vmem:[#allocation112_spill] sm:$0xff]  ;;  %v7013_v3 = vld [vmem:[#allocation115_spill] sm:$0xff]  ;;  %v7019_v54 = vld [vmem:[#allocation30_spill] sm:$0xff] }
  0xd5   :  { %6991 = vst [vmem:[#allocation14_spill] sm:$0xff] %v4991_v52  ;;  %v7006_v0 = vsel %vm7003_vm13, %v7004_v47, %v7005_v56  ;;  %v7014_v20 = vsel %vm7011_vm14, %v7012_v29, %v7013_v3  ;;  %v7017_v37 = vmax.f32 %v7016_v13, 0.0  ;;  %v2264_v43 = vsel %vm4827_vm8, %v2261_v41, %v2258_v7  ;;  %v7022_v32 = vld [vmem:[#allocation31_spill] sm:$0xff]  ;;  %v7025_v8 = vld [vmem:[#allocation32_spill] sm:$0xff]  ;;  %v7028_v53 = vld [vmem:[#allocation33_spill] sm:$0xff] }
  0xd6   :  { %6999 = vst [vmem:[#allocation120_spill] sm:$0xff] %v5000_v21  ;;  %v5011_v44 = vadd.f32 %v7006_v0, %v7001_v49  ;;  %v5020_v22 = vadd.f32 %v7014_v20, %v7009_v5  ;;  %v7020_v35 = vmax.f32 %v7019_v54, 0.0  ;;  %v7023_v24 = vmax.f32 %v7022_v32, 0.0  ;;  %v7034_v41 = vld [vmem:[#allocation35_spill] sm:$0xff]  ;;  %v7037_v49 = vld [vmem:[#allocation36_spill] sm:$0xff]  ;;  %v7040_v47 = vld [vmem:[#allocation98_spill] sm:$0xff] }
  0xd7   :  { %v5024_v31 = vadd.f32 %v2183_v40, %v7017_v37  ;;  %v7026_v9 = vmax.f32 %v7025_v8, 0.0  ;;  %v7029_v18 = vmax.f32 %v7028_v53, 0.0  ;;  %v7031_v40 = vld [vmem:[#allocation34_spill] sm:$0xff]  ;;  %v7035_v7 = vmax.f32 %v7034_v41, 0.0  ;;  %v7045_v63 = vld [vmem:[#allocation100_spill] sm:$0xff]  ;;  %v7048_v3 = vld [vmem:[#allocation45_spill] sm:$0xff] }
  0xd8   :  { %7007 = vst [vmem:[#allocation131_spill] sm:$0xff] %v5011_v44  ;;  %7015 = vst [vmem:[#allocation15_spill] sm:$0xff] %v5020_v22  ;;  %v5030_v42 = vadd.f32 %v2192_v38, %v7020_v35  ;;  %v5034_v60 = vadd.f32 %v2201_v36, %v7023_v24  ;;  %v7032_v1 = vmax.f32 %v7031_v40, 0.0  ;;  %v7038_v28 = vmax.f32 %v7037_v49, 0.0  ;;  %v7049_v20 = vld [vmem:[#allocation46_spill] sm:$0xff]  ;;  %v7052_v37 = vld [vmem:[#allocation49_spill] sm:$0xff] }
  0xd9   :  { %7018 = vst [vmem:[#allocation134_spill] sm:$0xff] %v5024_v31  ;;  %v5038_v51 = vadd.f32 %v2210_v14, %v7026_v9  ;;  %v5042_v10 = vadd.f32 %v2219_v30, %v7029_v18  ;;  %v5050_v38 = vadd.f32 %v2237_v6, %v7035_v7  ;;  %v2273_v14 = vsel %vm4831_vm11, %v2270_v50, %v2267_v39  ;;  %v7043_v30 = vld [vmem:[#allocation43_spill] sm:$0xff]  ;;  %v7053_v35 = vld [vmem:[#allocation50_spill] sm:$0xff]  ;;  %v7058_v40 = vld [vmem:[#allocation52_spill] sm:$0xff] }
  0xda   :  { %7021 = vst [vmem:[#allocation16_spill] sm:$0xff] %v5030_v42  ;;  %7024 = vst [vmem:[#allocation17_spill] sm:$0xff] %v5034_v60  ;;  %v5046_v2 = vadd.f32 %v2228_v55, %v7032_v1  ;;  %v5054_v36 = vadd.f32 %v2246_v57, %v7038_v28  ;;  %v7041_v56 = vmax.f32 %v7040_v47, 0.0  ;;  %v5063_v33 = vmul.f32 1.4, %v7043_v30  ;;  %v7044_v55 = vld [vmem:[#allocation44_spill] sm:$0xff] }
  0xdb   :  { %7027 = vst [vmem:[#allocation18_spill] sm:$0xff] %v5038_v51  ;;  %7030 = vst [vmem:[#allocation19_spill] sm:$0xff] %v5042_v10  ;;  %v5066_v5 = vmul.f32 1.4, %v7044_v55  ;;  %v7046_v6 = vmax.f32 %v7045_v63, 0.0  ;;  %v7050_v50 = vld [vmem:[#allocation47_spill] sm:$0xff] }
  0xdc   :  { %7033 = vst [vmem:[#allocation139_spill] sm:$0xff] %v5046_v2  ;;  %7036 = vst [vmem:[#allocation20_spill] sm:$0xff] %v5050_v38  ;;  %v5060_v0 = vadd.f32 %v2255_v26, %v7041_v56  ;;  %v5073_v57 = vmul.f32 1.4, %v7048_v3  ;;  %v5076_v17 = vmul.f32 1.4, %v7049_v20 }
  0xdd   :  { %7039 = vst [vmem:[#allocation127_spill] sm:$0xff] %v5054_v36  ;;  %v5070_v29 = vadd.f32 %v2264_v43, %v7046_v6  ;;  %v5079_v39 = vmul.f32 1.4, %v7050_v50  ;;  %v7051_v26 = vld [vmem:[#allocation48_spill] sm:$0xff]  ;;  %v5085_v54 = vmul.f32 1.4, %v7052_v37 }
  0xde   :  { %7042 = vst [vmem:[#allocation121_spill] sm:$0xff] %v5060_v0  ;;  %v5082_v13 = vmul.f32 1.4, %v7051_v26  ;;  %v5088_v32 = vmul.f32 1.4, %v7053_v35  ;;  %v7054_v24 = vld [vmem:[#allocation102_spill] sm:$0xff] }
  0xdf   :  { %7047 = vst [vmem:[#allocation140_spill] sm:$0xff] %v5070_v29  ;;  %v7055_v8 = vmax.f32 %v7054_v24, 0.0  ;;  %v7057_v53 = vld [vmem:[#allocation51_spill] sm:$0xff]  ;;  %v5100_v1 = vmul.f32 1.4, %v7058_v40  ;;  %v7059_v41 = vld [vmem:[#allocation53_spill] sm:$0xff] }
  0xe0   :  { %v5097_v18 = vmul.f32 1.4, %v7057_v53  ;;  %v5103_v7 = vmul.f32 1.4, %v7059_v41  ;;  %v7060_v49 = vld [vmem:[#allocation54_spill] sm:$0xff]  ;;  %v7061_v47 = vld [vmem:[#allocation55_spill] sm:$0xff] }
  0xe1   :  { %v5094_v9 = vadd.f32 %v2273_v14, %v7055_v8  ;;  %v5106_v28 = vmul.f32 1.4, %v7060_v49  ;;  %v5109_v56 = vmul.f32 1.4, %v7061_v47  ;;  %v7062_v63 = vld [vmem:[#allocation56_spill] sm:$0xff]  ;;  %v7063_v24 = vld [vmem:[#allocation57_spill] sm:$0xff] }
  0xe2   :  { %v5112_v6 = vmul.f32 1.4, %v7062_v63  ;;  %v5117_v8 = vmul.f32 1.4, %v7063_v24  ;;  %v7064_v43 = vld [vmem:[#allocation58_spill] sm:$0xff]  ;;  %v7065_v41 = vld [vmem:[#allocation59_spill] sm:$0xff] }
  0xe3   :  { %7056 = vst [vmem:[#allocation21_spill] sm:$0xff] %v5094_v9  ;;  %v5120_v53 = vmul.f32 1.4, %v7064_v43  ;;  %v5123_v40 = vmul.f32 1.4, %v7065_v41  ;;  %v7066_v47 = vld [vmem:[#allocation60_spill] sm:$0xff] }
  0xe4   :  { %v5128_v37 = vmul.f32 1.4, %v7066_v47  ;;  %v7067_v63 = vld [vmem:[#allocation61_spill] sm:$0xff]  ;;  %v7068_v50 = vld [vmem:[#allocation62_spill] sm:$0xff]  ;;  %v7069_v43 = vld [vmem:[#allocation63_spill] sm:$0xff] }
  0xe5   :  { %v5131_v35 = vmul.f32 1.4, %v7067_v63  ;;  %v5134_v14 = vmul.f32 1.4, %v7068_v50  ;;  %v5139_v26 = vmul.f32 1.4, %v7069_v43 }
  0xe6   :  { %v7070_v41 = vld [vmem:[#allocation64_spill] sm:$0xff]  ;;  %v7071_v20 = vld [vmem:[#allocation65_spill] sm:$0xff]  ;;  %v7072_v63 = vld [vmem:[#allocation66_spill] sm:$0xff]  ;;  %v5156_v24 = vmul.f32 1.4, %v7074_v15 }
  0xe7   :  { %v5142_v3 = vmul.f32 1.4, %v7070_v41  ;;  %v5145_v49 = vmul.f32 1.4, %v7071_v20  ;;  %v5150_v30 = vmul.f32 1.4, %v7072_v63 }
  0xe8   :  { %v7073_v50 = vld [vmem:[#allocation67_spill] sm:$0xff]  ;;  %v7075_v41 = vld [vmem:[#allocation69_spill] sm:$0xff]  ;;  %v7076_v20 = vld [vmem:[#allocation70_spill] sm:$0xff]  ;;  %v5167_v47 = vmul.f32 1.4, %v7077_v16 }
  0xe9   :  { %v5153_v55 = vmul.f32 1.4, %v7073_v50  ;;  %v5161_v62 = vmul.f32 1.4, %v7075_v41  ;;  %v5164_v23 = vmul.f32 1.4, %v7076_v20 }
  0xea   :  { %v7078_v50 = vld [vmem:[#allocation72_spill] sm:$0xff]  ;;  %v7079_v15 = vld [vmem:[#allocation73_spill] sm:$0xff]  ;;  %v7080_v29 = vld [vmem:[#allocation74_spill] sm:$0xff] }
  0xeb   :  { %v5172_v59 = vmul.f32 1.4, %v7078_v50  ;;  %v5175_v9 = vmul.f32 1.4, %v7079_v15  ;;  %v5178_v43 = vmul.f32 1.4, %v7080_v29 }
  0xec   :  { %v7081_v20 = vld [vmem:[#allocation75_spill] sm:$0xff]  ;;  %v7082_v16 = vld [vmem:[#allocation76_spill] sm:$0xff]  ;;  %v7083_v36 = vld [vmem:[#allocation77_spill] sm:$0xff] }
  0xed   :  { %v5183_v12 = vmul.f32 1.4, %v7081_v20  ;;  %v5186_v0 = vmul.f32 1.4, %v7082_v16  ;;  %v5189_v63 = vmul.f32 1.4, %v7083_v36 }
  0xee   :  { %v7084_v15 = vld [vmem:[#allocation78_spill] sm:$0xff]  ;;  %v7085_v29 = vld [vmem:[#allocation79_spill] sm:$0xff]  ;;  %v7086_v2 = vld [vmem:[#allocation80_spill] sm:$0xff] }
  0xef   :  { %v5194_v4 = vmul.f32 1.4, %v7084_v15  ;;  %v5197_v38 = vmul.f32 1.4, %v7085_v29  ;;  %v5200_v41 = vmul.f32 1.4, %v7086_v2 }
  0xf0   :  { %v7087_v16 = vld [vmem:[#allocation81_spill] sm:$0xff]  ;;  %v7088_v36 = vld [vmem:[#allocation82_spill] sm:$0xff]  ;;  %v7089_v51 = vld [vmem:[#allocation83_spill] sm:$0xff] }
  0xf1   :  { %v5205_v11 = vmul.f32 1.4, %v7087_v16  ;;  %v5208_v10 = vmul.f32 1.4, %v7088_v36  ;;  %v5211_v50 = vmul.f32 1.4, %v7089_v51 }
  0xf2   :  { %v7090_v29 = vld [vmem:[#allocation84_spill] sm:$0xff]  ;;  %v7091_v2 = vld [vmem:[#allocation85_spill] sm:$0xff]  ;;  %v7092_v42 = vld [vmem:[#allocation86_spill] sm:$0xff] }
  0xf3   :  { %v5216_v34 = vmul.f32 1.4, %v7090_v29  ;;  %v5219_v60 = vmul.f32 1.4, %v7091_v2  ;;  %v5222_v20 = vmul.f32 1.4, %v7092_v42 }
  0xf4   :  { %v7093_v36 = vld [vmem:[#allocation87_spill] sm:$0xff]  ;;  %v7094_v51 = vld [vmem:[#allocation88_spill] sm:$0xff]  ;;  %v7095_v22 = vld [vmem:[#allocation89_spill] sm:$0xff] }
  0xf5   :  { %v5227_v48 = vmul.f32 1.4, %v7093_v36  ;;  %v5230_v31 = vmul.f32 1.4, %v7094_v51  ;;  %v5233_v15 = vmul.f32 1.4, %v7095_v22 }
  0xf6   :  { %v7097_v2 = vld [vmem:[#allocation90_spill] sm:$0xff]  ;;  %v7098_v42 = vld [vmem:[#allocation91_spill] sm:$0xff]  ;;  %v7100_v21 = vld [vmem:[#allocation92_spill] sm:$0xff] }
  0xf7   :  { %7096 = vst [vmem:[#allocation128_spill] sm:$0xff] %v5233_v15  ;;  %v5238_v45 = vmul.f32 1.4, %v7097_v2  ;;  %v5241_v44 = vmul.f32 1.4, %v7098_v42  ;;  %v7102_v51 = vld [vmem:[#allocation93_spill] sm:$0xff] }
  0xf8   :  { %v5244_v16 = vmul.f32 1.4, %v7100_v21  ;;  %v5249_v19 = vmul.f32 1.4, %v7102_v51  ;;  %v7103_v22 = vld [vmem:[#allocation94_spill] sm:$0xff]  ;;  %v7105_v15 = vld [vmem:[#allocation95_spill] sm:$0xff] }
  0xf9   :  { %7099 = vst [vmem:[#allocation126_spill] sm:$0xff] %v5241_v44  ;;  %v5252_v52 = vmul.f32 1.4, %v7103_v22  ;;  %v5255_v29 = vmul.f32 1.4, %v7105_v15  ;;  %v7107_v42 = vld [vmem:[#allocation96_spill] sm:$0xff] }
  0xfa   :  { %7101 = vst [vmem:[#allocation141_spill] sm:$0xff] %v5244_v16  ;;  %v5260_v27 = vmul.f32 1.4, %v7107_v42  ;;  %v7108_v21 = vld [vmem:[#allocation97_spill] sm:$0xff]  ;;  %v7110_v44 = vld [vmem:[#allocation99_spill] sm:$0xff]  ;;  %v5300_v42 = vadd.f32 1.0, %v5066_v5 }
  0xfb   :  { %7104 = vst [vmem:[#allocation22_spill] sm:$0xff] %v5252_v52  ;;  %7106 = vst [vmem:[#allocation132_spill] sm:$0xff] %v5255_v29  ;;  %v5263_v16 = vmul.f32 1.4, %v7108_v21  ;;  %v5266_v36 = vmul.f32 1.4, %v7110_v44 }
  0xfc   :  { %v7112_v22 = vld [vmem:[#allocation101_spill] sm:$0xff]  ;;  %v7113_v15 = vld [vmem:[#allocation103_spill] sm:$0xff]  ;;  %v7115_v52 = vld [vmem:[#allocation104_spill] sm:$0xff]  ;;  %v5321_v5 = vadd.f32 1.0, %v5097_v18  ;;  %v5342_v18 = vadd.f32 1.0, %v5120_v53  ;;  %v5363_v53 = vadd.f32 1.0, %v5145_v49 }
  0xfd   :  { %7109 = vst [vmem:[#allocation129_spill] sm:$0xff] %v5263_v16  ;;  %7111 = vst [vmem:[#allocation142_spill] sm:$0xff] %v5266_v36  ;;  %v5271_v58 = vmul.f32 1.4, %v7112_v22  ;;  %v5274_v29 = vmul.f32 1.4, %v7113_v15 }
  0xfe   :  { %v5277_v2 = vadd.f32 1.0, %v7115_v52  ;;  %v7116_v21 = vld [vmem:[#allocation105_spill] sm:$0xff]  ;;  %v7117_v44 = vld [vmem:[#allocation106_spill] sm:$0xff]  ;;  %v7118_v16 = vld [vmem:[#allocation107_spill] sm:$0xff]  ;;  %v5297_v52 = vadd.f32 1.0, %v5063_v33  ;;  %v5318_v33 = vadd.f32 1.0, %v5088_v32 }
  0xff   :  { %7114 = vst [vmem:[#allocation23_spill] sm:$0xff] %v5274_v29  ;;  %v5282_v61 = vadd.f32 1.0, %v7116_v21  ;;  %v5285_v36 = vadd.f32 1.0, %v7117_v44  ;;  %v5288_v51 = vadd.f32 1.0, %v7118_v16  ;;  %v7119_v22 = vld [vmem:[#allocation108_spill] sm:$0xff]  ;;  %v7120_v15 = vld [vmem:[#allocation109_spill] sm:$0xff] }
 0x100   :  { %v5291_v25 = vadd.f32 1.0, %v7119_v22  ;;  %v5294_v29 = vadd.f32 1.0, %v7120_v15  ;;  %v5303_v21 = vadd.f32 1.0, %v5073_v57  ;;  %v5306_v44 = vadd.f32 1.0, %v5076_v17 }
 0x101   :  { %v5309_v16 = vadd.f32 1.0, %v5079_v39  ;;  %v5312_v22 = vadd.f32 1.0, %v5082_v13  ;;  %v5315_v15 = vadd.f32 1.0, %v5085_v54  ;;  %v5324_v57 = vadd.f32 1.0, %v5100_v1 }
 0x102   :  { %v5327_v17 = vadd.f32 1.0, %v5103_v7  ;;  %v5330_v39 = vadd.f32 1.0, %v5106_v28  ;;  %v5333_v13 = vadd.f32 1.0, %v5109_v56  ;;  %v5336_v54 = vadd.f32 1.0, %v5112_v6 }
 0x103   :  { %v5339_v32 = vadd.f32 1.0, %v5117_v8  ;;  %v5345_v1 = vadd.f32 1.0, %v5123_v40  ;;  %v5348_v7 = vadd.f32 1.0, %v5128_v37  ;;  %v5351_v28 = vadd.f32 1.0, %v5131_v35 }
 0x104   :  { %v5354_v56 = vadd.f32 1.0, %v5134_v14  ;;  %v5357_v6 = vadd.f32 1.0, %v5139_v26  ;;  %v5360_v8 = vadd.f32 1.0, %v5142_v3  ;;  %v5366_v40 = vadd.f32 1.0, %v5150_v30 }
 0x105   :  { %v5369_v37 = vadd.f32 1.0, %v5153_v55  ;;  %v5372_v35 = vadd.f32 1.0, %v5156_v24  ;;  %v5375_v14 = vadd.f32 1.0, %v5161_v62  ;;  %v5378_v26 = vadd.f32 1.0, %v5164_v23 }
 0x106   :  { %v5381_v3 = vadd.f32 1.0, %v5167_v47  ;;  %v5384_v49 = vadd.f32 1.0, %v5172_v59  ;;  %v5387_v30 = vadd.f32 1.0, %v5175_v9  ;;  %v5390_v55 = vadd.f32 1.0, %v5178_v43 }
 0x107   :  { %v5393_v24 = vadd.f32 1.0, %v5183_v12  ;;  %v5396_v62 = vadd.f32 1.0, %v5186_v0  ;;  %v5399_v23 = vadd.f32 1.0, %v5189_v63  ;;  %v5402_v47 = vadd.f32 1.0, %v5194_v4 }
 0x108   :  { %7121 = vst [vmem:[#allocation135_spill] sm:$0xff] %v5390_v55  ;;  %v5405_v59 = vadd.f32 1.0, %v5197_v38  ;;  %v5408_v9 = vadd.f32 1.0, %v5200_v41  ;;  %v5411_v43 = vadd.f32 1.0, %v5205_v11  ;;  %v5414_v12 = vadd.f32 1.0, %v5208_v10  ;;  %v7136_v10 = vld [vmem:[#allocation128_spill] sm:$0xff] }
 0x109   :  { %7122 = vst [vmem:[#allocation130_spill] sm:$0xff] %v5393_v24  ;;  %7123 = vst [vmem:[#allocation143_spill] sm:$0xff] %v5396_v62  ;;  %v5417_v0 = vadd.f32 1.0, %v5211_v50  ;;  %v5420_v63 = vadd.f32 1.0, %v5216_v34  ;;  %v5423_v4 = vadd.f32 1.0, %v5219_v60  ;;  %v5426_v38 = vadd.f32 1.0, %v5222_v20 }
 0x10a   :  { %7124 = vst [vmem:[#allocation24_spill] sm:$0xff] %v5399_v23  ;;  %7125 = vst [vmem:[#allocation136_spill] sm:$0xff] %v5402_v47  ;;  %v5429_v41 = vadd.f32 1.0, %v5227_v48  ;;  %v5432_v11 = vadd.f32 1.0, %v5230_v31  ;;  %v5438_v50 = vadd.f32 1.0, %v5238_v45  ;;  %v7139_v34 = vld [vmem:[#allocation126_spill] sm:$0xff] }
 0x10b   :  { %7126 = vst [vmem:[#allocation133_spill] sm:$0xff] %v5405_v59  ;;  %7127 = vst [vmem:[#allocation144_spill] sm:$0xff] %v5408_v9  ;;  %v7141_v60 = vld [vmem:[#allocation141_spill] sm:$0xff]  ;;  %v5447_v20 = vadd.f32 1.0, %v5249_v19  ;;  %v7144_v48 = vld [vmem:[#allocation22_spill] sm:$0xff] }
 0x10c   :  { %7128 = vst [vmem:[#allocation25_spill] sm:$0xff] %v5411_v43  ;;  %7129 = vst [vmem:[#allocation137_spill] sm:$0xff] %v5414_v12  ;;  %v5435_v12 = vadd.f32 1.0, %v7136_v10  ;;  %v7146_v31 = vld [vmem:[#allocation132_spill] sm:$0xff]  ;;  %v5456_v10 = vadd.f32 1.0, %v5260_v27  ;;  %v7149_v45 = vld [vmem:[#allocation129_spill] sm:$0xff] }
 0x10d   :  { %7130 = vst [vmem:[#allocation138_spill] sm:$0xff] %v5417_v0  ;;  %7131 = vst [vmem:[#allocation147_spill] sm:$0xff] %v5420_v63  ;;  %v5441_v63 = vadd.f32 1.0, %v7139_v34  ;;  %v7151_v34 = vld [vmem:[#allocation142_spill] sm:$0xff]  ;;  %v7154_v19 = vld [vmem:[#allocation23_spill] sm:$0xff] }
 0x10e   :  { %7132 = vst [vmem:[#allocation26_spill] sm:$0xff] %v5423_v4  ;;  %7133 = vst [vmem:[#allocation146_spill] sm:$0xff] %v5426_v38  ;;  %v5444_v4 = vadd.f32 1.0, %v7141_v60  ;;  %v5465_v60 = vadd.f32 1.0, %v5271_v58  ;;  %v7158_v27 = vld [vmem:[#allocation131_spill] sm:$0xff]  ;;  %v7161_v58 = vld [vmem:[#allocation16_spill] sm:$0xff] }
 0x10f   :  { %7134 = vst [vmem:[#allocation145_spill] sm:$0xff] %v5429_v41  ;;  %7135 = vst [vmem:[#allocation113_spill] sm:$0xff] %v5432_v11  ;;  %v5450_v41 = vadd.f32 1.0, %v7144_v48  ;;  %v5453_v11 = vadd.f32 1.0, %v7146_v31  ;;  %v7156_v48 = vld [vmem:[#allocation14_spill] sm:$0xff]  ;;  %v7157_v31 = vld [vmem:[#allocation120_spill] sm:$0xff] }
 0x110   :  { %7137 = vst [vmem:[#allocation27_spill] sm:$0xff] %v5435_v12  ;;  %7138 = vst [vmem:[#allocation149_spill] sm:$0xff] %v5438_v50  ;;  %v5459_v50 = vadd.f32 1.0, %v7149_v45  ;;  %v7159_v45 = vld [vmem:[#allocation15_spill] sm:$0xff]  ;;  %v7166_v59 = vld [vmem:[#allocation20_spill] sm:$0xff] }
 0x111   :  { %7140 = vst [vmem:[#allocation148_spill] sm:$0xff] %v5441_v63  ;;  %7142 = vst [vmem:[#allocation114_spill] sm:$0xff] %v5444_v4  ;;  %v5462_v63 = vadd.f32 1.0, %v7151_v34  ;;  %v7160_v34 = vld [vmem:[#allocation134_spill] sm:$0xff]  ;;  %v7164_v38 = vld [vmem:[#allocation19_spill] sm:$0xff]  ;;  %v2493_v47 = vcombine.high %v7166_v59, %v7166_v59 }
 0x112   :  { %7143 = vst [vmem:[#allocation28_spill] sm:$0xff] %v5447_v20  ;;  %7145 = vst [vmem:[#allocation150_spill] sm:$0xff] %v5450_v41  ;;  %v5468_v20 = vadd.f32 1.0, %v7154_v19  ;;  %v2483_v41 = vcombine.high %v7156_v48, %v7156_v48  ;;  %v7162_v19 = vld [vmem:[#allocation17_spill] sm:$0xff]  ;;  %v7163_v4 = vld [vmem:[#allocation18_spill] sm:$0xff]  ;;  %v2491_v0 = vcombine.high %v7164_v38, %v7164_v38 }
 0x113   :  { %7147 = vst [vmem:[#allocation112_spill] sm:$0xff] %v5453_v11  ;;  %7148 = vst [vmem:[#allocation115_spill] sm:$0xff] %v5456_v10  ;;  %v2484_v11 = vcombine.high %v7157_v31, %v7157_v31  ;;  %v2485_v10 = vcombine.high %v7158_v27, %v7158_v27  ;;  %v2490_v12 = vcombine.high %v7163_v4, %v7163_v4  ;;  %v7165_v43 = vld [vmem:[#allocation139_spill] sm:$0xff]  ;;  %v7170_v24 = vld [vmem:[#allocation21_spill] sm:$0xff] }
 0x114   :  { %7150 = vst [vmem:[#allocation29_spill] sm:$0xff] %v5459_v50  ;;  %7152 = vst [vmem:[#allocation30_spill] sm:$0xff] %v5462_v63  ;;  %v2486_v50 = vcombine.high %v7159_v45, %v7159_v45  ;;  %v2487_v63 = vcombine.high %v7160_v34, %v7160_v34  ;;  %v2492_v9 = vcombine.high %v7165_v43, %v7165_v43  ;;  %v7167_v23 = vld [vmem:[#allocation127_spill] sm:$0xff]  ;;  %v7168_v45 = vld [vmem:[#allocation121_spill] sm:$0xff] }
 0x115   :  { %7153 = vst [vmem:[#allocation31_spill] sm:$0xff] %v5465_v60  ;;  %7155 = vst [vmem:[#allocation32_spill] sm:$0xff] %v5468_v20  ;;  %v2488_v60 = vcombine.high %v7161_v58, %v7161_v58  ;;  %v2489_v20 = vcombine.high %v7162_v19, %v7162_v19  ;;  %v2494_v34 = vcombine.high %v7167_v23, %v7167_v23  ;;  %v7171_v27 = vld [vmem:[#allocation116_spill] sm:$0xff]  ;;  %v7173_v23 = vld [vmem:[#allocation117_spill] sm:$0xff] }
 0x116   :  { %v2495_v58 = vcombine.high %v7168_v45, %v7168_v45  ;;  %v5502_v38 = vmul.f32 %v5277_v2, %v7171_v27  ;;  %v7172_v59 = vcombine.high %v7171_v27, %v7171_v27  ;;  %v5512_v55 = vmul.f32 %v5285_v36, %v7173_v23  ;;  %v7175_v4 = vld [vmem:[#allocation118_spill] sm:$0xff] }
 0x117   :  { %v7174_v19 = vcombine.high %v7173_v23, %v7173_v23  ;;  %v5522_v2 = vmul.f32 %v5291_v25, %v7175_v4  ;;  %v7176_v27 = vcombine.high %v7175_v4, %v7175_v4 }
 0x118   :  { %v5508_v43 = vmul.f32 %v7172_v59, %v5282_v61  ;;  %v7177_v59 = vld [vmem:[#allocation8_spill] sm:$0xff] }
 0x119   :  { %v5518_v62 = vmul.f32 %v7174_v19, %v5288_v51  ;;  %v5528_v61 = vmul.f32 %v7176_v27, %v5294_v29  ;;  %v5532_v36 = vmul.f32 %v5297_v52, %v7177_v59  ;;  %v7178_v23 = vcombine.high %v7177_v59, %v7177_v59  ;;  %v7180_v19 = vld [vmem:[#allocation122_spill] sm:$0xff]  ;;  %v7184_v27 = vld [vmem:[#allocation9_spill] sm:$0xff] }
 0x11a   :  { %v5542_v25 = vmul.f32 %v5303_v21, %v7180_v19  ;;  %v7182_v4 = vcombine.high %v7180_v19, %v7180_v19  ;;  %v5552_v52 = vmul.f32 %v5309_v16, %v7184_v27  ;;  %v7186_v59 = vcombine.high %v7184_v27, %v7184_v27 }
 0x11b   :  { %v5538_v51 = vmul.f32 %v7178_v23, %v5300_v42  ;;  %v7188_v23 = vld [vmem:[#allocation10_spill] sm:$0xff] }
 0x11c   :  { %7181 = vst [vmem:[#allocation34_spill] sm:$0xff] %v5542_v25  ;;  %v5548_v29 = vmul.f32 %v7182_v4, %v5306_v44  ;;  %7185 = vst [vmem:[#allocation36_spill] sm:$0xff] %v5552_v52  ;;  %v5558_v42 = vmul.f32 %v7186_v59, %v5312_v22  ;;  %v5562_v21 = vmul.f32 %v5315_v15, %v7188_v23  ;;  %v7192_v4 = vld [vmem:[#allocation11_spill] sm:$0xff]  ;;  %v3468_v25 = vld [vmem:[#allocation2 + $0x48] sm:$0xff] }
 0x11d   :  { %7179 = vst [vmem:[#allocation33_spill] sm:$0xff] %v5538_v51  ;;  %v7190_v19 = vcombine.high %v7188_v23, %v7188_v23  ;;  %v5572_v16 = vmul.f32 %v5321_v5, %v7192_v4  ;;  %v7194_v27 = vcombine.high %v7192_v4, %v7192_v4  ;;  %v7196_v59 = vld [vmem:[#allocation123_spill] sm:$0xff]  ;;  %v3469_v51 = vld [vmem:[#allocation2 + $0x50] sm:$0xff] }
 0x11e   :  { %7183 = vst [vmem:[#allocation35_spill] sm:$0xff] %v5548_v29  ;;  %7187 = vst [vmem:[#allocation98_spill] sm:$0xff] %v5558_v42  ;;  %v5582_v15 = vmul.f32 %v5327_v17, %v7196_v59  ;;  %v7198_v23 = vcombine.high %v7196_v59, %v7196_v59  ;;  %v3466_v42 = vld [vmem:[#allocation2 + $0x38] sm:$0xff] }
 0x11f   :  { %7189 = vst [vmem:[#allocation100_spill] sm:$0xff] %v5562_v21  ;;  %v5568_v44 = vmul.f32 %v7190_v19, %v5318_v33  ;;  %7193 = vst [vmem:[#allocation104_spill] sm:$0xff] %v5572_v16  ;;  %v5578_v22 = vmul.f32 %v7194_v27, %v5324_v57  ;;  %v7200_v19 = vld [vmem:[#allocation12_spill] sm:$0xff]  ;;  %v7204_v27 = vld [vmem:[#allocation110_spill] sm:$0xff] }
 0x120   :  { %7197 = vst [vmem:[#allocation106_spill] sm:$0xff] %v5582_v15  ;;  %v5588_v33 = vmul.f32 %v7198_v23, %v5330_v39  ;;  %v5592_v5 = vmul.f32 %v5333_v13, %v7200_v19  ;;  %v7202_v4 = vcombine.high %v7200_v19, %v7200_v19  ;;  %v5602_v17 = vmul.f32 %v5339_v32, %v7204_v27  ;;  %v7208_v23 = vld [vmem:[#allocation124_spill] sm:$0xff]  ;;  %v3465_v21 = vld [vmem:[#allocation2 + $0x30] sm:$0xff] }
 0x121   :  { %7191 = vst [vmem:[#allocation102_spill] sm:$0xff] %v5568_v44  ;;  %7195 = vst [vmem:[#allocation105_spill] sm:$0xff] %v5578_v22  ;;  %v7206_v59 = vcombine.high %v7204_v27, %v7204_v27  ;;  %v5612_v13 = vmul.f32 %v5345_v1, %v7208_v23  ;;  %v7210_v19 = vcombine.high %v7208_v23, %v7208_v23  ;;  %v3462_v22 = vld [vmem:[#allocation2 + $0x18] sm:$0xff] }
 0x122   :  { %7199 = vst [vmem:[#allocation107_spill] sm:$0xff] %v5588_v33  ;;  %7201 = vst [vmem:[#allocation108_spill] sm:$0xff] %v5592_v5  ;;  %v5598_v57 = vmul.f32 %v7202_v4, %v5336_v54  ;;  %v7212_v4 = vld [vmem:[#allocation13_spill] sm:$0xff]  ;;  %v7363_v5 = vld [vmem:[#allocation103_spill] sm:$0xff] }
 0x123   :  { %7205 = vst [vmem:[#allocation128_spill] sm:$0xff] %v5602_v17  ;;  %v5608_v39 = vmul.f32 %v7206_v59, %v5342_v18  ;;  %7209 = vst [vmem:[#allocation141_spill] sm:$0xff] %v5612_v13  ;;  %v5618_v54 = vmul.f32 %v7210_v19, %v5348_v7  ;;  %v5622_v32 = vmul.f32 %v5351_v28, %v7212_v4  ;;  %v7216_v59 = vld [vmem:[#allocation119_spill] sm:$0xff]  ;;  %v7355_v13 = vld [vmem:[#allocation92_spill] sm:$0xff] }
 0x124   :  { %7203 = vst [vmem:[#allocation109_spill] sm:$0xff] %v5598_v57  ;;  %v7214_v27 = vcombine.high %v7212_v4, %v7212_v4  ;;  %v5632_v1 = vmul.f32 %v5357_v6, %v7216_v59  ;;  %v7218_v23 = vcombine.high %v7216_v59, %v7216_v59  ;;  %v7220_v19 = vld [vmem:[#allocation111_spill] sm:$0xff]  ;;  %v7359_v17 = vld [vmem:[#allocation96_spill] sm:$0xff] }
 0x125   :  { %7207 = vst [vmem:[#allocation126_spill] sm:$0xff] %v5608_v39  ;;  %7211 = vst [vmem:[#allocation22_spill] sm:$0xff] %v5618_v54  ;;  %v5642_v28 = vmul.f32 %v5363_v53, %v7220_v19  ;;  %v7222_v4 = vcombine.high %v7220_v19, %v7220_v19  ;;  %v5662_v53 = vmul.f32 %v5375_v14, %v4982_v46  ;;  %v7353_v54 = vld [vmem:[#allocation90_spill] sm:$0xff]  ;;  %v7361_v57 = vld [vmem:[#allocation99_spill] sm:$0xff] }
 0x126   :  { %7213 = vst [vmem:[#allocation132_spill] sm:$0xff] %v5622_v32  ;;  %v5628_v18 = vmul.f32 %v7214_v27, %v5354_v56  ;;  %7217 = vst [vmem:[#allocation142_spill] sm:$0xff] %v5632_v1  ;;  %v5638_v7 = vmul.f32 %v7218_v23, %v5360_v8  ;;  %v7224_v27 = vld [vmem:[#allocation125_spill] sm:$0xff]  ;;  %v7229_v23 = vcombine.high %v4982_v46, %v4982_v46  ;;  %v7239_v46 = vld [vmem:[#allocation143_spill] sm:$0xff] }
 0x127   :  { %7221 = vst [vmem:[#allocation14_spill] sm:$0xff] %v5642_v28  ;;  %v5648_v56 = vmul.f32 %v7222_v4, %v5366_v40  ;;  %v5652_v6 = vmul.f32 %v5369_v37, %v7224_v27  ;;  %v7226_v59 = vcombine.high %v7224_v27, %v7224_v27  ;;  %7228 = vst [vmem:[#allocation116_spill] sm:$0xff] %v5662_v53  ;;  %v7234_v4 = vld [vmem:[#allocation135_spill] sm:$0xff]  ;;  %v7343_v28 = vld [vmem:[#allocation80_spill] sm:$0xff] }
 0x128   :  { %7215 = vst [vmem:[#allocation129_spill] sm:$0xff] %v5628_v18  ;;  %7219 = vst [vmem:[#allocation23_spill] sm:$0xff] %v5638_v7  ;;  %v5668_v40 = vmul.f32 %v7229_v23, %v5378_v26  ;;  %v5672_v37 = vmul.f32 %v5381_v3, %v7156_v48  ;;  %v5675_v19 = vmul.f32 %v2483_v41, %v5384_v49  ;;  %v7236_v27 = vld [vmem:[#allocation131_spill] sm:$0xff]  ;;  %v7242_v3 = vld [vmem:[#allocation24_spill] sm:$0xff] }
 0x129   :  { %7223 = vst [vmem:[#allocation120_spill] sm:$0xff] %v5648_v56  ;;  %7225 = vst [vmem:[#allocation121_spill] sm:$0xff] %v5652_v6  ;;  %v5658_v8 = vmul.f32 %v7226_v59, %v5372_v35  ;;  %v5679_v35 = vmul.f32 %v5387_v30, %v7157_v31  ;;  %v5682_v14 = vmul.f32 %v2484_v11, %v7234_v4  ;;  %v7237_v59 = vld [vmem:[#allocation130_spill] sm:$0xff]  ;;  %v7241_v23 = vld [vmem:[#allocation15_spill] sm:$0xff] }
 0x12a   :  { %7230 = vst [vmem:[#allocation117_spill] sm:$0xff] %v5668_v40  ;;  %7231 = vst [vmem:[#allocation118_spill] sm:$0xff] %v5672_v37  ;;  %v5686_v53 = vmul.f32 %v7237_v59, %v7236_v27  ;;  %v5689_v26 = vmul.f32 %v2485_v10, %v7239_v46  ;;  %v5693_v48 = vmul.f32 %v7242_v3, %v7241_v23  ;;  %v7244_v49 = vld [vmem:[#allocation136_spill] sm:$0xff]  ;;  %v7247_v30 = vld [vmem:[#allocation133_spill] sm:$0xff] }
 0x12b   :  { %7227 = vst [vmem:[#allocation21_spill] sm:$0xff] %v5658_v8  ;;  %7232 = vst [vmem:[#allocation8_spill] sm:$0xff] %v5675_v19  ;;  %v5696_v41 = vmul.f32 %v2486_v50, %v7244_v49  ;;  %v7246_v19 = vld [vmem:[#allocation134_spill] sm:$0xff]  ;;  %v7249_v11 = vld [vmem:[#allocation144_spill] sm:$0xff] }
 0x12c   :  { %7233 = vst [vmem:[#allocation122_spill] sm:$0xff] %v5679_v35  ;;  %7235 = vst [vmem:[#allocation9_spill] sm:$0xff] %v5682_v14  ;;  %v5700_v31 = vmul.f32 %v7247_v30, %v7246_v19  ;;  %v5703_v4 = vmul.f32 %v2487_v63, %v7249_v11  ;;  %v7251_v14 = vld [vmem:[#allocation16_spill] sm:$0xff]  ;;  %v7252_v27 = vld [vmem:[#allocation25_spill] sm:$0xff] }
 0x12d   :  { %7238 = vst [vmem:[#allocation10_spill] sm:$0xff] %v5686_v53  ;;  %7240 = vst [vmem:[#allocation11_spill] sm:$0xff] %v5689_v26  ;;  %v5707_v59 = vmul.f32 %v7252_v27, %v7251_v14  ;;  %v7254_v10 = vld [vmem:[#allocation137_spill] sm:$0xff]  ;;  %v7257_v23 = vld [vmem:[#allocation138_spill] sm:$0xff] }
 0x12e   :  { %7243 = vst [vmem:[#allocation123_spill] sm:$0xff] %v5693_v48  ;;  %7245 = vst [vmem:[#allocation12_spill] sm:$0xff] %v5696_v41  ;;  %v5710_v46 = vmul.f32 %v2488_v60, %v7254_v10  ;;  %v7256_v26 = vld [vmem:[#allocation17_spill] sm:$0xff]  ;;  %v7259_v50 = vld [vmem:[#allocation147_spill] sm:$0xff] }
 0x12f   :  { %7248 = vst [vmem:[#allocation110_spill] sm:$0xff] %v5700_v31  ;;  %7250 = vst [vmem:[#allocation124_spill] sm:$0xff] %v5703_v4  ;;  %v5714_v3 = vmul.f32 %v7257_v23, %v7256_v26  ;;  %v5717_v49 = vmul.f32 %v2489_v20, %v7259_v50  ;;  %v7261_v41 = vld [vmem:[#allocation18_spill] sm:$0xff]  ;;  %v7266_v4 = vld [vmem:[#allocation19_spill] sm:$0xff] }
 0x130   :  { %7253 = vst [vmem:[#allocation13_spill] sm:$0xff] %v5707_v59  ;;  %7255 = vst [vmem:[#allocation119_spill] sm:$0xff] %v5710_v46  ;;  %v7262_v19 = vld [vmem:[#allocation26_spill] sm:$0xff]  ;;  %v7267_v14 = vld [vmem:[#allocation145_spill] sm:$0xff] }
 0x131   :  { %7258 = vst [vmem:[#allocation111_spill] sm:$0xff] %v5714_v3  ;;  %7260 = vst [vmem:[#allocation125_spill] sm:$0xff] %v5717_v49  ;;  %v5721_v30 = vmul.f32 %v7262_v19, %v7261_v41  ;;  %v7264_v63 = vld [vmem:[#allocation146_spill] sm:$0xff]  ;;  %v5728_v27 = vmul.f32 %v7267_v14, %v7266_v4  ;;  %v7269_v60 = vld [vmem:[#allocation113_spill] sm:$0xff] }
 0x132   :  { %v5724_v11 = vmul.f32 %v2490_v12, %v7264_v63  ;;  %v5731_v10 = vmul.f32 %v2491_v0, %v7269_v60  ;;  %v7271_v46 = vld [vmem:[#allocation139_spill] sm:$0xff]  ;;  %v7274_v20 = vld [vmem:[#allocation149_spill] sm:$0xff]  ;;  %v7276_v49 = vld [vmem:[#allocation20_spill] sm:$0xff] }
 0x133   :  { %7263 = vst [vmem:[#allocation135_spill] sm:$0xff] %v5721_v30  ;;  %7268 = vst [vmem:[#allocation130_spill] sm:$0xff] %v5728_v27  ;;  %v7272_v26 = vld [vmem:[#allocation27_spill] sm:$0xff]  ;;  %v5738_v50 = vmul.f32 %v2492_v9, %v7274_v20  ;;  %v7277_v41 = vld [vmem:[#allocation148_spill] sm:$0xff] }
 0x134   :  { %7265 = vst [vmem:[#allocation131_spill] sm:$0xff] %v5724_v11  ;;  %7270 = vst [vmem:[#allocation143_spill] sm:$0xff] %v5731_v10  ;;  %v5735_v23 = vmul.f32 %v7272_v26, %v7271_v46  ;;  %v5742_v19 = vmul.f32 %v7277_v41, %v7276_v49  ;;  %v7279_v12 = vld [vmem:[#allocation114_spill] sm:$0xff]  ;;  %v7281_v11 = vld [vmem:[#allocation127_spill] sm:$0xff] }
 0x135   :  { %7275 = vst [vmem:[#allocation24_spill] sm:$0xff] %v5738_v50  ;;  %v5745_v63 = vmul.f32 %v2493_v47, %v7279_v12  ;;  %v7282_v4 = vld [vmem:[#allocation28_spill] sm:$0xff]  ;;  %v7284_v0 = vld [vmem:[#allocation150_spill] sm:$0xff]  ;;  %v7288_v9 = vld [vmem:[#allocation115_spill] sm:$0xff] }
 0x136   :  { %7273 = vst [vmem:[#allocation15_spill] sm:$0xff] %v5735_v23  ;;  %7278 = vst [vmem:[#allocation136_spill] sm:$0xff] %v5742_v19  ;;  %v5749_v14 = vmul.f32 %v7282_v4, %v7281_v11  ;;  %v5752_v60 = vmul.f32 %v2494_v34, %v7284_v0  ;;  %v7286_v46 = vld [vmem:[#allocation112_spill] sm:$0xff]  ;;  %v5759_v20 = vmul.f32 %v2495_v58, %v7288_v9  ;;  %v7291_v49 = vld [vmem:[#allocation29_spill] sm:$0xff] }
 0x137   :  { %7280 = vst [vmem:[#allocation134_spill] sm:$0xff] %v5745_v63  ;;  %v5756_v26 = vmul.f32 %v7286_v46, %v7168_v45  ;;  %v7290_v50 = vld [vmem:[#allocation140_spill] sm:$0xff]  ;;  %v7293_v47 = vld [vmem:[#allocation30_spill] sm:$0xff]  ;;  %v7296_v34 = vld [vmem:[#allocation31_spill] sm:$0xff]  ;;  %v7299_v45 = vcombine.high %v7170_v24, %v7170_v24 }
 0x138   :  { %7283 = vst [vmem:[#allocation133_spill] sm:$0xff] %v5749_v14  ;;  %7285 = vst [vmem:[#allocation144_spill] sm:$0xff] %v5752_v60  ;;  %v5763_v41 = vmul.f32 %v7291_v49, %v7290_v50  ;;  %v7294_v12 = vcombine.high %v7290_v50, %v7290_v50  ;;  %v5773_v4 = vmul.f32 %v7296_v34, %v7170_v24  ;;  %v7298_v0 = vld [vmem:[#allocation32_spill] sm:$0xff]  ;;  %v7301_v46 = vld [vmem:[#allocation38_spill] sm:$0xff] }
 0x139   :  { %7287 = vst [vmem:[#allocation16_spill] sm:$0xff] %v5756_v26  ;;  %7289 = vst [vmem:[#allocation25_spill] sm:$0xff] %v5759_v20  ;;  %v5779_v58 = vmul.f32 %v7299_v45, %v7298_v0  ;;  %v7302_v9 = vld [vmem:[#allocation37_spill] sm:$0xff]  ;;  %v7304_v20 = vld [vmem:[#allocation39_spill] sm:$0xff] }
 0x13a   :  { %7292 = vst [vmem:[#allocation137_spill] sm:$0xff] %v5763_v41  ;;  %v5769_v11 = vmul.f32 %v7294_v12, %v7293_v47  ;;  %7297 = vst [vmem:[#allocation138_spill] sm:$0xff] %v5773_v4  ;;  %v2658_v49 = vcombine.low %v7302_v9, %v7301_v46  ;;  %v7303_v41 = vld [vmem:[#allocation40_spill] sm:$0xff]  ;;  %v7305_v60 = vld [vmem:[#allocation42_spill] sm:$0xff] }
 0x13b   :  { %7300 = vst [vmem:[#allocation147_spill] sm:$0xff] %v5779_v58  ;;  %v2659_v26 = vcombine.low %v7304_v20, %v7303_v41  ;;  %v7306_v50 = vld [vmem:[#allocation41_spill] sm:$0xff]  ;;  %v7307_v12 = vld [vmem:[#allocation44_spill] sm:$0xff]  ;;  %v7309_v34 = vld [vmem:[#allocation46_spill] sm:$0xff] }
 0x13c   :  { %7295 = vst [vmem:[#allocation17_spill] sm:$0xff] %v5769_v11  ;;  %v2660_v47 = vcombine.low %v7306_v50, %v7305_v60  ;;  %v7308_v11 = vld [vmem:[#allocation43_spill] sm:$0xff]  ;;  %v7310_v4 = vld [vmem:[#allocation45_spill] sm:$0xff]  ;;  %v7311_v19 = vld [vmem:[#allocation48_spill] sm:$0xff] }
 0x13d   :  { %v2661_v14 = vcombine.low %v7308_v11, %v7307_v12  ;;  %v2662_v63 = vcombine.low %v7310_v4, %v7309_v34  ;;  %v7312_v23 = vld [vmem:[#allocation47_spill] sm:$0xff]  ;;  %v7313_v0 = vld [vmem:[#allocation50_spill] sm:$0xff]  ;;  %v7314_v45 = vld [vmem:[#allocation49_spill] sm:$0xff] }
 0x13e   :  { %v2663_v24 = vcombine.low %v7312_v23, %v7311_v19  ;;  %v2664_v58 = vcombine.low %v7314_v45, %v7313_v0  ;;  %v7315_v10 = vld [vmem:[#allocation52_spill] sm:$0xff]  ;;  %v7316_v46 = vld [vmem:[#allocation51_spill] sm:$0xff]  ;;  %v7317_v27 = vld [vmem:[#allocation54_spill] sm:$0xff] }
 0x13f   :  { %v2665_v9 = vcombine.low %v7316_v46, %v7315_v10  ;;  %v7318_v20 = vld [vmem:[#allocation53_spill] sm:$0xff]  ;;  %v7319_v30 = vld [vmem:[#allocation56_spill] sm:$0xff]  ;;  %v7320_v60 = vld [vmem:[#allocation55_spill] sm:$0xff] }
 0x140   :  { %v2666_v41 = vcombine.low %v7318_v20, %v7317_v27  ;;  %v2667_v50 = vcombine.low %v7320_v60, %v7319_v30  ;;  %v7321_v3 = vld [vmem:[#allocation58_spill] sm:$0xff]  ;;  %v7322_v11 = vld [vmem:[#allocation57_spill] sm:$0xff]  ;;  %v7323_v59 = vld [vmem:[#allocation60_spill] sm:$0xff] }
 0x141   :  { %v2668_v12 = vcombine.low %v7322_v11, %v7321_v3  ;;  %v7324_v4 = vld [vmem:[#allocation59_spill] sm:$0xff]  ;;  %v7325_v31 = vld [vmem:[#allocation62_spill] sm:$0xff]  ;;  %v7326_v23 = vld [vmem:[#allocation61_spill] sm:$0xff]  ;;  %v2729_v52 = vmul.f32 %v3466_v42, %v2665_v9 }
 0x142   :  { %v2669_v34 = vcombine.low %v7324_v4, %v7323_v59  ;;  %v2670_v19 = vcombine.low %v7326_v23, %v7325_v31  ;;  %v7327_v48 = vld [vmem:[#allocation64_spill] sm:$0xff]  ;;  %v7328_v0 = vld [vmem:[#allocation63_spill] sm:$0xff]  ;;  %v7329_v53 = vld [vmem:[#allocation66_spill] sm:$0xff] }
 0x143   :  { %v2671_v45 = vcombine.low %v7328_v0, %v7327_v48  ;;  %v7330_v10 = vld [vmem:[#allocation65_spill] sm:$0xff]  ;;  %v7331_v35 = vld [vmem:[#allocation68_spill] sm:$0xff]  ;;  %v7332_v27 = vld [vmem:[#allocation67_spill] sm:$0xff] }
 0x144   :  { %v2672_v46 = vcombine.low %v7330_v10, %v7329_v53  ;;  %v2673_v20 = vcombine.low %v7332_v27, %v7331_v35  ;;  %v7333_v37 = vld [vmem:[#allocation70_spill] sm:$0xff]  ;;  %v7334_v30 = vld [vmem:[#allocation69_spill] sm:$0xff]  ;;  %v7335_v40 = vld [vmem:[#allocation72_spill] sm:$0xff] }
 0x145   :  { %v2674_v60 = vcombine.low %v7334_v30, %v7333_v37  ;;  %v7336_v3 = vld [vmem:[#allocation71_spill] sm:$0xff]  ;;  %v7337_v8 = vld [vmem:[#allocation74_spill] sm:$0xff]  ;;  %v7338_v59 = vld [vmem:[#allocation73_spill] sm:$0xff] }
 0x146   :  { %v2675_v11 = vcombine.low %v7336_v3, %v7335_v40  ;;  %v2676_v4 = vcombine.low %v7338_v59, %v7337_v8  ;;  %v7339_v6 = vld [vmem:[#allocation76_spill] sm:$0xff]  ;;  %v7340_v31 = vld [vmem:[#allocation75_spill] sm:$0xff]  ;;  %v7341_v56 = vld [vmem:[#allocation78_spill] sm:$0xff] }
 0x147   :  { %v2677_v23 = vcombine.low %v7340_v31, %v7339_v6  ;;  %v7342_v48 = vld [vmem:[#allocation77_spill] sm:$0xff]  ;;  %v7344_v53 = vld [vmem:[#allocation79_spill] sm:$0xff]  ;;  %v7345_v7 = vld [vmem:[#allocation82_spill] sm:$0xff] }
 0x148   :  { %v2678_v0 = vcombine.low %v7342_v48, %v7341_v56  ;;  %v2679_v10 = vcombine.low %v7344_v53, %v7343_v28  ;;  %v7346_v35 = vld [vmem:[#allocation81_spill] sm:$0xff]  ;;  %v7347_v1 = vld [vmem:[#allocation84_spill] sm:$0xff]  ;;  %v7348_v37 = vld [vmem:[#allocation83_spill] sm:$0xff] }
 0x149   :  { %v2680_v27 = vcombine.low %v7346_v35, %v7345_v7  ;;  %v2681_v30 = vcombine.low %v7348_v37, %v7347_v1  ;;  %v7349_v18 = vld [vmem:[#allocation86_spill] sm:$0xff]  ;;  %v7350_v40 = vld [vmem:[#allocation85_spill] sm:$0xff]  ;;  %v7351_v32 = vld [vmem:[#allocation88_spill] sm:$0xff]  ;;  %v2728_v35 = vmul.f32 %v3465_v21, %v2664_v58 }
 0x14a   :  { %v2682_v3 = vcombine.low %v7350_v40, %v7349_v18  ;;  %v7352_v8 = vld [vmem:[#allocation87_spill] sm:$0xff]  ;;  %v7354_v6 = vld [vmem:[#allocation89_spill] sm:$0xff]  ;;  %v7357_v39 = vld [vmem:[#allocation94_spill] sm:$0xff]  ;;  %v2731_v40 = vmul.f32 %v3468_v25, %v2667_v50 }
 0x14b   :  { %v2683_v59 = vcombine.low %v7352_v8, %v7351_v32  ;;  %v2684_v31 = vcombine.low %v7354_v6, %v7353_v54  ;;  %v7356_v56 = vld [vmem:[#allocation91_spill] sm:$0xff]  ;;  %v7358_v28 = vld [vmem:[#allocation93_spill] sm:$0xff]  ;;  %v3460_v8 = vld [vmem:[#allocation2 + $0x8] sm:$0xff] }
 0x14c   :  { %v2685_v48 = vcombine.low %v7356_v56, %v7355_v13  ;;  %v7360_v7 = vld [vmem:[#allocation95_spill] sm:$0xff]  ;;  %v7362_v1 = vld [vmem:[#allocation97_spill] sm:$0xff]  ;;  %v2723_v15 = vmul.f32 %v3460_v8, %v2659_v26  ;;  %v2725_v13 = vmul.f32 %v3462_v22, %v2661_v14  ;;  %v3464_v53 = vld [vmem:[#allocation2 + $0x28] sm:$0xff] }
 0x14d   :  { %v7364_v18 = vld [vmem:[#allocation101_spill] sm:$0xff]  ;;  %v3459_v33 = vld [vmem:[#allocation2] sm:$0xff]  ;;  %v2727_v44 = vmul.f32 %v3464_v53, %v2663_v24  ;;  %v3476_v58 = vld [vmem:[#allocation2 + $0x88] sm:$0xff] }
 0x14e   :  { %v2722_v32 = vmul.f32 %v3459_v33, %v2658_v49  ;;  %v3461_v54 = vld [vmem:[#allocation2 + $0x10] sm:$0xff]  ;;  %v3463_v56 = vld [vmem:[#allocation2 + $0x20] sm:$0xff]  ;;  %v2732_v33 = vmul.f32 %v3469_v51, %v2668_v12  ;;  %v3470_v49 = vld [vmem:[#allocation2 + $0x58] sm:$0xff]  ;;  %v2739_v42 = vmul.f32 %v3476_v58, %v2675_v11  ;;  %v5847_v58 = vmul.f32 2.4, %v2723_v15 }
 0x14f   :  { %v2724_v6 = vmul.f32 %v3461_v54, %v2660_v47  ;;  %v2726_v16 = vmul.f32 %v3463_v56, %v2662_v63  ;;  %v3467_v37 = vld [vmem:[#allocation2 + $0x40] sm:$0xff]  ;;  %v2733_v26 = vmul.f32 %v3470_v49, %v2669_v34  ;;  %v3472_v54 = vld [vmem:[#allocation2 + $0x68] sm:$0xff]  ;;  %v3473_v14 = vld [vmem:[#allocation2 + $0x70] sm:$0xff]  ;;  %v7368_v15 = vcombine.low %v7364_v18, %v7363_v5 }
 0x150   :  { %v2730_v29 = vmul.f32 %v3467_v37, %v2666_v41  ;;  %v3471_v8 = vld [vmem:[#allocation2 + $0x60] sm:$0xff]  ;;  %v2735_v22 = vmul.f32 %v3472_v54, %v2671_v45  ;;  %v2736_v63 = vmul.f32 %v3473_v14, %v2672_v46  ;;  %v3474_v56 = vld [vmem:[#allocation2 + $0x78] sm:$0xff]  ;;  %v3477_v9 = vld [vmem:[#allocation2 + $0x90] sm:$0xff]  ;;  %v5845_v14 = vmul.f32 2.4, %v2722_v32 }
 0x151   :  { %v2734_v47 = vmul.f32 %v3471_v8, %v2670_v19  ;;  %v2737_v24 = vmul.f32 %v3474_v56, %v2673_v20  ;;  %v3475_v53 = vld [vmem:[#allocation2 + $0x80] sm:$0xff]  ;;  %v2740_v41 = vmul.f32 %v3477_v9, %v2676_v4  ;;  %v3478_v37 = vld [vmem:[#allocation2 + $0x98] sm:$0xff]  ;;  %v3480_v12 = vld [vmem:[#allocation2 + $0xa8] sm:$0xff]  ;;  %v5879_v5 = vmul.f32 2.4, %v2732_v33 }
 0x152   :  { %v2738_v21 = vmul.f32 %v3475_v53, %v2674_v60  ;;  %v2741_v25 = vmul.f32 %v3478_v37, %v2677_v23  ;;  %v3479_v50 = vld [vmem:[#allocation2 + $0xa0] sm:$0xff]  ;;  %v2743_v34 = vmul.f32 %v3480_v12, %v2679_v10  ;;  %v3481_v49 = vld [vmem:[#allocation2 + $0xb0] sm:$0xff]  ;;  %v3482_v8 = vld [vmem:[#allocation2 + $0xb8] sm:$0xff]  ;;  %v5867_v12 = vmul.f32 2.4, %v2727_v44 }
 0x153   :  { %v2742_v51 = vmul.f32 %v3479_v50, %v2678_v0  ;;  %v2744_v19 = vmul.f32 %v3481_v49, %v2680_v27  ;;  %v2745_v45 = vmul.f32 %v3482_v8, %v2681_v30  ;;  %v3483_v54 = vld [vmem:[#allocation2 + $0xc0] sm:$0xff]  ;;  %v3484_v20 = vld [vmem:[#allocation2 + $0xc8] sm:$0xff]  ;;  %v3485_v56 = vld [vmem:[#allocation2 + $0xd0] sm:$0xff]  ;;  %v7365_v0 = vcombine.low %v7358_v28, %v7357_v39 }
 0x154   :  { %v2746_v46 = vmul.f32 %v3483_v54, %v2682_v3  ;;  %v2747_v60 = vmul.f32 %v3484_v20, %v2683_v59  ;;  %v2748_v11 = vmul.f32 %v3485_v56, %v2684_v31  ;;  %v3486_v53 = vld [vmem:[#allocation2 + $0xd8] sm:$0xff]  ;;  %v3487_v23 = vld [vmem:[#allocation2 + $0xe0] sm:$0xff]  ;;  %v3488_v27 = vld [vmem:[#allocation2 + $0xe8] sm:$0xff]  ;;  %v7366_v30 = vcombine.low %v7360_v7, %v7359_v17 }
 0x155   :  { %v2749_v4 = vmul.f32 %v3486_v53, %v2685_v48  ;;  %v2750_v10 = vmul.f32 %v3487_v23, %v7365_v0  ;;  %v3489_v32 = vld [vmem:[#allocation2 + $0xf0] sm:$0xff]  ;;  %v7367_v59 = vcombine.low %v7362_v1, %v7361_v57  ;;  %v5858_v31 = vmul.f32 2.4, %v2724_v6  ;;  %v3490_v48 = vld [vmem:[#allocation2 + $0xf8] sm:$0xff] }
 0x156   :  { %v2751_v3 = vmul.f32 %v3488_v27, %v7366_v30  ;;  %v2753_v37 = vmul.f32 %v3490_v48, %v7368_v15  ;;  %v5863_v50 = vmul.f32 2.4, %v2725_v13  ;;  %v5865_v39 = vmul.f32 2.4, %v2726_v16 }
 0x157   :  { %v2752_v9 = vmul.f32 %v3489_v32, %v7367_v59  ;;  %v6566_v28 = vlaneseq  ;;  %v5869_v17 = vmul.f32 2.4, %v2728_v35  ;;  %v5871_v7 = vmul.f32 2.4, %v2729_v52 }
 0x158   :  { %v2818_v57 = vcombine.high %v5845_v14, %v5845_v14  ;;  %v5875_v1 = vmul.f32 2.4, %v2730_v29  ;;  %v5877_v6 = vmul.f32 2.4, %v2731_v40  ;;  %v2819_v16 = vcombine.high %v5847_v58, %v5847_v58 }
 0x159   :  { %v5883_v18 = vmul.f32 2.4, %v2733_v26  ;;  %v5885_v44 = vmul.f32 2.4, %v2734_v47  ;;  %v5887_v35 = vmul.f32 2.4, %v2735_v22  ;;  %v2820_v52 = vcombine.high %v5858_v31, %v5858_v31 }
 0x15a   :  { %v5891_v13 = vmul.f32 2.4, %v2736_v63  ;;  %v5893_v29 = vmul.f32 2.4, %v2737_v24  ;;  %v5895_v40 = vmul.f32 2.4, %v2738_v21  ;;  %v2821_v33 = vcombine.high %v5863_v50, %v5863_v50 }
 0x15b   :  { %7369 = vst [vmem:[#allocation18_spill] sm:$0xff] %v5885_v44  ;;  %7370 = vst [vmem:[#allocation26_spill] sm:$0xff] %v5887_v35  ;;  %v5899_v49 = vmul.f32 2.4, %v2739_v42  ;;  %v5901_v26 = vmul.f32 2.4, %v2740_v41  ;;  %v2822_v22 = vcombine.high %v5865_v39, %v5865_v39  ;;  %v2823_v21 = vcombine.high %v5867_v12, %v5867_v12 }
 0x15c   :  { %7371 = vst [vmem:[#allocation146_spill] sm:$0xff] %v5891_v13  ;;  %7372 = vst [vmem:[#allocation19_spill] sm:$0xff] %v5895_v40  ;;  %v5903_v47 = vmul.f32 2.4, %v2741_v25  ;;  %v5907_v8 = vmul.f32 2.4, %v2742_v51  ;;  %v2824_v25 = vcombine.high %v5869_v17, %v5869_v17  ;;  %v2828_v53 = vcombine.high %v5879_v5, %v5879_v5 }
 0x15d   :  { %v5909_v63 = vmul.f32 2.4, %v2743_v34  ;;  %v5911_v24 = vmul.f32 2.4, %v2744_v19  ;;  %v5915_v54 = vmul.f32 2.4, %v2745_v45  ;;  %v2825_v19 = vcombine.high %v5871_v7, %v5871_v7 }
 0x15e   :  { %v5917_v42 = vmul.f32 2.4, %v2746_v46  ;;  %v5919_v41 = vmul.f32 2.4, %v2747_v60  ;;  %v5923_v20 = vmul.f32 2.4, %v2748_v11  ;;  %v2826_v60 = vcombine.high %v5875_v1, %v5875_v1 }
 0x15f   :  { %7373 = vst [vmem:[#allocation145_spill] sm:$0xff] %v5911_v24  ;;  %7374 = vst [vmem:[#allocation113_spill] sm:$0xff] %v5915_v54  ;;  %v5925_v51 = vmul.f32 2.4, %v2749_v4  ;;  %v5927_v34 = vmul.f32 2.4, %v2750_v10  ;;  %v2827_v11 = vcombine.high %v5877_v6, %v5877_v6  ;;  %v2829_v4 = vcombine.high %v5883_v18, %v5883_v18 }
 0x160   :  { %7375 = vst [vmem:[#allocation139_spill] sm:$0xff] %v5917_v42  ;;  %7376 = vst [vmem:[#allocation27_spill] sm:$0xff] %v5919_v41  ;;  %v5931_v56 = vmul.f32 2.4, %v2751_v3  ;;  %v5933_v45 = vmul.f32 2.4, %v2752_v9  ;;  %v2830_v23 = vcombine.high %v5885_v44, %v5885_v44  ;;  %v2831_v0 = vcombine.high %v5887_v35, %v5887_v35 }
 0x161   :  { %7377 = vst [vmem:[#allocation149_spill] sm:$0xff] %v5923_v20  ;;  %7378 = vst [vmem:[#allocation20_spill] sm:$0xff] %v5925_v51  ;;  %v5935_v46 = vmul.f32 2.4, %v2753_v37  ;;  %v5962_v9 = vshrl.u32 %v6566_v28, 7  ;;  %v2882_v59 = vsub.f32 %v5502_v38, %v5845_v14  ;;  %v2883_v30 = vsub.f32 %v5508_v43, %v2818_v57  ;;  %v7383_v10 = vld [vmem:[#allocation33_spill] sm:$0xff] }
 0x162   :  { %7379 = vst [vmem:[#allocation148_spill] sm:$0xff] %v5927_v34  ;;  %7380 = vst [vmem:[#allocation114_spill] sm:$0xff] %v5931_v56  ;;  %v2884_v48 = vsub.f32 %v5512_v55, %v5847_v58  ;;  %v2885_v15 = vsub.f32 %v5518_v62, %v2819_v16  ;;  %v2886_v37 = vsub.f32 %v5522_v2, %v5858_v31  ;;  %v7384_v38 = vld [vmem:[#allocation34_spill] sm:$0xff]  ;;  %v7385_v14 = vld [vmem:[#allocation35_spill] sm:$0xff] }
 0x163   :  { %7381 = vst [vmem:[#allocation127_spill] sm:$0xff] %v5933_v45  ;;  %7382 = vst [vmem:[#allocation28_spill] sm:$0xff] %v5935_v46  ;;  %v2948_v27 = vadd.s32 8, %v5962_v9  ;;  %v2887_v3 = vsub.f32 %v5528_v61, %v2820_v52  ;;  %v2888_v32 = vsub.f32 %v5532_v36, %v5863_v50  ;;  %v2889_v28 = vsub.f32 %v7383_v10, %v2821_v33  ;;  %v7386_v58 = vld [vmem:[#allocation36_spill] sm:$0xff]  ;;  %v7387_v16 = vld [vmem:[#allocation98_spill] sm:$0xff] }
 0x164   :  { %v2890_v43 = vsub.f32 %v7384_v38, %v5865_v39  ;;  %v2891_v57 = vsub.f32 %v7385_v14, %v2822_v22  ;;  %v2949_v55 = vadd.s32 16, %v5962_v9  ;;  %v6008_v46 = vsub.f32 %v7387_v16, %v2823_v21  ;;  %v7388_v2 = vld [vmem:[#allocation100_spill] sm:$0xff]  ;;  %v7389_v31 = vld [vmem:[#allocation102_spill] sm:$0xff]  ;;  %v7392_v14 = vld [vmem:[#allocation105_spill] sm:$0xff] }
 0x165   :  { %v6013_v36 = vsub.f32 %v7389_v31, %v2824_v25  ;;  %v2950_v50 = vadd.s32 24, %v5962_v9  ;;  %v7390_v52 = vlaneseq  ;;  %v3015_v33 = vmul.u32 128, %v5962_v9  ;;  %v7391_v10 = vld [vmem:[#allocation104_spill] sm:$0xff]  ;;  %v7393_v16 = vld [vmem:[#allocation106_spill] sm:$0xff]  ;;  %v7394_v62 = vld [vmem:[#allocation107_spill] sm:$0xff] }
 0x166   :  { %v3016_v22 = vmul.u32 128, %v2948_v27  ;;  %v6023_v21 = vsub.f32 %v7392_v14, %v2825_v19  ;;  %v6028_v25 = vsub.f32 %v7394_v62, %v2826_v60  ;;  %v7395_v31 = vld [vmem:[#allocation108_spill] sm:$0xff]  ;;  %v2951_v27 = vadd.s32 32, %v5962_v9  ;;  %v7398_v19 = vld [vmem:[#allocation126_spill] sm:$0xff]  ;;  %v7399_v61 = vld [vmem:[#allocation141_spill] sm:$0xff] }
 0x167   :  { %v6017_v39 = vand.u32 127, %v7390_v52  ;;  %v7396_v52 = vld [vmem:[#allocation109_spill] sm:$0xff]  ;;  %v3017_v34 = vmul.u32 128, %v2949_v55  ;;  %v7397_v38 = vld [vmem:[#allocation128_spill] sm:$0xff]  ;;  %v6039_v14 = vsub.f32 %v7398_v19, %v2828_v53  ;;  %v7400_v60 = vld [vmem:[#allocation22_spill] sm:$0xff]  ;;  %v2952_v45 = vadd.s32 40, %v5962_v9 }
 0x168   :  { %v6033_v56 = vsub.f32 %v7396_v52, %v2827_v11  ;;  %v6044_v62 = vsub.f32 %v7400_v60, %v2829_v4  ;;  %v3018_v41 = vmul.u32 128, %v2950_v50  ;;  %v7401_v55 = vld [vmem:[#allocation132_spill] sm:$0xff]  ;;  %v7402_v51 = vld [vmem:[#allocation129_spill] sm:$0xff]  ;;  %v7403_v53 = vld [vmem:[#allocation142_spill] sm:$0xff]  ;;  %v2953_v50 = vadd.s32 48, %v5962_v9 }
 0x169   :  { %v3047_v11 = vadd.s32 %v3015_v33, %v6017_v39  ;;  %v3048_v52 = vadd.s32 %v3016_v22, %v6017_v39  ;;  %v6052_v54 = vsub.f32 %v7402_v51, %v2830_v23  ;;  %v7404_v20 = vld [vmem:[#allocation23_spill] sm:$0xff]  ;;  %v3019_v33 = vmul.u32 128, %v2951_v27  ;;  %v7407_v44 = vld [vmem:[#allocation120_spill] sm:$0xff]  ;;  %v7409_v60 = vld [vmem:[#allocation121_spill] sm:$0xff] }
 0x16a   :  { %v6057_v24 = vsub.f32 %v7404_v20, %v2831_v0  ;;  %v3049_v22 = vadd.s32 %v3017_v34, %v6017_v39  ;;  %v7406_v42 = vcombine.high %v5891_v13, %v5891_v13  ;;  %v2954_v23 = vadd.s32 56, %v5962_v9  ;;  %v7411_v4 = vld [vmem:[#allocation21_spill] sm:$0xff] }
 0x16b   :  { %v3175_v19 = vcombine.low %v2882_v59, %v2883_v30  ;;  %v3176_v35 = vcombine.low %v2884_v48, %v2885_v15  ;;  %v3020_v20 = vmul.u32 128, %v2952_v45  ;;  %v3050_v0 = vadd.s32 %v3018_v41, %v6017_v39  ;;  %v7414_v48 = vld [vmem:[#allocation117_spill] sm:$0xff] }
 0x16c   :  { %v6067_v51 = vsub.f32 %v7407_v44, %v7406_v42  ;;  %vm3079_vm3 = vcmp.lt.s32.totalorder %v3047_v11, 8  ;;  %vm3080_vm15 = vcmp.lt.s32.totalorder %v3048_v52, 8  ;;  %v7410_v34 = vcombine.high %v5893_v29, %v5893_v29  ;;  %v7412_v44 = vld [vmem:[#allocation116_spill] sm:$0xff] }
 0x16d   :  { %v2955_v30 = vadd.s32 64, %v5962_v9  ;;  %v3021_v45 = vmul.u32 128, %v2953_v50  ;;  %v3051_v41 = vadd.s32 %v3019_v33, %v6017_v39  ;;  %vm3081_vm8 = vcmp.lt.s32.totalorder %v3049_v22, 8 }
 0x16e   :  { %7408 = vst [vmem:[#allocation150_spill] sm:$0xff] %v6067_v51  ;;  %v6077_v13 = vsub.f32 %v7411_v4, %v7410_v34  ;;  %v3177_v51 = vcombine.low %v2886_v37, %v2887_v3  ;;  %v7413_v59 = vcombine.high %v5895_v40, %v5895_v40  ;;  %v3178_v11 = vcombine.low %v2888_v32, %v2889_v28  ;;  %v7415_v37 = vld [vmem:[#allocation118_spill] sm:$0xff]  ;;  %v7417_v32 = vld [vmem:[#allocation8_spill] sm:$0xff] }
 0x16f   :  { %v3239_v52 = vsel %vm3079_vm3, %v3175_v19, 0.0  ;;  %v3240_v4 = vsel %vm3080_vm15, %v3176_v35, 0.0  ;;  %v2956_v34 = vadd.s32 72, %v5962_v9  ;;  %v3022_v27 = vmul.u32 128, %v2954_v23 }
 0x170   :  { %v6087_v15 = vsub.f32 %v7414_v48, %v7413_v59  ;;  %v3052_v3 = vadd.s32 %v3020_v20, %v6017_v39  ;;  %vm3082_vm11 = vcmp.lt.s32.totalorder %v3050_v0, 8  ;;  %v2916_v50 = vsub.f32 %v7415_v37, %v5899_v49 }
 0x171   :  { %v2957_v33 = vadd.s32 80, %v5962_v9  ;;  %v3179_v22 = vcombine.low %v2890_v43, %v2891_v57  ;;  %v3241_v42 = vsel %vm3081_vm8, %v3177_v51, 0.0  ;;  %v3023_v40 = vmul.u32 128, %v2955_v30 }
 0x172   :  { %v3053_v59 = vadd.s32 %v3021_v45, %v6017_v39  ;;  %vm3083_vm0 = vcmp.lt.s32.totalorder %v3051_v41, 8  ;;  %v3271_v28 = vadd.f32 %v3240_v4, %v3239_v52  ;;  %v7416_v35 = vcombine.high %v5899_v49, %v5899_v49  ;;  %v7419_v45 = vld [vmem:[#allocation122_spill] sm:$0xff] }
 0x173   :  { %v2958_v23 = vadd.s32 88, %v5962_v9  ;;  %v7418_v20 = vsub.f32 %v7386_v58, %v5867_v12  ;;  %v3242_v43 = vsel %vm3082_vm11, %v3178_v11, 0.0  ;;  %v3024_v57 = vmul.u32 128, %v2956_v34 }
 0x174   :  { %v6099_v19 = vsub.f32 %v7417_v32, %v7416_v35  ;;  %v3054_v51 = vadd.s32 %v3022_v27, %v6017_v39  ;;  %vm3084_vm2 = vcmp.lt.s32.totalorder %v3052_v3, 8  ;;  %v3272_v30 = vadd.f32 %v3271_v28, %v3241_v42  ;;  %v7422_v27 = vld [vmem:[#allocation9_spill] sm:$0xff] }
 0x175   :  { %v3180_v0 = vcombine.low %v7418_v20, %v6008_v46  ;;  %v2918_v41 = vsub.f32 %v7419_v45, %v5901_v26  ;;  %v2959_v48 = vadd.s32 96, %v5962_v9  ;;  %v7420_v52 = vsub.f32 %v7388_v2, %v5869_v17 }
 0x176   :  { %v3243_v35 = vsel %vm3083_vm0, %v3179_v22, 0.0  ;;  %v3025_v32 = vmul.u32 128, %v2957_v33  ;;  %v3055_v12 = vadd.s32 %v3023_v40, %v6017_v39  ;;  %vm3085_vm1 = vcmp.lt.s32.totalorder %v3053_v59, 8  ;;  %v7424_v33 = vld [vmem:[#allocation10_spill] sm:$0xff] }
 0x177   :  { %v3181_v4 = vcombine.low %v7420_v52, %v6013_v36  ;;  %v3273_v46 = vadd.f32 %v3272_v30, %v3242_v43  ;;  %v7421_v58 = vcombine.high %v5901_v26, %v5901_v26  ;;  %v2960_v11 = vadd.s32 104, %v5962_v9 }
 0x178   :  { %v7423_v34 = vsub.f32 %v7391_v10, %v5871_v7  ;;  %v3244_v2 = vsel %vm3084_vm2, %v3180_v0, 0.0  ;;  %v3026_v36 = vmul.u32 128, %v2958_v23  ;;  %v3056_v3 = vadd.s32 %v3024_v57, %v6017_v39  ;;  %v7427_v23 = vld [vmem:[#allocation11_spill] sm:$0xff] }
 0x179   :  { %v6119_v42 = vsub.f32 %v7422_v27, %v7421_v58  ;;  %vm3086_vm4 = vcmp.lt.s32.totalorder %v3054_v51, 8  ;;  %v3274_v40 = vadd.f32 %v3273_v46, %v3243_v35  ;;  %v2920_v22 = vsub.f32 %v7424_v33, %v5903_v47 }
 0x17a   :  { %v3182_v17 = vcombine.low %v7423_v34, %v6023_v21  ;;  %v2961_v59 = vadd.s32 112, %v5962_v9  ;;  %v7425_v28 = vsub.f32 %v7393_v16, %v5875_v1  ;;  %v3245_v43 = vsel %vm3085_vm1, %v3181_v4, 0.0  ;;  %v7429_v4 = vld [vmem:[#allocation123_spill] sm:$0xff] }
 0x17b   :  { %v3027_v30 = vmul.u32 128, %v2959_v48  ;;  %v3057_v7 = vadd.s32 %v3025_v32, %v6017_v39  ;;  %vm3087_vm5 = vcmp.lt.s32.totalorder %v3055_v12, 8  ;;  %v3275_v10 = vadd.f32 %v3274_v40, %v3244_v2  ;;  %v7434_v40 = vld [vmem:[#allocation110_spill] sm:$0xff] }
 0x17c   :  { %v3183_v20 = vcombine.low %v7425_v28, %v6028_v25  ;;  %v7426_v21 = vcombine.high %v5903_v47, %v5903_v47  ;;  %v2962_v57 = vadd.s32 120, %v5962_v9  ;;  %v7428_v51 = vsub.f32 %v7395_v31, %v5877_v6 }
 0x17d   :  { %v3246_v16 = vsel %vm3086_vm4, %v3182_v17, 0.0  ;;  %v3028_v25 = vmul.u32 128, %v2960_v11  ;;  %v3058_v48 = vadd.s32 %v3026_v36, %v6017_v39  ;;  %vm3088_vm6 = vcmp.lt.s32.totalorder %v3056_v3, 8  ;;  %v7432_v11 = vld [vmem:[#allocation12_spill] sm:$0xff] }
 0x17e   :  { %v6139_v0 = vsub.f32 %v7427_v23, %v7426_v21  ;;  %v3184_v1 = vcombine.low %v7428_v51, %v6033_v56  ;;  %v3276_v52 = vadd.f32 %v3275_v10, %v3245_v43  ;;  %v2922_v35 = vsub.f32 %v7429_v4, %v5907_v8  ;;  %v7438_v21 = vld [vmem:[#allocation124_spill] sm:$0xff]  ;;  %v7439_v51 = vld [vmem:[#allocation26_spill] sm:$0xff] }
 0x17f   :  { %v2963_v32 = vadd.s32 128, %v5962_v9  ;;  %v7430_v12 = vsub.f32 %v7397_v38, %v5879_v5  ;;  %v3247_v58 = vsel %vm3087_vm5, %v3183_v20, 0.0  ;;  %v3029_v27 = vmul.u32 128, %v2961_v59  ;;  %v7435_v20 = vld [vmem:[#allocation18_spill] sm:$0xff] }
 0x180   :  { %v3059_v6 = vadd.s32 %v3027_v30, %v6017_v39  ;;  %vm3089_vm7 = vcmp.lt.s32.totalorder %v3057_v7, 8  ;;  %v3277_v56 = vadd.f32 %v3276_v52, %v3246_v16  ;;  %v7431_v31 = vcombine.high %v5907_v8, %v5907_v8  ;;  %v7441_v52 = vld [vmem:[#allocation145_spill] sm:$0xff] }
 0x181   :  { %v3185_v46 = vcombine.low %v7430_v12, %v6039_v14  ;;  %v2964_v17 = vadd.s32 136, %v5962_v9  ;;  %v7433_v2 = vsub.f32 %v7399_v61, %v5883_v18  ;;  %v3248_v38 = vsel %vm3088_vm6, %v3184_v1, 0.0 }
 0x182   :  { %v6159_v34 = vsub.f32 %v7432_v11, %v7431_v31  ;;  %v3030_v14 = vmul.u32 128, %v2962_v57  ;;  %v3060_v36 = vadd.s32 %v3028_v25, %v6017_v39  ;;  %vm3090_vm9 = vcmp.lt.s32.totalorder %v3058_v48, 8 }
 0x183   :  { %v3186_v5 = vcombine.low %v7433_v2, %v6044_v62  ;;  %v3278_v3 = vadd.f32 %v3277_v56, %v3247_v58  ;;  %v2924_v59 = vsub.f32 %v7434_v40, %v5909_v63  ;;  %v2965_v28 = vadd.s32 144, %v5962_v9  ;;  %v7443_v58 = vld [vmem:[#allocation150_spill] sm:$0xff] }
 0x184   :  { %v7436_v43 = vsub.f32 %v7401_v55, %v7435_v20  ;;  %v3249_v7 = vsel %vm3089_vm7, %v3185_v46, 0.0  ;;  %v3031_v10 = vmul.u32 128, %v2963_v32  ;;  %v3061_v18 = vadd.s32 %v3029_v27, %v6017_v39  ;;  %v7442_v32 = vld [vmem:[#allocation13_spill] sm:$0xff]  ;;  %v7444_v27 = vld [vmem:[#allocation14_spill] sm:$0xff] }
 0x185   :  { %vm3091_vm10 = vcmp.lt.s32.totalorder %v3059_v6, 8  ;;  %v3279_v61 = vadd.f32 %v3278_v3, %v3248_v38  ;;  %v7437_v62 = vcombine.high %v5909_v63, %v5909_v63  ;;  %v2966_v57 = vadd.s32 152, %v5962_v9  ;;  %v7445_v6 = vld [vmem:[#allocation146_spill] sm:$0xff] }
 0x186   :  { %v3187_v30 = vcombine.low %v7436_v43, %v6052_v54  ;;  %v7440_v1 = vsub.f32 %v7403_v53, %v7439_v51  ;;  %v3250_v54 = vsel %vm3090_vm9, %v3186_v5, 0.0  ;;  %v3032_v16 = vmul.u32 128, %v2964_v17  ;;  %v7448_v5 = vld [vmem:[#allocation119_spill] sm:$0xff] }
 0x187   :  { %v6179_v23 = vsub.f32 %v7438_v21, %v7437_v62  ;;  %v3062_v25 = vadd.s32 %v3030_v14, %v6017_v39  ;;  %vm3092_vm12 = vcmp.lt.s32.totalorder %v3060_v36, 8  ;;  %v3280_v48 = vadd.f32 %v3279_v61, %v3249_v7  ;;  %v7450_v7 = vld [vmem:[#allocation113_spill] sm:$0xff]  ;;  %v7452_v62 = vld [vmem:[#allocation19_spill] sm:$0xff] }
 0x188   :  { %v3188_v55 = vcombine.low %v7440_v1, %v6057_v24  ;;  %v2926_v12 = vsub.f32 %v7442_v32, %v7441_v52  ;;  %v2967_v46 = vadd.s32 160, %v5962_v9  ;;  %v7446_v56 = vsub.f32 %v7444_v27, %v7445_v6  ;;  %v7457_v27 = vld [vmem:[#allocation135_spill] sm:$0xff]  ;;  %v7468_v32 = vld [vmem:[#allocation20_spill] sm:$0xff] }
 0x189   :  { %v3251_v11 = vsel %vm3091_vm10, %v3187_v30, 0.0  ;;  %v3033_v2 = vmul.u32 128, %v2965_v28  ;;  %v3063_v24 = vadd.s32 %v3031_v10, %v6017_v39  ;;  %vm3093_vm13 = vcmp.lt.s32.totalorder %v3061_v18, 8  ;;  %v7451_v10 = vld [vmem:[#allocation111_spill] sm:$0xff] }
 0x18a   :  { %v3189_v31 = vcombine.low %v7446_v56, %v7443_v58  ;;  %v3281_v53 = vadd.f32 %v3280_v48, %v3250_v54  ;;  %v7447_v17 = vcombine.high %v7441_v52, %v7441_v52  ;;  %v2968_v14 = vadd.s32 168, %v5962_v9  ;;  %v7456_v58 = vld [vmem:[#allocation139_spill] sm:$0xff] }
 0x18b   :  { %v7449_v36 = vsub.f32 %v7409_v60, %v5893_v29  ;;  %v3252_v20 = vsel %vm3092_vm12, %v3188_v55, 0.0  ;;  %v3034_v43 = vmul.u32 128, %v2966_v57  ;;  %v3064_v28 = vadd.s32 %v3032_v16, %v6017_v39  ;;  %v7455_v57 = vld [vmem:[#allocation125_spill] sm:$0xff] }
 0x18c   :  { %v2927_v38 = vsub.f32 %v7448_v5, %v7447_v17  ;;  %vm3094_vm14 = vcmp.lt.s32.totalorder %v3062_v25, 8  ;;  %v3282_v30 = vadd.f32 %v3281_v53, %v3251_v11  ;;  %v2928_v18 = vsub.f32 %v7451_v10, %v7450_v7  ;;  %v7460_v5 = vld [vmem:[#allocation27_spill] sm:$0xff] }
 0x18d   :  { %v3190_v3 = vcombine.low %v7449_v36, %v6077_v13  ;;  %v2969_v61 = vadd.s32 176, %v5962_v9  ;;  %v7453_v21 = vsub.f32 %v7412_v44, %v7452_v62  ;;  %v3253_v1 = vsel %vm3093_vm13, %v3189_v31, 0.0  ;;  %v7465_v62 = vld [vmem:[#allocation15_spill] sm:$0xff] }
 0x18e   :  { %v3035_v54 = vmul.u32 128, %v2967_v46  ;;  %v3065_v13 = vadd.s32 %v3033_v2, %v6017_v39  ;;  %vm3095_vm3 = vcmp.lt.s32.totalorder %v3063_v24, 8  ;;  %v3283_v29 = vadd.f32 %v3282_v30, %v3252_v20 }
 0x18f   :  { %v3191_v51 = vcombine.low %v7453_v21, %v6087_v15  ;;  %v7454_v60 = vcombine.high %v7450_v7, %v7450_v7  ;;  %v2970_v16 = vadd.s32 184, %v5962_v9  ;;  %v3192_v25 = vcombine.low %v2916_v50, %v6099_v19  ;;  %v7459_v19 = vld [vmem:[#allocation131_spill] sm:$0xff] }
 0x190   :  { %v3254_v44 = vsel %vm3094_vm14, %v3190_v3, 0.0  ;;  %v3036_v15 = vmul.u32 128, %v2968_v14  ;;  %v3066_v48 = vadd.s32 %v3034_v43, %v6017_v39  ;;  %vm3096_vm15 = vcmp.lt.s32.totalorder %v3064_v28, 8  ;;  %v7461_v14 = vld [vmem:[#allocation130_spill] sm:$0xff] }
 0x191   :  { %v2929_v55 = vsub.f32 %v7455_v57, %v7454_v60  ;;  %v3284_v46 = vadd.f32 %v3283_v29, %v3253_v1  ;;  %v2930_v6 = vsub.f32 %v7457_v27, %v7456_v58  ;;  %v2971_v56 = vadd.s32 192, %v5962_v9 }
 0x192   :  { %v3193_v31 = vcombine.low %v2918_v41, %v6119_v42  ;;  %v3255_v11 = vsel %vm3095_vm3, %v3191_v51, 0.0  ;;  %v3037_v2 = vmul.u32 128, %v2969_v61  ;;  %v3067_v49 = vadd.s32 %v3035_v54, %v6017_v39  ;;  %v7464_v61 = vld [vmem:[#allocation149_spill] sm:$0xff] }
 0x193   :  { %vm3097_vm8 = vcmp.lt.s32.totalorder %v3065_v13, 8  ;;  %v3285_v37 = vadd.f32 %v3284_v46, %v3254_v44  ;;  %v7458_v50 = vcombine.high %v7456_v58, %v7456_v58  ;;  %v2972_v53 = vadd.s32 200, %v5962_v9 }
 0x194   :  { %v3194_v17 = vcombine.low %v2920_v22, %v6139_v0  ;;  %v3256_v26 = vsel %vm3096_vm15, %v3192_v25, 0.0  ;;  %v3038_v45 = vmul.u32 128, %v2970_v16  ;;  %v3068_v41 = vadd.s32 %v3036_v15, %v6017_v39  ;;  %v7463_v0 = vld [vmem:[#allocation143_spill] sm:$0xff] }
 0x195   :  { %v2931_v24 = vsub.f32 %v7459_v19, %v7458_v50  ;;  %vm3098_vm11 = vcmp.lt.s32.totalorder %v3066_v48, 8  ;;  %v3286_v42 = vadd.f32 %v3285_v37, %v3255_v11  ;;  %v2932_v36 = vsub.f32 %v7461_v14, %v7460_v5  ;;  %v7472_v19 = vld [vmem:[#allocation148_spill] sm:$0xff] }
 0x196   :  { %v2973_v3 = vadd.s32 208, %v5962_v9  ;;  %v3195_v20 = vcombine.low %v2922_v35, %v6159_v34  ;;  %v3257_v43 = vsel %vm3097_vm8, %v3193_v31, 0.0  ;;  %v3039_v28 = vmul.u32 128, %v2971_v56 }
 0x197   :  { %v3069_v47 = vadd.s32 %v3037_v2, %v6017_v39  ;;  %vm3099_vm0 = vcmp.lt.s32.totalorder %v3067_v49, 8  ;;  %v3287_v33 = vadd.f32 %v3286_v42, %v3256_v26  ;;  %v7462_v22 = vcombine.high %v7460_v5, %v7460_v5  ;;  %v7475_v26 = vld [vmem:[#allocation144_spill] sm:$0xff] }
 0x198   :  { %v2974_v7 = vadd.s32 216, %v5962_v9  ;;  %v3196_v10 = vcombine.low %v2924_v59, %v6179_v23  ;;  %v3258_v8 = vsel %vm3098_vm11, %v3194_v17, 0.0  ;;  %v3040_v4 = vmul.u32 128, %v2972_v53  ;;  %v7467_v23 = vld [vmem:[#allocation24_spill] sm:$0xff] }
 0x199   :  { %v2933_v30 = vsub.f32 %v7463_v0, %v7462_v22  ;;  %v3070_v35 = vadd.s32 %v3038_v45, %v6017_v39  ;;  %vm3100_vm2 = vcmp.lt.s32.totalorder %v3068_v41, 8  ;;  %v3288_v34 = vadd.f32 %v3287_v33, %v3257_v43 }
 0x19a   :  { %v2934_v21 = vsub.f32 %v7465_v62, %v7464_v61  ;;  %v2975_v51 = vadd.s32 224, %v5962_v9  ;;  %v3197_v1 = vcombine.low %v2926_v12, %v2927_v38  ;;  %v3259_v54 = vsel %vm3099_vm0, %v3195_v20, 0.0  ;;  %v7469_v12 = vld [vmem:[#allocation136_spill] sm:$0xff] }
 0x19b   :  { %v3041_v13 = vmul.u32 128, %v2973_v3  ;;  %v3071_v63 = vadd.s32 %v3039_v28, %v6017_v39  ;;  %vm3101_vm1 = vcmp.lt.s32.totalorder %v3069_v47, 8  ;;  %v3289_v40 = vadd.f32 %v3288_v34, %v3258_v8  ;;  %v7477_v3 = vld [vmem:[#allocation16_spill] sm:$0xff]  ;;  %v7479_v28 = vld [vmem:[#allocation25_spill] sm:$0xff] }
 0x19c   :  { %v7466_v59 = vcombine.high %v7464_v61, %v7464_v61  ;;  %v2976_v60 = vadd.s32 232, %v5962_v9  ;;  %v3198_v57 = vcombine.low %v2928_v18, %v2929_v55  ;;  %v3260_v16 = vsel %vm3100_vm2, %v3196_v10, 0.0  ;;  %v7471_v55 = vld [vmem:[#allocation134_spill] sm:$0xff]  ;;  %v7480_v10 = vld [vmem:[#allocation127_spill] sm:$0xff]  ;;  %v7481_v8 = vld [vmem:[#allocation137_spill] sm:$0xff] }
 0x19d   :  { %v3042_v25 = vmul.u32 128, %v2974_v7  ;;  %v3072_v44 = vadd.s32 %v3040_v4, %v6017_v39  ;;  %vm3102_vm4 = vcmp.lt.s32.totalorder %v3070_v35, 8  ;;  %v3290_v52 = vadd.f32 %v3289_v40, %v3259_v54  ;;  %v7483_v34 = vld [vmem:[#allocation17_spill] sm:$0xff]  ;;  %v7484_v54 = vld [vmem:[#allocation28_spill] sm:$0xff] }
 0x19e   :  { %v2935_v29 = vsub.f32 %v7467_v23, %v7466_v59  ;;  %v2936_v38 = vsub.f32 %v7469_v12, %v7468_v32  ;;  %v2977_v15 = vadd.s32 240, %v5962_v9  ;;  %v3199_v48 = vcombine.low %v2930_v6, %v2931_v24  ;;  %v7473_v24 = vld [vmem:[#allocation133_spill] sm:$0xff]  ;;  %v7487_v59 = vld [vmem:[#allocation147_spill] sm:$0xff] }
 0x19f   :  { %v3261_v46 = vsel %vm3101_vm1, %v3197_v1, 0.0  ;;  %v3043_v58 = vmul.u32 128, %v2975_v51  ;;  %v3073_v27 = vadd.s32 %v3041_v13, %v6017_v39  ;;  %vm3103_vm5 = vcmp.lt.s32.totalorder %v3071_v63, 8  ;;  %v7485_v13 = vld [vmem:[#allocation138_spill] sm:$0xff] }
 0x1a0   :  { %v3291_v56 = vadd.f32 %v3290_v52, %v3260_v16  ;;  %v7470_v18 = vcombine.high %v7468_v32, %v7468_v32  ;;  %v2978_v11 = vadd.s32 248, %v5962_v9  ;;  %v3200_v2 = vcombine.low %v2932_v36, %v2933_v30  ;;  %v7476_v36 = vld [vmem:[#allocation114_spill] sm:$0xff] }
 0x1a1   :  { %v3262_v49 = vsel %vm3102_vm4, %v3198_v57, 0.0  ;;  %v3044_v37 = vmul.u32 128, %v2976_v60  ;;  %v3074_v50 = vadd.s32 %v3042_v25, %v6017_v39  ;;  %vm3104_vm6 = vcmp.lt.s32.totalorder %v3072_v44, 8 }
 0x1a2   :  { %v2937_v31 = vsub.f32 %v7471_v55, %v7470_v18  ;;  %v3292_v6 = vadd.f32 %v3291_v56, %v3261_v46  ;;  %v2938_v53 = vsub.f32 %v7473_v24, %v7472_v19  ;;  %v7474_v17 = vcombine.high %v7472_v19, %v7472_v19 }
 0x1a3   :  { %v3201_v41 = vcombine.low %v2934_v21, %v2935_v29  ;;  %v3263_v42 = vsel %vm3103_vm5, %v3199_v48, 0.0  ;;  %v3045_v5 = vmul.u32 128, %v2977_v15  ;;  %v3075_v9 = vadd.s32 %v3043_v58, %v6017_v39 }
 0x1a4   :  { %v2939_v45 = vsub.f32 %v7475_v26, %v7474_v17  ;;  %vm3105_vm7 = vcmp.lt.s32.totalorder %v3073_v27, 8  ;;  %v3293_v14 = vadd.f32 %v3292_v6, %v3262_v49  ;;  %v2940_v20 = vsub.f32 %v7477_v3, %v7476_v36 }
 0x1a5   :  { %v7478_v43 = vcombine.high %v7476_v36, %v7476_v36  ;;  %v3202_v33 = vcombine.low %v2936_v38, %v2937_v31  ;;  %v3264_v22 = vsel %vm3104_vm6, %v3200_v2, 0.0  ;;  %v3046_v0 = vmul.u32 128, %v2978_v11 }
 0x1a6   :  { %v3076_v30 = vadd.s32 %v3044_v37, %v6017_v39  ;;  %vm3106_vm9 = vcmp.lt.s32.totalorder %v3074_v50, 8  ;;  %v3294_v7 = vadd.f32 %v3293_v14, %v3263_v42  ;;  %v2942_v4 = vsub.f32 %v7481_v8, %v7480_v10 }
 0x1a7   :  { %v2941_v47 = vsub.f32 %v7479_v28, %v7478_v43  ;;  %v7482_v35 = vcombine.high %v7480_v10, %v7480_v10  ;;  %v3203_v62 = vcombine.low %v2938_v53, %v2939_v45  ;;  %v3265_v21 = vsel %vm3105_vm7, %v3201_v41, 0.0 }
 0x1a8   :  { %v3077_v51 = vadd.s32 %v3045_v5, %v6017_v39  ;;  %vm3107_vm10 = vcmp.lt.s32.totalorder %v3075_v9, 8  ;;  %v3295_v1 = vadd.f32 %v3294_v7, %v3264_v22  ;;  %v2944_v63 = vsub.f32 %v7485_v13, %v7484_v54 }
 0x1a9   :  { %v2943_v61 = vsub.f32 %v7483_v34, %v7482_v35  ;;  %v7486_v40 = vcombine.high %v7484_v54, %v7484_v54  ;;  %v3204_v29 = vcombine.low %v2940_v20, %v2941_v47  ;;  %v3266_v60 = vsel %vm3106_vm9, %v3202_v33, 0.0 }
 0x1aa   :  { %v3078_v57 = vadd.s32 %v3046_v0, %v6017_v39  ;;  %vm3108_vm12 = vcmp.lt.s32.totalorder %v3076_v30, 8  ;;  %v3296_v16 = vadd.f32 %v3295_v1, %v3265_v21  ;;  %v3267_v44 = vsel %vm3107_vm10, %v3203_v62, 0.0 }
 0x1ab   :  { %v2945_v23 = vsub.f32 %v7487_v59, %v7486_v40  ;;  %v3205_v25 = vcombine.low %v2942_v4, %v2943_v61  ;;  %vm3109_vm13 = vcmp.lt.s32.totalorder %v3077_v51, 8  ;;  %v3268_v12 = vsel %vm3108_vm12, %v3204_v29, 0.0 }
 0x1ac   :  { %v3297_v52 = vadd.f32 %v3296_v16, %v3266_v60  ;;  %vm3110_vm14 = vcmp.lt.s32.totalorder %v3078_v57, 8 }
 0x1ad   :  { %v3206_v32 = vcombine.low %v2944_v63, %v2945_v23  ;;  %v3269_v15 = vsel %vm3109_vm13, %v3205_v25, 0.0 }
 0x1ae   :  { %v3298_v38 = vadd.f32 %v3297_v52, %v3267_v44 }
 0x1af   :  { %v3270_v46 = vsel %vm3110_vm14, %v3206_v32, 0.0 }
 0x1b0   :  { %v3299_v48 = vadd.f32 %v3298_v38, %v3268_v12 }
 0x1b2   :  { %v3300_v58 = vadd.f32 %v3299_v48, %v3269_v15 }
 0x1b4   :  { %v3301_v27 = vadd.f32 %v3300_v58, %v3270_v46 }
 0x1b6   :  { %3305 = vst [vmem:[#allocation5] sm:$0xff] %v3301_v27 }
 0x1b7   :  { %3524 = shalt.err (!%p3521_p12)
}
 0x1b8   :  { %s3525_s11 = scalar_lea.hbm %s6324_s2, 128 }
 0x1b9   :  { %p3526_p13 = scmp.ne.s32.totalorder %s6324_s2, %s3525_s11  ;;  %p3529_p0 = scmp.lt.u32.totalorder %s3525_s11, %s6324_s2 }
 0x1bb   :  { %p3531_p1 = pnand %p3529_p0, %p3526_p13 }
 0x1bd   :  { %3534 = shalt.err (!%p3531_p1)
}
 0x1be   :  { %3315 = dma.vmem_to_hbm [thread:$0]  %s3313_s7, 128, %s6324_s2, [#allocation4]  }
 0x1bf   :  { %3537 = dma.done.wait [#allocation4], 128  }
 0x1c0   :  { %3538 = vsyncadd [#allocation4], 4294967168 }
 0x1c1   :  { %3319 = vsyncpa [#allocation3], 1 }
 0x1c2   :  { %3320 = vsyncpa [#allocation4], 1 }

</bundles_post_ra>
